<compile_context>
chip_gen: v7x
topology: tpu7x:2x2x1
jax: 0.10.0
libtpu: 0.0.40
codegen_flags: <defaults>
</compile_context>

<pallas_src>
import math
from functools import partial

import jax
import jax.numpy as jnp
from jax.experimental import pallas as pl
from jax.experimental.pallas import tpu as pltpu

VMEM = pltpu.MemorySpace.VMEM


def _vmem_limit_bytes():
    """Scoped-VMEM budget: 3/4 of physical VMEM, clamped to [32 MB, 100 MB]."""
    cap = 64 * 1024 * 1024
    try:
        cap = int(pltpu.get_tpu_info().vmem_capacity_bytes)
    except Exception:
        pass
    return int(min(max(cap * 3 // 4, 32 * 1024 * 1024), 100 * 1024 * 1024))


VMEM_LIMIT = _vmem_limit_bytes()


def _vspec():
    return pl.BlockSpec(memory_space=VMEM)


def _pick_tile(dim, prefs):
    """Largest preferred tile dividing `dim`; else a preferred tile to pad up to;
    else the (small) full dim."""
    for t in prefs:
        if dim % t == 0:
            return t
    for t in prefs:
        if dim > t:
            return t          # caller pads dim up to a multiple of t
    return dim                # tiny dim: one full-size tile


def _round_up(x, m):
    return (x + m - 1) // m * m


def _batch_tile(b, max_tb=8):
    for tb in range(min(b, max_tb), 0, -1):
        if b % tb == 0:
            return tb
    return 1


def _gelu_tanh(x):
    # tanh-based GELU: the bulk of the work is one EUP tanh per element.
    c = math.sqrt(2.0 / math.pi)
    return 0.5 * x * (1.0 + jnp.tanh(c * (x + 0.044715 * x * x * x)))


def _layernorm(x, g, b, eps):
    mu = jnp.mean(x, axis=-1, keepdims=True)
    xc = x - mu
    var = jnp.mean(xc * xc, axis=-1, keepdims=True)
    return xc * jax.lax.rsqrt(var + eps) * g + b


# ----------------------------------------------------------------------------
# Tiled linear (used for the patch embedding matmul)
# ----------------------------------------------------------------------------
def matmul_kernel(x_ref, w_ref, b_ref, o_ref, acc_ref):
    @pl.when(pl.program_id(2) == 0)
    def _():
        acc_ref[...] = jnp.zeros_like(acc_ref)

    acc_ref[...] += jnp.dot(x_ref[...], w_ref[...],
                            preferred_element_type=jnp.float32)

    @pl.when(pl.program_id(2) == pl.num_programs(2) - 1)
    def _():
        o_ref[...] = (acc_ref[...] + b_ref[...]).astype(o_ref.dtype)


def linear(x, w, b):
    """Tiled (M, K) @ (K, N) + (N,) -> (M, N) fp32, fp32 VMEM accumulator.
    Non-divisible dims are padded up to the tile (never a giant full-dim tile)."""
    M, K = x.shape
    N = w.shape[1]
    x = x.astype(w.dtype)                           # bf16 operands when w is bf16
    tm = _pick_tile(M, (512, 256, 128))
    tn = _pick_tile(N, (512, 256, 128))
    tk = _pick_tile(K, (1024, 512, 256))
    Mp, Np, Kp = _round_up(M, tm), _round_up(N, tn), _round_up(K, tk)
    if (Mp, Kp) != (M, K):
        x = jnp.pad(x, ((0, Mp - M), (0, Kp - K)))
    if (Kp, Np) != (K, N):
        w = jnp.pad(w, ((0, Kp - K), (0, Np - N)))
    b2 = b.reshape(1, N).astype(jnp.float32)
    if Np != N:
        b2 = jnp.pad(b2, ((0, 0), (0, Np - N)))

    grid = (Mp // tm, Np // tn, Kp // tk)
    bytes_accessed = (Mp * Kp + Kp * Np) * x.dtype.itemsize + Mp * Np * 4
    out = pl.pallas_call(
        matmul_kernel,
        out_shape=jax.ShapeDtypeStruct((Mp, Np), jnp.float32),
        grid_spec=pltpu.PrefetchScalarGridSpec(
            num_scalar_prefetch=0,
            grid=grid,
            in_specs=[pl.BlockSpec((tm, tk), lambda i, j, k: (i, k)),
                      pl.BlockSpec((tk, tn), lambda i, j, k: (k, j)),
                      pl.BlockSpec((1, tn), lambda i, j, k: (0, j))],
            out_specs=pl.BlockSpec((tm, tn), lambda i, j, k: (i, j)),
            scratch_shapes=[pltpu.VMEM((tm, tn), jnp.float32)]),
        compiler_params=pltpu.CompilerParams(
            dimension_semantics=("parallel", "parallel", "arbitrary"),
            vmem_limit_bytes=VMEM_LIMIT),
        cost_estimate=pl.CostEstimate(flops=2 * M * N * K, transcendentals=0,
                                      bytes_accessed=bytes_accessed),
    )(x, w, b2)
    if (Mp, Np) != (M, N):
        out = out[:M, :N]
    return out


# ----------------------------------------------------------------------------
# Fused transformer block (text post-LN layer & ViT pre-LN block)
# ----------------------------------------------------------------------------
def fused_block_kernel(n_heads, eps, pre_ln,
                       x_ref, wqkv_ref, bqkv_ref, wo_ref, bo_ref,
                       ln1_g_ref, ln1_b_ref, ln2_g_ref, ln2_b_ref,
                       w1_ref, b1_ref, w2_ref, b2_ref,
                       o_ref, heads_scratch):
    TB, L, W = x_ref.shape
    dh = W // n_heads
    scale = 1.0 / math.sqrt(dh)

    x = x_ref[...].astype(jnp.float32).reshape(TB * L, W)     # (TB*L, W) fp32

    def mm(a_f32, w_ref, b_ref):
        # bf16 operands on the MXU, fp32 accumulation.
        return (jnp.dot(a_f32.astype(jnp.bfloat16), w_ref[...],
                        preferred_element_type=jnp.float32) + b_ref[...])

    attn_in = _layernorm(x, ln1_g_ref[...], ln1_b_ref[...], eps) if pre_ln else x

    # Fused QKV projection: one (TB*L, W) @ (W, 3W) MXU pass.
    qkv = mm(attn_in, wqkv_ref, bqkv_ref)                     # (TB*L, 3W) fp32
    # Cast once (not per head); fold 1/sqrt(dh) into q.
    q = (qkv[:, 0 * W:1 * W] * scale).astype(jnp.bfloat16).reshape(TB, L, W)
    k = qkv[:, 1 * W:2 * W].astype(jnp.bfloat16).reshape(TB, L, W)
    v = qkv[:, 2 * W:3 * W].astype(jnp.bfloat16).reshape(TB, L, W)

    # Per-head attention, batched over the TB sequences of this grid step.
    # Head outputs are collected into a (TB, L, W) fp32 scratch so the output
    # projection is a single K=W matmul afterwards.
    for h in range(n_heads):
        sl = slice(h * dh, (h + 1) * dh)
        qh, kh, vh = q[:, :, sl], k[:, :, sl], v[:, :, sl]    # (TB, L, dh)
        s = jnp.einsum('bqd,bkd->bqk', qh, kh,
                       preferred_element_type=jnp.float32)    # (TB, L, L)
        s = s - jnp.max(s, axis=-1, keepdims=True)
        p = jnp.exp(s)
        p = p * pl.reciprocal(jnp.sum(p, axis=-1, keepdims=True), approx=True)
        heads_scratch[:, :, sl] = jnp.einsum(
            'bqk,bkd->bqd', p.astype(jnp.bfloat16), vh,
            preferred_element_type=jnp.float32)

    ctx = heads_scratch[...].reshape(TB * L, W)
    attn = mm(ctx, wo_ref, bo_ref)                            # (TB*L, W) fp32

    if pre_ln:                       # torchvision ViT encoder block (pre-LN)
        x1 = x + attn
        mlp_in = _layernorm(x1, ln2_g_ref[...], ln2_b_ref[...], eps)
    else:                            # PyTorch post-LN TransformerEncoderLayer
        x1 = _layernorm(x + attn, ln1_g_ref[...], ln1_b_ref[...], eps)
        mlp_in = x1

    ff = mm(mlp_in, w1_ref, b1_ref)
    ff = _gelu_tanh(ff)
    ff = mm(ff, w2_ref, b2_ref)

    out = (x1 + ff) if pre_ln else _layernorm(x1 + ff,
                                              ln2_g_ref[...], ln2_b_ref[...], eps)
    o_ref[...] = out.reshape(TB, L, W).astype(o_ref.dtype)


def transformer_block(x, p, n_heads, *, pre_ln, eps):
    """One fused transformer block; grid over batch tiles (parallel -> megacore).

    Activations enter/leave as bf16; weights/biases/LN params are grid-invariant
    whole-array VMEM operands (single resident copy, no double buffering)."""
    B, L, W = x.shape
    F = p['w1'].shape[1]
    TB = _batch_tile(B)
    x = x.astype(jnp.bfloat16)                  # bf16 inter-block activations

    wspec = _vspec()                            # resident, single-buffered

    flops = B * (2 * L * W * 3 * W + 4 * L * L * W + 2 * L * W * W + 4 * L * W * F)
    transcendentals = B * (n_heads * L * L + L * F)
    bytes_accessed = (2 * B * L * W * 2                       # bf16 in + out
                      + 2 * (3 * W * W + W * W + 2 * W * F)   # bf16 weights
                      + 4 * (9 * W + F))                      # fp32 biases / LN

    return pl.pallas_call(
        partial(fused_block_kernel, n_heads, eps, pre_ln),
        out_shape=jax.ShapeDtypeStruct((B, L, W), jnp.bfloat16),
        grid=(B // TB,),
        in_specs=[pl.BlockSpec((TB, L, W), lambda b: (b, 0, 0))] + [wspec] * 12,
        out_specs=pl.BlockSpec((TB, L, W), lambda b: (b, 0, 0)),
        scratch_shapes=[pltpu.VMEM((TB, L, W), jnp.float32)],
        compiler_params=pltpu.CompilerParams(
            dimension_semantics=("parallel",),
            vmem_limit_bytes=VMEM_LIMIT),
        cost_estimate=pl.CostEstimate(flops=flops, transcendentals=transcendentals,
                                      bytes_accessed=bytes_accessed),
    )(x,
      p['wqkv'], p['bqkv'].reshape(1, -1),
      p['wo'], p['bo'].reshape(1, -1),
      p['ln1_g'].reshape(1, -1), p['ln1_b'].reshape(1, -1),
      p['ln2_g'].reshape(1, -1), p['ln2_b'].reshape(1, -1),
      p['w1'], p['b1'].reshape(1, -1),
      p['w2'], p['b2'].reshape(1, -1))


# ----------------------------------------------------------------------------
# Fused CLIP head: ViT final LN + heads + projections + norm + logits + loss
# ----------------------------------------------------------------------------
def clip_head_kernel(t_ref, tpw_ref, tpb_ref,
                     ic_ref, lng_ref, lnb_ref, hw_ref, hb_ref,
                     vpw_ref, vpb_ref, s_ref,
                     logits_ref, loss_ref):
    # Text projection.
    t = t_ref[...].astype(jnp.float32)                                  # (B, W)
    tfeat = jnp.dot(t, tpw_ref[...],
                    preferred_element_type=jnp.float32) + tpb_ref[...]  # (B, E)

    # ViT final LN (per-row, so LN of the cls row alone is exact), head, proj.
    ic = ic_ref[...].astype(jnp.float32)                                # (B, D)
    iln = _layernorm(ic, lng_ref[...], lnb_ref[...], 1e-6)
    ih = jnp.dot(iln, hw_ref[...],
                 preferred_element_type=jnp.float32) + hb_ref[...]
    ifeat = jnp.dot(ih, vpw_ref[...],
                    preferred_element_type=jnp.float32) + vpb_ref[...]  # (B, E)

    # L2 normalisation via rsqrt (EUP) with a tiny eps against zero rows.
    tn = tfeat * jax.lax.rsqrt(
        jnp.sum(tfeat * tfeat, axis=-1, keepdims=True) + 1e-12)
    im = ifeat * jax.lax.rsqrt(
        jnp.sum(ifeat * ifeat, axis=-1, keepdims=True) + 1e-12)

    scale = jnp.exp(s_ref[...])                                         # (1, 1)
    # Contract last dims directly (no in-kernel transpose of image features).
    logits = jax.lax.dot_general(tn, im, (((1,), (1,)), ((), ())),
                                 preferred_element_type=jnp.float32) * scale
    logits_ref[...] = logits

    B = logits.shape[0]
    diag_mask = (jax.lax.broadcasted_iota(jnp.int32, (B, B), 0) ==
                 jax.lax.broadcasted_iota(jnp.int32, (B, B), 1))
    diag_sel = jnp.where(diag_mask, logits, 0.0)

    # loss_i: cross-entropy over rows, labels = arange(B)
    diag_r = jnp.sum(diag_sel, axis=1, keepdims=True)
    m_r = jnp.max(logits, axis=1, keepdims=True)
    lse_r = m_r + jnp.log(jnp.sum(jnp.exp(logits - m_r), axis=1, keepdims=True))
    loss_i = jnp.mean(lse_r - diag_r)

    # loss_t: cross-entropy over columns (logits.T)
    diag_c = jnp.sum(diag_sel, axis=0, keepdims=True)
    m_c = jnp.max(logits, axis=0, keepdims=True)
    lse_c = m_c + jnp.log(jnp.sum(jnp.exp(logits - m_c), axis=0, keepdims=True))
    loss_t = jnp.mean(lse_c - diag_c)

    loss_ref[...] = jnp.reshape((loss_i + loss_t) * 0.5, (1, 1))


def clip_head(t_pool, i_cls, p_text, p_vis, logit_scale):
    B = t_pool.shape[0]
    logits, loss = pl.pallas_call(
        clip_head_kernel,
        out_shape=(jax.ShapeDtypeStruct((B, B), jnp.float32),
                   jax.ShapeDtypeStruct((1, 1), jnp.float32)),
        in_specs=[_vspec()] * 11,
        out_specs=(_vspec(), _vspec()),
        compiler_params=pltpu.CompilerParams(vmem_limit_bytes=VMEM_LIMIT),
    )(t_pool, p_text['tproj_w'], p_text['tproj_b'].reshape(1, -1),
      i_cls, p_vis['ln_g'].reshape(1, -1), p_vis['ln_b'].reshape(1, -1),
      p_vis['head_w'], p_vis['head_b'].reshape(1, -1),
      p_vis['vproj_w'], p_vis['vproj_b'].reshape(1, -1),
      logit_scale.reshape(1, 1))
    return logits, loss[0, 0]


# ----------------------------------------------------------------------------
# Model glue (reshapes / patch extraction / block stacking)
# ----------------------------------------------------------------------------
IMNET_MEAN = (0.485, 0.456, 0.406)
IMNET_STD = (0.229, 0.224, 0.225)


def _fold_normalize_into_patch(w, b, ps):
    """Fold (x - mean)/std (per input channel) into the patch-embedding weights.

    Patch rows are the (C, ps, ps) receptive field flattened, so the channel of
    row k is k // (ps*ps).  out = ((x - m)/s) @ W + b = x @ (W/s) + (b - (m/s) @ W).
    """
    mean = jnp.asarray(IMNET_MEAN, jnp.float32)
    std = jnp.asarray(IMNET_STD, jnp.float32)
    row_ch = jnp.repeat(jnp.arange(3), ps * ps)                 # (3*ps*ps,)
    inv_std = (1.0 / std)[row_ch][:, None]                      # (K, 1)
    mean_r = mean[row_ch][:, None]                              # (K, 1)
    w32 = w.astype(jnp.float32)
    w_fold = (w32 * inv_std).astype(w.dtype)
    b_fold = b - jnp.sum(w32 * (mean_r * inv_std), axis=0)
    return w_fold, b_fold


def encode_image(img, p, cfg):
    """img: (B, 3, H, W) NCHW (PyTorch convention) -> cls-token features."""
    B, C, H, W = img.shape
    ps = cfg['patch']
    gh, gw = H // ps, W // ps
    # ImageNet normalisation is folded into the patch weights (no image pass).
    patches = (img.reshape(B, C, gh, ps, gw, ps)
                  .transpose(0, 2, 4, 1, 3, 5)
                  .reshape(B * gh * gw, C * ps * ps))
    pw, pb = _fold_normalize_into_patch(p['patch_w'], p['patch_b'], ps)
    D = cfg['vit_width']
    x = linear(patches, pw, pb)                               # patch conv as matmul
    x = x.reshape(B, gh * gw, D)
    cls = jnp.broadcast_to(p['cls_token'], (B, 1, D))
    x = jnp.concatenate([cls, x], axis=1)                     # (B, 1+n, D)
    x = x + p['pos_embed']
    for blk in p['blocks']:
        x = transformer_block(x, blk, cfg['vit_heads'], pre_ln=True, eps=1e-6)
    # Final LN + classification head + vision projection are fused in clip_head.
    return x[:, 0, :]                                         # class token


def encode_text(txt, p, cfg):
    """txt: (B, context_length, transformer_width) -> last-token features."""
    x = txt + p['pos_embed']                                  # broadcast (L, W)
    for layer in p['layers']:
        x = transformer_block(x, layer, cfg['text_heads'], pre_ln=False, eps=1e-5)
    return x[:, -1, :]                                        # text_projection fused in head


def clip_forward(text, image, params, cfg):
    t_pool = encode_text(text, params['text'], cfg)
    i_cls = encode_image(image, params['vision'], cfg)
    return clip_head(t_pool, i_cls, params['text'], params['vision'],
                     params['logit_scale'])


# ----------------------------------------------------------------------------
# Deterministic parameter init (matmul weights stored in bf16, rest fp32)
# ----------------------------------------------------------------------------
def init_params(key, cfg):
    keys = iter(jax.random.split(key, 512))

    def nrm(shape, scale=0.02):
        return scale * jax.random.normal(next(keys), shape, jnp.float32)

    def zeros(shape):
        return jnp.zeros(shape, jnp.float32)

    def ones(shape):
        return jnp.ones(shape, jnp.float32)

    def bf16(x):
        return x.astype(jnp.bfloat16)

    def block_params(w, ffn):
        return dict(
            wqkv=bf16(nrm((w, 3 * w))), bqkv=zeros((3 * w,)),
            wo=bf16(nrm((w, w))), bo=zeros((w,)),
            ln1_g=ones((w,)), ln1_b=zeros((w,)),
            ln2_g=ones((w,)), ln2_b=zeros((w,)),
            w1=bf16(nrm((w, ffn))), b1=zeros((ffn,)),
            w2=bf16(nrm((ffn, w))), b2=zeros((w,)))

    W, E = cfg['text_width'], cfg['embed_size']
    text = dict(
        pos_embed=nrm((cfg['context_length'], W)),
        layers=[block_params(W, cfg['text_ffn'])
                for _ in range(cfg['text_layers'])],
        tproj_w=nrm((W, E)), tproj_b=zeros((E,)),
    )

    D, ps = cfg['vit_width'], cfg['patch']
    n_patches = (cfg['image_size'] // ps) ** 2
    vision = dict(
        patch_w=bf16(nrm((3 * ps * ps, D))), patch_b=zeros((D,)),
        cls_token=nrm((1, 1, D)),
        pos_embed=nrm((1, n_patches + 1, D)),
        blocks=[block_params(D, cfg['vit_mlp'])
                for _ in range(cfg['vit_layers'])],
        ln_g=ones((D,)), ln_b=zeros((D,)),
        head_w=nrm((D, cfg['head_out'])), head_b=zeros((cfg['head_out'],)),
        vproj_w=nrm((cfg['head_out'], E)), vproj_b=zeros((E,)),
    )
    return dict(text=text, vision=vision,
                logit_scale=jnp.array(math.log(1.0 / 0.07), jnp.float32))


# ----------------------------------------------------------------------------
if __name__ == "__main__":
    cfg = dict(embed_size=32,
               text_width=32, text_heads=4, text_layers=2, text_ffn=64,
               context_length=8,
               vit_width=32, vit_heads=4, vit_layers=2, vit_mlp=64,
               patch=16, image_size=32, head_out=16)

    key = jax.random.PRNGKey(0)
    kp, kt, ki = jax.random.split(key, 3)
    params = init_params(kp, cfg)

    B = 2
    text = jax.random.normal(
        kt, (B, cfg['context_length'], cfg['text_width']), jnp.float32)
    image = jax.random.uniform(
        ki, (B, 3, cfg['image_size'], cfg['image_size']), jnp.float32)

    fwd = jax.jit(lambda t, i, p: clip_forward(t, i, p, cfg))
    logits, loss = fwd(text, image, params)
    jax.block_until_ready((logits, loss))
    assert logits.shape == (B, B)
    assert loss.shape == ()
    assert bool(jnp.isfinite(loss))
    print("KERNEL_OK")
</pallas_src>

<mosaic_0001>
module attributes {stable_mosaic.version = 11 : i64} {
  func.func @matmul_kernel(%arg0: i32, %arg1: i32, %arg2: i32, %arg3: memref<8x256xbf16, #tpu.memory_space<vmem>>, %arg4: memref<256x32xbf16, #tpu.memory_space<vmem>>, %arg5: memref<1x32xf32, #tpu.memory_space<vmem>>, %arg6: memref<8x32xf32, #tpu.memory_space<vmem>>, %arg7: memref<8x32xf32, #tpu.memory_space<vmem>>) attributes {dimension_semantics = [#tpu.dimension_semantics<parallel>, #tpu.dimension_semantics<parallel>, #tpu.dimension_semantics<arbitrary>], iteration_bounds = array<i64: 1, 1, 3>, scalar_prefetch = 0 : i64, scratch_operands = 1 : i64, tpu.core_type = #tpu.core_type<tc>, window_params = [{transform_indices = @transform_0, window_bounds = array<i64: 8, 256>}, {transform_indices = @transform_1, window_bounds = array<i64: 256, 32>}, {transform_indices = @transform_2, window_bounds = array<i64: 1, 32>}, {transform_indices = @transform_3, window_bounds = array<i64: 8, 32>}]} {
    %c0_i32 = arith.constant 0 : i32
    %0 = arith.cmpi eq, %arg2, %c0_i32 : i32
    %1 = arith.extui %0 : i1 to i32
    %c0_i32_0 = arith.constant 0 : i32
    %2 = arith.cmpi ne, %1, %c0_i32_0 : i32
    scf.if %2 {
      %cst_9 = arith.constant 0.000000e+00 : f32
      %12 = vector.broadcast %cst_9 : f32 to vector<8x32xf32>
      %c0_10 = arith.constant 0 : index
      %c0_11 = arith.constant 0 : index
      %13 = vector.load %arg7[%c0_10, %c0_11] : memref<8x32xf32, #tpu.memory_space<vmem>>, vector<8x32xf32>
      tpu.vector_store %arg7[%c0_10, %c0_11], %12 {strides = array<i32>} : memref<8x32xf32, #tpu.memory_space<vmem>>, vector<8x32xf32>,
    } else {
    }
    %c0 = arith.constant 0 : index
    %c0_1 = arith.constant 0 : index
    %3 = vector.load %arg7[%c0, %c0_1] : memref<8x32xf32, #tpu.memory_space<vmem>>, vector<8x32xf32>
    %c0_2 = arith.constant 0 : index
    %c0_3 = arith.constant 0 : index
    %4 = vector.load %arg3[%c0_2, %c0_3] : memref<8x256xbf16, #tpu.memory_space<vmem>>, vector<8x256xbf16>
    %c0_4 = arith.constant 0 : index
    %c0_5 = arith.constant 0 : index
    %5 = vector.load %arg4[%c0_4, %c0_5] : memref<256x32xbf16, #tpu.memory_space<vmem>>, vector<256x32xbf16>
    %cst = arith.constant dense<0.000000e+00> : vector<8x32xf32>
    %6 = tpu.matmul %4, %5, %cst {dimension_numbers = #tpu.dot_dimension_numbers<[1], [0], [0], [1], [0, 0, 1, 1], [], []>} : vector<8x256xbf16>, vector<256x32xbf16>, vector<8x32xf32> -> vector<8x32xf32>
    %7 = arith.addf %3, %6 : vector<8x32xf32>
    %c0_6 = arith.constant 0 : index
    %c0_7 = arith.constant 0 : index
    %8 = vector.load %arg7[%c0_6, %c0_7] : memref<8x32xf32, #tpu.memory_space<vmem>>, vector<8x32xf32>
    tpu.vector_store %arg7[%c0_6, %c0_7], %7 {strides = array<i32>} : memref<8x32xf32, #tpu.memory_space<vmem>>, vector<8x32xf32>,
    %c2_i32 = arith.constant 2 : i32
    %9 = arith.cmpi eq, %arg2, %c2_i32 : i32
    %10 = arith.extui %9 : i1 to i32
    %c0_i32_8 = arith.constant 0 : i32
    %11 = arith.cmpi ne, %10, %c0_i32_8 : i32
    scf.if %11 {
      %c0_9 = arith.constant 0 : index
      %c0_10 = arith.constant 0 : index
      %12 = vector.load %arg7[%c0_9, %c0_10] : memref<8x32xf32, #tpu.memory_space<vmem>>, vector<8x32xf32>
      %c0_11 = arith.constant 0 : index
      %c0_12 = arith.constant 0 : index
      %13 = vector.load %arg5[%c0_11, %c0_12] : memref<1x32xf32, #tpu.memory_space<vmem>>, vector<1x32xf32>
      %14 = vector.broadcast %13 : vector<1x32xf32> to vector<8x32xf32>
      %15 = arith.addf %12, %14 : vector<8x32xf32>
      %c0_13 = arith.constant 0 : index
      %c0_14 = arith.constant 0 : index
      %16 = vector.load %arg6[%c0_13, %c0_14] : memref<8x32xf32, #tpu.memory_space<vmem>>, vector<8x32xf32>
      tpu.vector_store %arg6[%c0_13, %c0_14], %15 {strides = array<i32>} : memref<8x32xf32, #tpu.memory_space<vmem>>, vector<8x32xf32>,
    } else {
    }
    return
  }
  func.func @transform_0(%arg0: i32, %arg1: i32, %arg2: i32) -> (i32, i32) {
    %c0_i32 = arith.constant 0 : i32
    return %arg0, %arg2 : i32, i32
  }
  func.func @transform_1(%arg0: i32, %arg1: i32, %arg2: i32) -> (i32, i32) {
    %c0_i32 = arith.constant 0 : i32
    return %arg2, %arg1 : i32, i32
  }
  func.func @transform_2(%arg0: i32, %arg1: i32, %arg2: i32) -> (i32, i32) {
    %c0_i32 = arith.constant 0 : i32
    %c0_i32_0 = arith.constant 0 : i32
    return %c0_i32, %arg1 : i32, i32
  }
  func.func @transform_3(%arg0: i32, %arg1: i32, %arg2: i32) -> (i32, i32) {
    %c0_i32 = arith.constant 0 : i32
    return %arg0, %arg1 : i32, i32
  }
}

module attributes {stable_mosaic.version = 11 : i64} {
  func.func @fused_block_kernel(%arg0: i32, %arg1: memref<2x5x32xbf16, #tpu.memory_space<vmem>>, %arg2: memref<32x96xbf16, #tpu.memory_space<vmem>>, %arg3: memref<1x96xf32, #tpu.memory_space<vmem>>, %arg4: memref<32x32xbf16, #tpu.memory_space<vmem>>, %arg5: memref<1x32xf32, #tpu.memory_space<vmem>>, %arg6: memref<1x32xf32, #tpu.memory_space<vmem>>, %arg7: memref<1x32xf32, #tpu.memory_space<vmem>>, %arg8: memref<1x32xf32, #tpu.memory_space<vmem>>, %arg9: memref<1x32xf32, #tpu.memory_space<vmem>>, %arg10: memref<32x64xbf16, #tpu.memory_space<vmem>>, %arg11: memref<1x64xf32, #tpu.memory_space<vmem>>, %arg12: memref<64x32xbf16, #tpu.memory_space<vmem>>, %arg13: memref<1x32xf32, #tpu.memory_space<vmem>>, %arg14: memref<2x5x32xbf16, #tpu.memory_space<vmem>>, %arg15: memref<2x5x32xf32, #tpu.memory_space<vmem>>) attributes {dimension_semantics = [#tpu.dimension_semantics<parallel>], iteration_bounds = array<i64: 1>, scalar_prefetch = 0 : i64, scratch_operands = 1 : i64, tpu.core_type = #tpu.core_type<tc>, window_params = [{transform_indices = @transform_0, window_bounds = array<i64: 2, 5, 32>}, {pipeline_mode = #tpu.pipeline_mode<synchronous>, transform_indices = @transform_1, window_bounds = array<i64: 32, 96>}, {pipeline_mode = #tpu.pipeline_mode<synchronous>, transform_indices = @transform_2, window_bounds = array<i64: 1, 96>}, {pipeline_mode = #tpu.pipeline_mode<synchronous>, transform_indices = @transform_3, window_bounds = array<i64: 32, 32>}, {pipeline_mode = #tpu.pipeline_mode<synchronous>, transform_indices = @transform_4, window_bounds = array<i64: 1, 32>}, {pipeline_mode = #tpu.pipeline_mode<synchronous>, transform_indices = @transform_5, window_bounds = array<i64: 1, 32>}, {pipeline_mode = #tpu.pipeline_mode<synchronous>, transform_indices = @transform_6, window_bounds = array<i64: 1, 32>}, {pipeline_mode = #tpu.pipeline_mode<synchronous>, transform_indices = @transform_7, window_bounds = array<i64: 1, 32>}, {pipeline_mode = #tpu.pipeline_mode<synchronous>, transform_indices = @transform_8, window_bounds = array<i64: 1, 32>}, {pipeline_mode = #tpu.pipeline_mode<synchronous>, transform_indices = @transform_9, window_bounds = array<i64: 32, 64>}, {pipeline_mode = #tpu.pipeline_mode<synchronous>, transform_indices = @transform_10, window_bounds = array<i64: 1, 64>}, {pipeline_mode = #tpu.pipeline_mode<synchronous>, transform_indices = @transform_11, window_bounds = array<i64: 64, 32>}, {pipeline_mode = #tpu.pipeline_mode<synchronous>, transform_indices = @transform_12, window_bounds = array<i64: 1, 32>}, {transform_indices = @transform_13, window_bounds = array<i64: 2, 5, 32>}]} {
    %c0 = arith.constant 0 : index
    %c0_0 = arith.constant 0 : index
    %c0_1 = arith.constant 0 : index
    %0 = vector.load %arg1[%c0, %c0_0, %c0_1] : memref<2x5x32xbf16, #tpu.memory_space<vmem>>, vector<2x5x32xbf16>
    %1 = arith.extf %0 : vector<2x5x32xbf16> to vector<2x5x32xf32>
    %2 = vector.shape_cast %1 : vector<2x5x32xf32> to vector<10x32xf32>
    %c0_2 = arith.constant 0 : index
    %c0_3 = arith.constant 0 : index
    %3 = vector.load %arg6[%c0_2, %c0_3] : memref<1x32xf32, #tpu.memory_space<vmem>>, vector<1x32xf32>
    %c0_4 = arith.constant 0 : index
    %c0_5 = arith.constant 0 : index
    %4 = vector.load %arg7[%c0_4, %c0_5] : memref<1x32xf32, #tpu.memory_space<vmem>>, vector<1x32xf32>
    %cst = arith.constant dense<0.000000e+00> : vector<10xf32>
    %5 = vector.multi_reduction <add>, %2, %cst [1] : vector<10x32xf32> to vector<10xf32>
    %6 = vector.shape_cast %5 : vector<10xf32> to vector<10x1xf32>
    %cst_6 = arith.constant 3.200000e+01 : f32
    %7 = vector.broadcast %cst_6 : f32 to vector<10x1xf32>
    %8 = arith.divf %6, %7 : vector<10x1xf32>
    %9 = vector.broadcast %8 : vector<10x1xf32> to vector<10x32xf32>
    %10 = arith.subf %2, %9 : vector<10x32xf32>
    %11 = arith.mulf %10, %10 : vector<10x32xf32>
    %cst_7 = arith.constant dense<0.000000e+00> : vector<10xf32>
    %12 = vector.multi_reduction <add>, %11, %cst_7 [1] : vector<10x32xf32> to vector<10xf32>
    %13 = vector.shape_cast %12 : vector<10xf32> to vector<10x1xf32>
    %cst_8 = arith.constant 3.200000e+01 : f32
    %14 = vector.broadcast %cst_8 : f32 to vector<10x1xf32>
    %15 = arith.divf %13, %14 : vector<10x1xf32>
    %cst_9 = arith.constant 9.99999997E-7 : f32
    %16 = vector.broadcast %cst_9 : f32 to vector<10x1xf32>
    %17 = arith.addf %15, %16 : vector<10x1xf32>
    %18 = math.rsqrt %17 : vector<10x1xf32>
    %19 = vector.broadcast %18 : vector<10x1xf32> to vector<10x32xf32>
    %20 = arith.mulf %10, %19 : vector<10x32xf32>
    %21 = vector.broadcast %3 : vector<1x32xf32> to vector<10x32xf32>
    %22 = arith.mulf %20, %21 : vector<10x32xf32>
    %23 = vector.broadcast %4 : vector<1x32xf32> to vector<10x32xf32>
    %24 = arith.addf %22, %23 : vector<10x32xf32>
    %25 = arith.truncf %24 : vector<10x32xf32> to vector<10x32xbf16>
    %c0_10 = arith.constant 0 : index
    %c0_11 = arith.constant 0 : index
    %26 = vector.load %arg2[%c0_10, %c0_11] : memref<32x96xbf16, #tpu.memory_space<vmem>>, vector<32x96xbf16>
    %cst_12 = arith.constant dense<0.000000e+00> : vector<10x96xf32>
    %27 = tpu.matmul %25, %26, %cst_12 {dimension_numbers = #tpu.dot_dimension_numbers<[1], [0], [0], [1], [0, 0, 1, 1], [], []>} : vector<10x32xbf16>, vector<32x96xbf16>, vector<10x96xf32> -> vector<10x96xf32>
    %c0_13 = arith.constant 0 : index
    %c0_14 = arith.constant 0 : index
    %28 = vector.load %arg3[%c0_13, %c0_14] : memref<1x96xf32, #tpu.memory_space<vmem>>, vector<1x96xf32>
    %29 = vector.broadcast %28 : vector<1x96xf32> to vector<10x96xf32>
    %30 = arith.addf %27, %29 : vector<10x96xf32>
    %31 = vector.extract_strided_slice %30 {offsets = [0, 0], sizes = [10, 32], strides = [1, 1]} : vector<10x96xf32> to vector<10x32xf32>
    %cst_15 = arith.constant 0.353553385 : f32
    %32 = vector.broadcast %cst_15 : f32 to vector<10x32xf32>
    %33 = arith.mulf %31, %32 : vector<10x32xf32>
    %34 = arith.truncf %33 : vector<10x32xf32> to vector<10x32xbf16>
    %35 = vector.shape_cast %34 : vector<10x32xbf16> to vector<2x5x32xbf16>
    %36 = vector.extract_strided_slice %30 {offsets = [0, 32], sizes = [10, 32], strides = [1, 1]} : vector<10x96xf32> to vector<10x32xf32>
    %37 = arith.truncf %36 : vector<10x32xf32> to vector<10x32xbf16>
    %38 = vector.shape_cast %37 : vector<10x32xbf16> to vector<2x5x32xbf16>
    %39 = vector.extract_strided_slice %30 {offsets = [0, 64], sizes = [10, 32], strides = [1, 1]} : vector<10x96xf32> to vector<10x32xf32>
    %40 = arith.truncf %39 : vector<10x32xf32> to vector<10x32xbf16>
    %41 = vector.shape_cast %40 : vector<10x32xbf16> to vector<2x5x32xbf16>
    %42 = vector.extract_strided_slice %35 {offsets = [0, 0, 0], sizes = [2, 5, 8], strides = [1, 1, 1]} : vector<2x5x32xbf16> to vector<2x5x8xbf16>
    %43 = vector.extract_strided_slice %38 {offsets = [0, 0, 0], sizes = [2, 5, 8], strides = [1, 1, 1]} : vector<2x5x32xbf16> to vector<2x5x8xbf16>
    %44 = vector.extract_strided_slice %41 {offsets = [0, 0, 0], sizes = [2, 5, 8], strides = [1, 1, 1]} : vector<2x5x32xbf16> to vector<2x5x8xbf16>
    "tpu.trace_start"() <{level = 10 : i32, message = "bqd,bkd->bqk"}> : () -> ()
    %cst_16 = arith.constant dense<0.000000e+00> : vector<2x5x5xf32>
    %45 = tpu.matmul %42, %43, %cst_16 {dimension_numbers = #tpu.dot_dimension_numbers<[2], [2], [1], [1], [0, 0, 0, 1, 1, 1], [0], [0]>} : vector<2x5x8xbf16>, vector<2x5x8xbf16>, vector<2x5x5xf32> -> vector<2x5x5xf32>
    "tpu.trace_stop"() : () -> ()
    %cst_17 = arith.constant dense<0xFF800000> : vector<2x5xf32>
    %46 = vector.multi_reduction <maximumf>, %45, %cst_17 [2] : vector<2x5x5xf32> to vector<2x5xf32>
    %47 = vector.shape_cast %46 : vector<2x5xf32> to vector<2x5x1xf32>
    %48 = vector.broadcast %47 : vector<2x5x1xf32> to vector<2x5x5xf32>
    %49 = arith.subf %45, %48 : vector<2x5x5xf32>
    %50 = math.exp %49 : vector<2x5x5xf32>
    %cst_18 = arith.constant dense<0.000000e+00> : vector<2x5xf32>
    %51 = vector.multi_reduction <add>, %50, %cst_18 [2] : vector<2x5x5xf32> to vector<2x5xf32>
    %52 = vector.shape_cast %51 : vector<2x5xf32> to vector<2x5x1xf32>
    %53 = tpu.reciprocal %52 {approx = true} : vector<2x5x1xf32> -> vector<2x5x1xf32>
    %54 = vector.broadcast %53 : vector<2x5x1xf32> to vector<2x5x5xf32>
    %55 = arith.mulf %50, %54 : vector<2x5x5xf32>
    %56 = arith.truncf %55 : vector<2x5x5xf32> to vector<2x5x5xbf16>
    "tpu.trace_start"() <{level = 10 : i32, message = "bqk,bkd->bqd"}> : () -> ()
    %cst_19 = arith.constant dense<0.000000e+00> : vector<2x5x8xf32>
    %57 = tpu.matmul %56, %44, %cst_19 {dimension_numbers = #tpu.dot_dimension_numbers<[2], [1], [1], [2], [0, 0, 0, 1, 1, 2], [0], [0]>} : vector<2x5x5xbf16>, vector<2x5x8xbf16>, vector<2x5x8xf32> -> vector<2x5x8xf32>
    "tpu.trace_stop"() : () -> ()
    %c0_20 = arith.constant 0 : index
    %c0_21 = arith.constant 0 : index
    %c0_22 = arith.constant 0 : index
    %58 = vector.load %arg15[%c0_20, %c0_21, %c0_22] : memref<2x5x32xf32, #tpu.memory_space<vmem>>, vector<2x5x8xf32>
    tpu.vector_store %arg15[%c0_20, %c0_21, %c0_22], %57 {strides = array<i32>} : memref<2x5x32xf32, #tpu.memory_space<vmem>>, vector<2x5x8xf32>,
    %59 = vector.extract_strided_slice %35 {offsets = [0, 0, 8], sizes = [2, 5, 8], strides = [1, 1, 1]} : vector<2x5x32xbf16> to vector<2x5x8xbf16>
    %60 = vector.extract_strided_slice %38 {offsets = [0, 0, 8], sizes = [2, 5, 8], strides = [1, 1, 1]} : vector<2x5x32xbf16> to vector<2x5x8xbf16>
    %61 = vector.extract_strided_slice %41 {offsets = [0, 0, 8], sizes = [2, 5, 8], strides = [1, 1, 1]} : vector<2x5x32xbf16> to vector<2x5x8xbf16>
    "tpu.trace_start"() <{level = 10 : i32, message = "bqd,bkd->bqk"}> : () -> ()
    %cst_23 = arith.constant dense<0.000000e+00> : vector<2x5x5xf32>
    %62 = tpu.matmul %59, %60, %cst_23 {dimension_numbers = #tpu.dot_dimension_numbers<[2], [2], [1], [1], [0, 0, 0, 1, 1, 1], [0], [0]>} : vector<2x5x8xbf16>, vector<2x5x8xbf16>, vector<2x5x5xf32> -> vector<2x5x5xf32>
    "tpu.trace_stop"() : () -> ()
    %cst_24 = arith.constant dense<0xFF800000> : vector<2x5xf32>
    %63 = vector.multi_reduction <maximumf>, %62, %cst_24 [2] : vector<2x5x5xf32> to vector<2x5xf32>
    %64 = vector.shape_cast %63 : vector<2x5xf32> to vector<2x5x1xf32>
    %65 = vector.broadcast %64 : vector<2x5x1xf32> to vector<2x5x5xf32>
    %66 = arith.subf %62, %65 : vector<2x5x5xf32>
    %67 = math.exp %66 : vector<2x5x5xf32>
    %cst_25 = arith.constant dense<0.000000e+00> : vector<2x5xf32>
    %68 = vector.multi_reduction <add>, %67, %cst_25 [2] : vector<2x5x5xf32> to vector<2x5xf32>
    %69 = vector.shape_cast %68 : vector<2x5xf32> to vector<2x5x1xf32>
    %70 = tpu.reciprocal %69 {approx = true} : vector<2x5x1xf32> -> vector<2x5x1xf32>
    %71 = vector.broadcast %70 : vector<2x5x1xf32> to vector<2x5x5xf32>
    %72 = arith.mulf %67, %71 : vector<2x5x5xf32>
    %73 = arith.truncf %72 : vector<2x5x5xf32> to vector<2x5x5xbf16>
    "tpu.trace_start"() <{level = 10 : i32, message = "bqk,bkd->bqd"}> : () -> ()
    %cst_26 = arith.constant dense<0.000000e+00> : vector<2x5x8xf32>
    %74 = tpu.matmul %73, %61, %cst_26 {dimension_numbers = #tpu.dot_dimension_numbers<[2], [1], [1], [2], [0, 0, 0, 1, 1, 2], [0], [0]>} : vector<2x5x5xbf16>, vector<2x5x8xbf16>, vector<2x5x8xf32> -> vector<2x5x8xf32>
    "tpu.trace_stop"() : () -> ()
    %c0_27 = arith.constant 0 : index
    %c0_28 = arith.constant 0 : index
    %c8 = arith.constant 8 : index
    %75 = vector.load %arg15[%c0_27, %c0_28, %c8] : memref<2x5x32xf32, #tpu.memory_space<vmem>>, vector<2x5x8xf32>
    tpu.vector_store %arg15[%c0_27, %c0_28, %c8], %74 {strides = array<i32>} : memref<2x5x32xf32, #tpu.memory_space<vmem>>, vector<2x5x8xf32>,
    %76 = vector.extract_strided_slice %35 {offsets = [0, 0, 16], sizes = [2, 5, 8], strides = [1, 1, 1]} : vector<2x5x32xbf16> to vector<2x5x8xbf16>
    %77 = vector.extract_strided_slice %38 {offsets = [0, 0, 16], sizes = [2, 5, 8], strides = [1, 1, 1]} : vector<2x5x32xbf16> to vector<2x5x8xbf16>
    %78 = vector.extract_strided_slice %41 {offsets = [0, 0, 16], sizes = [2, 5, 8], strides = [1, 1, 1]} : vector<2x5x32xbf16> to vector<2x5x8xbf16>
    "tpu.trace_start"() <{level = 10 : i32, message = "bqd,bkd->bqk"}> : () -> ()
    %cst_29 = arith.constant dense<0.000000e+00> : vector<2x5x5xf32>
    %79 = tpu.matmul %76, %77, %cst_29 {dimension_numbers = #tpu.dot_dimension_numbers<[2], [2], [1], [1], [0, 0, 0, 1, 1, 1], [0], [0]>} : vector<2x5x8xbf16>, vector<2x5x8xbf16>, vector<2x5x5xf32> -> vector<2x5x5xf32>
    "tpu.trace_stop"() : () -> ()
    %cst_30 = arith.constant dense<0xFF800000> : vector<2x5xf32>
    %80 = vector.multi_reduction <maximumf>, %79, %cst_30 [2] : vector<2x5x5xf32> to vector<2x5xf32>
    %81 = vector.shape_cast %80 : vector<2x5xf32> to vector<2x5x1xf32>
    %82 = vector.broadcast %81 : vector<2x5x1xf32> to vector<2x5x5xf32>
    %83 = arith.subf %79, %82 : vector<2x5x5xf32>
    %84 = math.exp %83 : vector<2x5x5xf32>
    %cst_31 = arith.constant dense<0.000000e+00> : vector<2x5xf32>
    %85 = vector.multi_reduction <add>, %84, %cst_31 [2] : vector<2x5x5xf32> to vector<2x5xf32>
    %86 = vector.shape_cast %85 : vector<2x5xf32> to vector<2x5x1xf32>
    %87 = tpu.reciprocal %86 {approx = true} : vector<2x5x1xf32> -> vector<2x5x1xf32>
    %88 = vector.broadcast %87 : vector<2x5x1xf32> to vector<2x5x5xf32>
    %89 = arith.mulf %84, %88 : vector<2x5x5xf32>
    %90 = arith.truncf %89 : vector<2x5x5xf32> to vector<2x5x5xbf16>
    "tpu.trace_start"() <{level = 10 : i32, message = "bqk,bkd->bqd"}> : () -> ()
    %cst_32 = arith.constant dense<0.000000e+00> : vector<2x5x8xf32>
    %91 = tpu.matmul %90, %78, %cst_32 {dimension_numbers = #tpu.dot_dimension_numbers<[2], [1], [1], [2], [0, 0, 0, 1, 1, 2], [0], [0]>} : vector<2x5x5xbf16>, vector<2x5x8xbf16>, vector<2x5x8xf32> -> vector<2x5x8xf32>
    "tpu.trace_stop"() : () -> ()
    %c0_33 = arith.constant 0 : index
    %c0_34 = arith.constant 0 : index
    %c16 = arith.constant 16 : index
    %92 = vector.load %arg15[%c0_33, %c0_34, %c16] : memref<2x5x32xf32, #tpu.memory_space<vmem>>, vector<2x5x8xf32>
    tpu.vector_store %arg15[%c0_33, %c0_34, %c16], %91 {strides = array<i32>} : memref<2x5x32xf32, #tpu.memory_space<vmem>>, vector<2x5x8xf32>,
    %93 = vector.extract_strided_slice %35 {offsets = [0, 0, 24], sizes = [2, 5, 8], strides = [1, 1, 1]} : vector<2x5x32xbf16> to vector<2x5x8xbf16>
    %94 = vector.extract_strided_slice %38 {offsets = [0, 0, 24], sizes = [2, 5, 8], strides = [1, 1, 1]} : vector<2x5x32xbf16> to vector<2x5x8xbf16>
    %95 = vector.extract_strided_slice %41 {offsets = [0, 0, 24], sizes = [2, 5, 8], strides = [1, 1, 1]} : vector<2x5x32xbf16> to vector<2x5x8xbf16>
    "tpu.trace_start"() <{level = 10 : i32, message = "bqd,bkd->bqk"}> : () -> ()
    %cst_35 = arith.constant dense<0.000000e+00> : vector<2x5x5xf32>
    %96 = tpu.matmul %93, %94, %cst_35 {dimension_numbers = #tpu.dot_dimension_numbers<[2], [2], [1], [1], [0, 0, 0, 1, 1, 1], [0], [0]>} : vector<2x5x8xbf16>, vector<2x5x8xbf16>, vector<2x5x5xf32> -> vector<2x5x5xf32>
    "tpu.trace_stop"() : () -> ()
    %cst_36 = arith.constant dense<0xFF800000> : vector<2x5xf32>
    %97 = vector.multi_reduction <maximumf>, %96, %cst_36 [2] : vector<2x5x5xf32> to vector<2x5xf32>
    %98 = vector.shape_cast %97 : vector<2x5xf32> to vector<2x5x1xf32>
    %99 = vector.broadcast %98 : vector<2x5x1xf32> to vector<2x5x5xf32>
    %100 = arith.subf %96, %99 : vector<2x5x5xf32>
    %101 = math.exp %100 : vector<2x5x5xf32>
    %cst_37 = arith.constant dense<0.000000e+00> : vector<2x5xf32>
    %102 = vector.multi_reduction <add>, %101, %cst_37 [2] : vector<2x5x5xf32> to vector<2x5xf32>
    %103 = vector.shape_cast %102 : vector<2x5xf32> to vector<2x5x1xf32>
    %104 = tpu.reciprocal %103 {approx = true} : vector<2x5x1xf32> -> vector<2x5x1xf32>
    %105 = vector.broadcast %104 : vector<2x5x1xf32> to vector<2x5x5xf32>
    %106 = arith.mulf %101, %105 : vector<2x5x5xf32>
    %107 = arith.truncf %106 : vector<2x5x5xf32> to vector<2x5x5xbf16>
    "tpu.trace_start"() <{level = 10 : i32, message = "bqk,bkd->bqd"}> : () -> ()
    %cst_38 = arith.constant dense<0.000000e+00> : vector<2x5x8xf32>
    %108 = tpu.matmul %107, %95, %cst_38 {dimension_numbers = #tpu.dot_dimension_numbers<[2], [1], [1], [2], [0, 0, 0, 1, 1, 2], [0], [0]>} : vector<2x5x5xbf16>, vector<2x5x8xbf16>, vector<2x5x8xf32> -> vector<2x5x8xf32>
    "tpu.trace_stop"() : () -> ()
    %c0_39 = arith.constant 0 : index
    %c0_40 = arith.constant 0 : index
    %c24 = arith.constant 24 : index
    %109 = vector.load %arg15[%c0_39, %c0_40, %c24] : memref<2x5x32xf32, #tpu.memory_space<vmem>>, vector<2x5x8xf32>
    tpu.vector_store %arg15[%c0_39, %c0_40, %c24], %108 {strides = array<i32>} : memref<2x5x32xf32, #tpu.memory_space<vmem>>, vector<2x5x8xf32>,
    %c0_41 = arith.constant 0 : index
    %c0_42 = arith.constant 0 : index
    %c0_43 = arith.constant 0 : index
    %110 = vector.load %arg15[%c0_41, %c0_42, %c0_43] : memref<2x5x32xf32, #tpu.memory_space<vmem>>, vector<2x5x32xf32>
    %111 = vector.shape_cast %110 : vector<2x5x32xf32> to vector<10x32xf32>
    %112 = arith.truncf %111 : vector<10x32xf32> to vector<10x32xbf16>
    %c0_44 = arith.constant 0 : index
    %c0_45 = arith.constant 0 : index
    %113 = vector.load %arg4[%c0_44, %c0_45] : memref<32x32xbf16, #tpu.memory_space<vmem>>, vector<32x32xbf16>
    %cst_46 = arith.constant dense<0.000000e+00> : vector<10x32xf32>
    %114 = tpu.matmul %112, %113, %cst_46 {dimension_numbers = #tpu.dot_dimension_numbers<[1], [0], [0], [1], [0, 0, 1, 1], [], []>} : vector<10x32xbf16>, vector<32x32xbf16>, vector<10x32xf32> -> vector<10x32xf32>
    %c0_47 = arith.constant 0 : index
    %c0_48 = arith.constant 0 : index
    %115 = vector.load %arg5[%c0_47, %c0_48] : memref<1x32xf32, #tpu.memory_space<vmem>>, vector<1x32xf32>
    %116 = vector.broadcast %115 : vector<1x32xf32> to vector<10x32xf32>
    %117 = arith.addf %114, %116 : vector<10x32xf32>
    %118 = arith.addf %2, %117 : vector<10x32xf32>
    %c0_49 = arith.constant 0 : index
    %c0_50 = arith.constant 0 : index
    %119 = vector.load %arg8[%c0_49, %c0_50] : memref<1x32xf32, #tpu.memory_space<vmem>>, vector<1x32xf32>
    %c0_51 = arith.constant 0 : index
    %c0_52 = arith.constant 0 : index
    %120 = vector.load %arg9[%c0_51, %c0_52] : memref<1x32xf32, #tpu.memory_space<vmem>>, vector<1x32xf32>
    %cst_53 = arith.constant dense<0.000000e+00> : vector<10xf32>
    %121 = vector.multi_reduction <add>, %118, %cst_53 [1] : vector<10x32xf32> to vector<10xf32>
    %122 = vector.shape_cast %121 : vector<10xf32> to vector<10x1xf32>
    %cst_54 = arith.constant 3.200000e+01 : f32
    %123 = vector.broadcast %cst_54 : f32 to vector<10x1xf32>
    %124 = arith.divf %122, %123 : vector<10x1xf32>
    %125 = vector.broadcast %124 : vector<10x1xf32> to vector<10x32xf32>
    %126 = arith.subf %118, %125 : vector<10x32xf32>
    %127 = arith.mulf %126, %126 : vector<10x32xf32>
    %cst_55 = arith.constant dense<0.000000e+00> : vector<10xf32>
    %128 = vector.multi_reduction <add>, %127, %cst_55 [1] : vector<10x32xf32> to vector<10xf32>
    %129 = vector.shape_cast %128 : vector<10xf32> to vector<10x1xf32>
    %cst_56 = arith.constant 3.200000e+01 : f32
    %130 = vector.broadcast %cst_56 : f32 to vector<10x1xf32>
    %131 = arith.divf %129, %130 : vector<10x1xf32>
    %cst_57 = arith.constant 9.99999997E-7 : f32
    %132 = vector.broadcast %cst_57 : f32 to vector<10x1xf32>
    %133 = arith.addf %131, %132 : vector<10x1xf32>
    %134 = math.rsqrt %133 : vector<10x1xf32>
    %135 = vector.broadcast %134 : vector<10x1xf32> to vector<10x32xf32>
    %136 = arith.mulf %126, %135 : vector<10x32xf32>
    %137 = vector.broadcast %119 : vector<1x32xf32> to vector<10x32xf32>
    %138 = arith.mulf %136, %137 : vector<10x32xf32>
    %139 = vector.broadcast %120 : vector<1x32xf32> to vector<10x32xf32>
    %140 = arith.addf %138, %139 : vector<10x32xf32>
    %141 = arith.truncf %140 : vector<10x32xf32> to vector<10x32xbf16>
    %c0_58 = arith.constant 0 : index
    %c0_59 = arith.constant 0 : index
    %142 = vector.load %arg10[%c0_58, %c0_59] : memref<32x64xbf16, #tpu.memory_space<vmem>>, vector<32x64xbf16>
    %cst_60 = arith.constant dense<0.000000e+00> : vector<10x64xf32>
    %143 = tpu.matmul %141, %142, %cst_60 {dimension_numbers = #tpu.dot_dimension_numbers<[1], [0], [0], [1], [0, 0, 1, 1], [], []>} : vector<10x32xbf16>, vector<32x64xbf16>, vector<10x64xf32> -> vector<10x64xf32>
    %c0_61 = arith.constant 0 : index
    %c0_62 = arith.constant 0 : index
    %144 = vector.load %arg11[%c0_61, %c0_62] : memref<1x64xf32, #tpu.memory_space<vmem>>, vector<1x64xf32>
    %145 = vector.broadcast %144 : vector<1x64xf32> to vector<10x64xf32>
    %146 = arith.addf %143, %145 : vector<10x64xf32>
    %cst_63 = arith.constant 5.000000e-01 : f32
    %147 = vector.broadcast %cst_63 : f32 to vector<10x64xf32>
    %148 = arith.mulf %147, %146 : vector<10x64xf32>
    %cst_64 = arith.constant 4.471500e-02 : f32
    %149 = vector.broadcast %cst_64 : f32 to vector<10x64xf32>
    %150 = arith.mulf %149, %146 : vector<10x64xf32>
    %151 = arith.mulf %150, %146 : vector<10x64xf32>
    %152 = arith.mulf %151, %146 : vector<10x64xf32>
    %153 = arith.addf %146, %152 : vector<10x64xf32>
    %cst_65 = arith.constant 0.797884583 : f32
    %154 = vector.broadcast %cst_65 : f32 to vector<10x64xf32>
    %155 = arith.mulf %154, %153 : vector<10x64xf32>
    %156 = math.tanh %155 : vector<10x64xf32>
    %cst_66 = arith.constant 1.000000e+00 : f32
    %157 = vector.broadcast %cst_66 : f32 to vector<10x64xf32>
    %158 = arith.addf %157, %156 : vector<10x64xf32>
    %159 = arith.mulf %148, %158 : vector<10x64xf32>
    %160 = arith.truncf %159 : vector<10x64xf32> to vector<10x64xbf16>
    %c0_67 = arith.constant 0 : index
    %c0_68 = arith.constant 0 : index
    %161 = vector.load %arg12[%c0_67, %c0_68] : memref<64x32xbf16, #tpu.memory_space<vmem>>, vector<64x32xbf16>
    %cst_69 = arith.constant dense<0.000000e+00> : vector<10x32xf32>
    %162 = tpu.matmul %160, %161, %cst_69 {dimension_numbers = #tpu.dot_dimension_numbers<[1], [0], [0], [1], [0, 0, 1, 1], [], []>} : vector<10x64xbf16>, vector<64x32xbf16>, vector<10x32xf32> -> vector<10x32xf32>
    %c0_70 = arith.constant 0 : index
    %c0_71 = arith.constant 0 : index
    %163 = vector.load %arg13[%c0_70, %c0_71] : memref<1x32xf32, #tpu.memory_space<vmem>>, vector<1x32xf32>
    %164 = vector.broadcast %163 : vector<1x32xf32> to vector<10x32xf32>
    %165 = arith.addf %162, %164 : vector<10x32xf32>
    %166 = arith.addf %118, %165 : vector<10x32xf32>
    %167 = vector.shape_cast %166 : vector<10x32xf32> to vector<2x5x32xf32>
    %168 = arith.truncf %167 : vector<2x5x32xf32> to vector<2x5x32xbf16>
    %c0_72 = arith.constant 0 : index
    %c0_73 = arith.constant 0 : index
    %c0_74 = arith.constant 0 : index
    %169 = vector.load %arg14[%c0_72, %c0_73, %c0_74] : memref<2x5x32xbf16, #tpu.memory_space<vmem>>, vector<2x5x32xbf16>
    tpu.vector_store %arg14[%c0_72, %c0_73, %c0_74], %168 {strides = array<i32>} : memref<2x5x32xbf16, #tpu.memory_space<vmem>>, vector<2x5x32xbf16>,
    return
  }
  func.func @transform_0(%arg0: i32) -> (i32, i32, i32) {
    %c0_i32 = arith.constant 0 : i32
    %c0_i32_0 = arith.constant 0 : i32
    %c0_i32_1 = arith.constant 0 : i32
    return %arg0, %c0_i32, %c0_i32_0 : i32, i32, i32
  }
  func.func @transform_1(%arg0: i32) -> (i32, i32) {
    %c0_i32 = arith.constant 0 : i32
    %c0_i32_0 = arith.constant 0 : i32
    %c0_i32_1 = arith.constant 0 : i32
    return %c0_i32, %c0_i32_0 : i32, i32
  }
  func.func @transform_2(%arg0: i32) -> (i32, i32) {
    %c0_i32 = arith.constant 0 : i32
    %c0_i32_0 = arith.constant 0 : i32
    %c0_i32_1 = arith.constant 0 : i32
    return %c0_i32, %c0_i32_0 : i32, i32
  }
  func.func @transform_3(%arg0: i32) -> (i32, i32) {
    %c0_i32 = arith.constant 0 : i32
    %c0_i32_0 = arith.constant 0 : i32
    %c0_i32_1 = arith.constant 0 : i32
    return %c0_i32, %c0_i32_0 : i32, i32
  }
  func.func @transform_4(%arg0: i32) -> (i32, i32) {
    %c0_i32 = arith.constant 0 : i32
    %c0_i32_0 = arith.constant 0 : i32
    %c0_i32_1 = arith.constant 0 : i32
    return %c0_i32, %c0_i32_0 : i32, i32
  }
  func.func @transform_5(%arg0: i32) -> (i32, i32) {
    %c0_i32 = arith.constant 0 : i32
    %c0_i32_0 = arith.constant 0 : i32
    %c0_i32_1 = arith.constant 0 : i32
    return %c0_i32, %c0_i32_0 : i32, i32
  }
  func.func @transform_6(%arg0: i32) -> (i32, i32) {
    %c0_i32 = arith.constant 0 : i32
    %c0_i32_0 = arith.constant 0 : i32
    %c0_i32_1 = arith.constant 0 : i32
    return %c0_i32, %c0_i32_0 : i32, i32
  }
  func.func @transform_7(%arg0: i32) -> (i32, i32) {
    %c0_i32 = arith.constant 0 : i32
    %c0_i32_0 = arith.constant 0 : i32
    %c0_i32_1 = arith.constant 0 : i32
    return %c0_i32, %c0_i32_0 : i32, i32
  }
  func.func @transform_8(%arg0: i32) -> (i32, i32) {
    %c0_i32 = arith.constant 0 : i32
    %c0_i32_0 = arith.constant 0 : i32
    %c0_i32_1 = arith.constant 0 : i32
    return %c0_i32, %c0_i32_0 : i32, i32
  }
  func.func @transform_9(%arg0: i32) -> (i32, i32) {
    %c0_i32 = arith.constant 0 : i32
    %c0_i32_0 = arith.constant 0 : i32
    %c0_i32_1 = arith.constant 0 : i32
    return %c0_i32, %c0_i32_0 : i32, i32
  }
  func.func @transform_10(%arg0: i32) -> (i32, i32) {
    %c0_i32 = arith.constant 0 : i32
    %c0_i32_0 = arith.constant 0 : i32
    %c0_i32_1 = arith.constant 0 : i32
    return %c0_i32, %c0_i32_0 : i32, i32
  }
  func.func @transform_11(%arg0: i32) -> (i32, i32) {
    %c0_i32 = arith.constant 0 : i32
    %c0_i32_0 = arith.constant 0 : i32
    %c0_i32_1 = arith.constant 0 : i32
    return %c0_i32, %c0_i32_0 : i32, i32
  }
  func.func @transform_12(%arg0: i32) -> (i32, i32) {
    %c0_i32 = arith.constant 0 : i32
    %c0_i32_0 = arith.constant 0 : i32
    %c0_i32_1 = arith.constant 0 : i32
    return %c0_i32, %c0_i32_0 : i32, i32
  }
  func.func @transform_13(%arg0: i32) -> (i32, i32, i32) {
    %c0_i32 = arith.constant 0 : i32
    %c0_i32_0 = arith.constant 0 : i32
    %c0_i32_1 = arith.constant 0 : i32
    return %arg0, %c0_i32, %c0_i32_0 : i32, i32, i32
  }
}

module attributes {stable_mosaic.version = 11 : i64} {
  func.func @fused_block_kernel(%arg0: i32, %arg1: memref<2x8x32xbf16, #tpu.memory_space<vmem>>, %arg2: memref<32x96xbf16, #tpu.memory_space<vmem>>, %arg3: memref<1x96xf32, #tpu.memory_space<vmem>>, %arg4: memref<32x32xbf16, #tpu.memory_space<vmem>>, %arg5: memref<1x32xf32, #tpu.memory_space<vmem>>, %arg6: memref<1x32xf32, #tpu.memory_space<vmem>>, %arg7: memref<1x32xf32, #tpu.memory_space<vmem>>, %arg8: memref<1x32xf32, #tpu.memory_space<vmem>>, %arg9: memref<1x32xf32, #tpu.memory_space<vmem>>, %arg10: memref<32x64xbf16, #tpu.memory_space<vmem>>, %arg11: memref<1x64xf32, #tpu.memory_space<vmem>>, %arg12: memref<64x32xbf16, #tpu.memory_space<vmem>>, %arg13: memref<1x32xf32, #tpu.memory_space<vmem>>, %arg14: memref<2x8x32xbf16, #tpu.memory_space<vmem>>, %arg15: memref<2x8x32xf32, #tpu.memory_space<vmem>>) attributes {dimension_semantics = [#tpu.dimension_semantics<parallel>], iteration_bounds = array<i64: 1>, scalar_prefetch = 0 : i64, scratch_operands = 1 : i64, tpu.core_type = #tpu.core_type<tc>, window_params = [{transform_indices = @transform_0, window_bounds = array<i64: 2, 8, 32>}, {pipeline_mode = #tpu.pipeline_mode<synchronous>, transform_indices = @transform_1, window_bounds = array<i64: 32, 96>}, {pipeline_mode = #tpu.pipeline_mode<synchronous>, transform_indices = @transform_2, window_bounds = array<i64: 1, 96>}, {pipeline_mode = #tpu.pipeline_mode<synchronous>, transform_indices = @transform_3, window_bounds = array<i64: 32, 32>}, {pipeline_mode = #tpu.pipeline_mode<synchronous>, transform_indices = @transform_4, window_bounds = array<i64: 1, 32>}, {pipeline_mode = #tpu.pipeline_mode<synchronous>, transform_indices = @transform_5, window_bounds = array<i64: 1, 32>}, {pipeline_mode = #tpu.pipeline_mode<synchronous>, transform_indices = @transform_6, window_bounds = array<i64: 1, 32>}, {pipeline_mode = #tpu.pipeline_mode<synchronous>, transform_indices = @transform_7, window_bounds = array<i64: 1, 32>}, {pipeline_mode = #tpu.pipeline_mode<synchronous>, transform_indices = @transform_8, window_bounds = array<i64: 1, 32>}, {pipeline_mode = #tpu.pipeline_mode<synchronous>, transform_indices = @transform_9, window_bounds = array<i64: 32, 64>}, {pipeline_mode = #tpu.pipeline_mode<synchronous>, transform_indices = @transform_10, window_bounds = array<i64: 1, 64>}, {pipeline_mode = #tpu.pipeline_mode<synchronous>, transform_indices = @transform_11, window_bounds = array<i64: 64, 32>}, {pipeline_mode = #tpu.pipeline_mode<synchronous>, transform_indices = @transform_12, window_bounds = array<i64: 1, 32>}, {transform_indices = @transform_13, window_bounds = array<i64: 2, 8, 32>}]} {
    %c0 = arith.constant 0 : index
    %c0_0 = arith.constant 0 : index
    %c0_1 = arith.constant 0 : index
    %0 = vector.load %arg1[%c0, %c0_0, %c0_1] : memref<2x8x32xbf16, #tpu.memory_space<vmem>>, vector<2x8x32xbf16>
    %1 = arith.extf %0 : vector<2x8x32xbf16> to vector<2x8x32xf32>
    %2 = vector.shape_cast %1 : vector<2x8x32xf32> to vector<16x32xf32>
    %3 = arith.truncf %2 : vector<16x32xf32> to vector<16x32xbf16>
    %c0_2 = arith.constant 0 : index
    %c0_3 = arith.constant 0 : index
    %4 = vector.load %arg2[%c0_2, %c0_3] : memref<32x96xbf16, #tpu.memory_space<vmem>>, vector<32x96xbf16>
    %cst = arith.constant dense<0.000000e+00> : vector<16x96xf32>
    %5 = tpu.matmul %3, %4, %cst {dimension_numbers = #tpu.dot_dimension_numbers<[1], [0], [0], [1], [0, 0, 1, 1], [], []>} : vector<16x32xbf16>, vector<32x96xbf16>, vector<16x96xf32> -> vector<16x96xf32>
    %c0_4 = arith.constant 0 : index
    %c0_5 = arith.constant 0 : index
    %6 = vector.load %arg3[%c0_4, %c0_5] : memref<1x96xf32, #tpu.memory_space<vmem>>, vector<1x96xf32>
    %7 = vector.broadcast %6 : vector<1x96xf32> to vector<16x96xf32>
    %8 = arith.addf %5, %7 : vector<16x96xf32>
    %9 = vector.extract_strided_slice %8 {offsets = [0, 0], sizes = [16, 32], strides = [1, 1]} : vector<16x96xf32> to vector<16x32xf32>
    %cst_6 = arith.constant 0.353553385 : f32
    %10 = vector.broadcast %cst_6 : f32 to vector<16x32xf32>
    %11 = arith.mulf %9, %10 : vector<16x32xf32>
    %12 = arith.truncf %11 : vector<16x32xf32> to vector<16x32xbf16>
    %13 = vector.shape_cast %12 : vector<16x32xbf16> to vector<2x8x32xbf16>
    %14 = vector.extract_strided_slice %8 {offsets = [0, 32], sizes = [16, 32], strides = [1, 1]} : vector<16x96xf32> to vector<16x32xf32>
    %15 = arith.truncf %14 : vector<16x32xf32> to vector<16x32xbf16>
    %16 = vector.shape_cast %15 : vector<16x32xbf16> to vector<2x8x32xbf16>
    %17 = vector.extract_strided_slice %8 {offsets = [0, 64], sizes = [16, 32], strides = [1, 1]} : vector<16x96xf32> to vector<16x32xf32>
    %18 = arith.truncf %17 : vector<16x32xf32> to vector<16x32xbf16>
    %19 = vector.shape_cast %18 : vector<16x32xbf16> to vector<2x8x32xbf16>
    %20 = vector.extract_strided_slice %13 {offsets = [0, 0, 0], sizes = [2, 8, 8], strides = [1, 1, 1]} : vector<2x8x32xbf16> to vector<2x8x8xbf16>
    %21 = vector.extract_strided_slice %16 {offsets = [0, 0, 0], sizes = [2, 8, 8], strides = [1, 1, 1]} : vector<2x8x32xbf16> to vector<2x8x8xbf16>
    %22 = vector.extract_strided_slice %19 {offsets = [0, 0, 0], sizes = [2, 8, 8], strides = [1, 1, 1]} : vector<2x8x32xbf16> to vector<2x8x8xbf16>
    "tpu.trace_start"() <{level = 10 : i32, message = "bqd,bkd->bqk"}> : () -> ()
    %cst_7 = arith.constant dense<0.000000e+00> : vector<2x8x8xf32>
    %23 = tpu.matmul %20, %21, %cst_7 {dimension_numbers = #tpu.dot_dimension_numbers<[2], [2], [1], [1], [0, 0, 0, 1, 1, 1], [0], [0]>} : vector<2x8x8xbf16>, vector<2x8x8xbf16>, vector<2x8x8xf32> -> vector<2x8x8xf32>
    "tpu.trace_stop"() : () -> ()
    %cst_8 = arith.constant dense<0xFF800000> : vector<2x8xf32>
    %24 = vector.multi_reduction <maximumf>, %23, %cst_8 [2] : vector<2x8x8xf32> to vector<2x8xf32>
    %25 = vector.shape_cast %24 : vector<2x8xf32> to vector<2x8x1xf32>
    %26 = vector.broadcast %25 : vector<2x8x1xf32> to vector<2x8x8xf32>
    %27 = arith.subf %23, %26 : vector<2x8x8xf32>
    %28 = math.exp %27 : vector<2x8x8xf32>
    %cst_9 = arith.constant dense<0.000000e+00> : vector<2x8xf32>
    %29 = vector.multi_reduction <add>, %28, %cst_9 [2] : vector<2x8x8xf32> to vector<2x8xf32>
    %30 = vector.shape_cast %29 : vector<2x8xf32> to vector<2x8x1xf32>
    %31 = tpu.reciprocal %30 {approx = true} : vector<2x8x1xf32> -> vector<2x8x1xf32>
    %32 = vector.broadcast %31 : vector<2x8x1xf32> to vector<2x8x8xf32>
    %33 = arith.mulf %28, %32 : vector<2x8x8xf32>
    %34 = arith.truncf %33 : vector<2x8x8xf32> to vector<2x8x8xbf16>
    "tpu.trace_start"() <{level = 10 : i32, message = "bqk,bkd->bqd"}> : () -> ()
    %cst_10 = arith.constant dense<0.000000e+00> : vector<2x8x8xf32>
    %35 = tpu.matmul %34, %22, %cst_10 {dimension_numbers = #tpu.dot_dimension_numbers<[2], [1], [1], [2], [0, 0, 0, 1, 1, 2], [0], [0]>} : vector<2x8x8xbf16>, vector<2x8x8xbf16>, vector<2x8x8xf32> -> vector<2x8x8xf32>
    "tpu.trace_stop"() : () -> ()
    %c0_11 = arith.constant 0 : index
    %c0_12 = arith.constant 0 : index
    %c0_13 = arith.constant 0 : index
    %36 = vector.load %arg15[%c0_11, %c0_12, %c0_13] : memref<2x8x32xf32, #tpu.memory_space<vmem>>, vector<2x8x8xf32>
    tpu.vector_store %arg15[%c0_11, %c0_12, %c0_13], %35 {strides = array<i32>} : memref<2x8x32xf32, #tpu.memory_space<vmem>>, vector<2x8x8xf32>,
    %37 = vector.extract_strided_slice %13 {offsets = [0, 0, 8], sizes = [2, 8, 8], strides = [1, 1, 1]} : vector<2x8x32xbf16> to vector<2x8x8xbf16>
    %38 = vector.extract_strided_slice %16 {offsets = [0, 0, 8], sizes = [2, 8, 8], strides = [1, 1, 1]} : vector<2x8x32xbf16> to vector<2x8x8xbf16>
    %39 = vector.extract_strided_slice %19 {offsets = [0, 0, 8], sizes = [2, 8, 8], strides = [1, 1, 1]} : vector<2x8x32xbf16> to vector<2x8x8xbf16>
    "tpu.trace_start"() <{level = 10 : i32, message = "bqd,bkd->bqk"}> : () -> ()
    %cst_14 = arith.constant dense<0.000000e+00> : vector<2x8x8xf32>
    %40 = tpu.matmul %37, %38, %cst_14 {dimension_numbers = #tpu.dot_dimension_numbers<[2], [2], [1], [1], [0, 0, 0, 1, 1, 1], [0], [0]>} : vector<2x8x8xbf16>, vector<2x8x8xbf16>, vector<2x8x8xf32> -> vector<2x8x8xf32>
    "tpu.trace_stop"() : () -> ()
    %cst_15 = arith.constant dense<0xFF800000> : vector<2x8xf32>
    %41 = vector.multi_reduction <maximumf>, %40, %cst_15 [2] : vector<2x8x8xf32> to vector<2x8xf32>
    %42 = vector.shape_cast %41 : vector<2x8xf32> to vector<2x8x1xf32>
    %43 = vector.broadcast %42 : vector<2x8x1xf32> to vector<2x8x8xf32>
    %44 = arith.subf %40, %43 : vector<2x8x8xf32>
    %45 = math.exp %44 : vector<2x8x8xf32>
    %cst_16 = arith.constant dense<0.000000e+00> : vector<2x8xf32>
    %46 = vector.multi_reduction <add>, %45, %cst_16 [2] : vector<2x8x8xf32> to vector<2x8xf32>
    %47 = vector.shape_cast %46 : vector<2x8xf32> to vector<2x8x1xf32>
    %48 = tpu.reciprocal %47 {approx = true} : vector<2x8x1xf32> -> vector<2x8x1xf32>
    %49 = vector.broadcast %48 : vector<2x8x1xf32> to vector<2x8x8xf32>
    %50 = arith.mulf %45, %49 : vector<2x8x8xf32>
    %51 = arith.truncf %50 : vector<2x8x8xf32> to vector<2x8x8xbf16>
    "tpu.trace_start"() <{level = 10 : i32, message = "bqk,bkd->bqd"}> : () -> ()
    %cst_17 = arith.constant dense<0.000000e+00> : vector<2x8x8xf32>
    %52 = tpu.matmul %51, %39, %cst_17 {dimension_numbers = #tpu.dot_dimension_numbers<[2], [1], [1], [2], [0, 0, 0, 1, 1, 2], [0], [0]>} : vector<2x8x8xbf16>, vector<2x8x8xbf16>, vector<2x8x8xf32> -> vector<2x8x8xf32>
    "tpu.trace_stop"() : () -> ()
    %c0_18 = arith.constant 0 : index
    %c0_19 = arith.constant 0 : index
    %c8 = arith.constant 8 : index
    %53 = vector.load %arg15[%c0_18, %c0_19, %c8] : memref<2x8x32xf32, #tpu.memory_space<vmem>>, vector<2x8x8xf32>
    tpu.vector_store %arg15[%c0_18, %c0_19, %c8], %52 {strides = array<i32>} : memref<2x8x32xf32, #tpu.memory_space<vmem>>, vector<2x8x8xf32>,
    %54 = vector.extract_strided_slice %13 {offsets = [0, 0, 16], sizes = [2, 8, 8], strides = [1, 1, 1]} : vector<2x8x32xbf16> to vector<2x8x8xbf16>
    %55 = vector.extract_strided_slice %16 {offsets = [0, 0, 16], sizes = [2, 8, 8], strides = [1, 1, 1]} : vector<2x8x32xbf16> to vector<2x8x8xbf16>
    %56 = vector.extract_strided_slice %19 {offsets = [0, 0, 16], sizes = [2, 8, 8], strides = [1, 1, 1]} : vector<2x8x32xbf16> to vector<2x8x8xbf16>
    "tpu.trace_start"() <{level = 10 : i32, message = "bqd,bkd->bqk"}> : () -> ()
    %cst_20 = arith.constant dense<0.000000e+00> : vector<2x8x8xf32>
    %57 = tpu.matmul %54, %55, %cst_20 {dimension_numbers = #tpu.dot_dimension_numbers<[2], [2], [1], [1], [0, 0, 0, 1, 1, 1], [0], [0]>} : vector<2x8x8xbf16>, vector<2x8x8xbf16>, vector<2x8x8xf32> -> vector<2x8x8xf32>
    "tpu.trace_stop"() : () -> ()
    %cst_21 = arith.constant dense<0xFF800000> : vector<2x8xf32>
    %58 = vector.multi_reduction <maximumf>, %57, %cst_21 [2] : vector<2x8x8xf32> to vector<2x8xf32>
    %59 = vector.shape_cast %58 : vector<2x8xf32> to vector<2x8x1xf32>
    %60 = vector.broadcast %59 : vector<2x8x1xf32> to vector<2x8x8xf32>
    %61 = arith.subf %57, %60 : vector<2x8x8xf32>
    %62 = math.exp %61 : vector<2x8x8xf32>
    %cst_22 = arith.constant dense<0.000000e+00> : vector<2x8xf32>
    %63 = vector.multi_reduction <add>, %62, %cst_22 [2] : vector<2x8x8xf32> to vector<2x8xf32>
    %64 = vector.shape_cast %63 : vector<2x8xf32> to vector<2x8x1xf32>
    %65 = tpu.reciprocal %64 {approx = true} : vector<2x8x1xf32> -> vector<2x8x1xf32>
    %66 = vector.broadcast %65 : vector<2x8x1xf32> to vector<2x8x8xf32>
    %67 = arith.mulf %62, %66 : vector<2x8x8xf32>
    %68 = arith.truncf %67 : vector<2x8x8xf32> to vector<2x8x8xbf16>
    "tpu.trace_start"() <{level = 10 : i32, message = "bqk,bkd->bqd"}> : () -> ()
    %cst_23 = arith.constant dense<0.000000e+00> : vector<2x8x8xf32>
    %69 = tpu.matmul %68, %56, %cst_23 {dimension_numbers = #tpu.dot_dimension_numbers<[2], [1], [1], [2], [0, 0, 0, 1, 1, 2], [0], [0]>} : vector<2x8x8xbf16>, vector<2x8x8xbf16>, vector<2x8x8xf32> -> vector<2x8x8xf32>
    "tpu.trace_stop"() : () -> ()
    %c0_24 = arith.constant 0 : index
    %c0_25 = arith.constant 0 : index
    %c16 = arith.constant 16 : index
    %70 = vector.load %arg15[%c0_24, %c0_25, %c16] : memref<2x8x32xf32, #tpu.memory_space<vmem>>, vector<2x8x8xf32>
    tpu.vector_store %arg15[%c0_24, %c0_25, %c16], %69 {strides = array<i32>} : memref<2x8x32xf32, #tpu.memory_space<vmem>>, vector<2x8x8xf32>,
    %71 = vector.extract_strided_slice %13 {offsets = [0, 0, 24], sizes = [2, 8, 8], strides = [1, 1, 1]} : vector<2x8x32xbf16> to vector<2x8x8xbf16>
    %72 = vector.extract_strided_slice %16 {offsets = [0, 0, 24], sizes = [2, 8, 8], strides = [1, 1, 1]} : vector<2x8x32xbf16> to vector<2x8x8xbf16>
    %73 = vector.extract_strided_slice %19 {offsets = [0, 0, 24], sizes = [2, 8, 8], strides = [1, 1, 1]} : vector<2x8x32xbf16> to vector<2x8x8xbf16>
    "tpu.trace_start"() <{level = 10 : i32, message = "bqd,bkd->bqk"}> : () -> ()
    %cst_26 = arith.constant dense<0.000000e+00> : vector<2x8x8xf32>
    %74 = tpu.matmul %71, %72, %cst_26 {dimension_numbers = #tpu.dot_dimension_numbers<[2], [2], [1], [1], [0, 0, 0, 1, 1, 1], [0], [0]>} : vector<2x8x8xbf16>, vector<2x8x8xbf16>, vector<2x8x8xf32> -> vector<2x8x8xf32>
    "tpu.trace_stop"() : () -> ()
    %cst_27 = arith.constant dense<0xFF800000> : vector<2x8xf32>
    %75 = vector.multi_reduction <maximumf>, %74, %cst_27 [2] : vector<2x8x8xf32> to vector<2x8xf32>
    %76 = vector.shape_cast %75 : vector<2x8xf32> to vector<2x8x1xf32>
    %77 = vector.broadcast %76 : vector<2x8x1xf32> to vector<2x8x8xf32>
    %78 = arith.subf %74, %77 : vector<2x8x8xf32>
    %79 = math.exp %78 : vector<2x8x8xf32>
    %cst_28 = arith.constant dense<0.000000e+00> : vector<2x8xf32>
    %80 = vector.multi_reduction <add>, %79, %cst_28 [2] : vector<2x8x8xf32> to vector<2x8xf32>
    %81 = vector.shape_cast %80 : vector<2x8xf32> to vector<2x8x1xf32>
    %82 = tpu.reciprocal %81 {approx = true} : vector<2x8x1xf32> -> vector<2x8x1xf32>
    %83 = vector.broadcast %82 : vector<2x8x1xf32> to vector<2x8x8xf32>
    %84 = arith.mulf %79, %83 : vector<2x8x8xf32>
    %85 = arith.truncf %84 : vector<2x8x8xf32> to vector<2x8x8xbf16>
    "tpu.trace_start"() <{level = 10 : i32, message = "bqk,bkd->bqd"}> : () -> ()
    %cst_29 = arith.constant dense<0.000000e+00> : vector<2x8x8xf32>
    %86 = tpu.matmul %85, %73, %cst_29 {dimension_numbers = #tpu.dot_dimension_numbers<[2], [1], [1], [2], [0, 0, 0, 1, 1, 2], [0], [0]>} : vector<2x8x8xbf16>, vector<2x8x8xbf16>, vector<2x8x8xf32> -> vector<2x8x8xf32>
    "tpu.trace_stop"() : () -> ()
    %c0_30 = arith.constant 0 : index
    %c0_31 = arith.constant 0 : index
    %c24 = arith.constant 24 : index
    %87 = vector.load %arg15[%c0_30, %c0_31, %c24] : memref<2x8x32xf32, #tpu.memory_space<vmem>>, vector<2x8x8xf32>
    tpu.vector_store %arg15[%c0_30, %c0_31, %c24], %86 {strides = array<i32>} : memref<2x8x32xf32, #tpu.memory_space<vmem>>, vector<2x8x8xf32>,
    %c0_32 = arith.constant 0 : index
    %c0_33 = arith.constant 0 : index
    %c0_34 = arith.constant 0 : index
    %88 = vector.load %arg15[%c0_32, %c0_33, %c0_34] : memref<2x8x32xf32, #tpu.memory_space<vmem>>, vector<2x8x32xf32>
    %89 = vector.shape_cast %88 : vector<2x8x32xf32> to vector<16x32xf32>
    %90 = arith.truncf %89 : vector<16x32xf32> to vector<16x32xbf16>
    %c0_35 = arith.constant 0 : index
    %c0_36 = arith.constant 0 : index
    %91 = vector.load %arg4[%c0_35, %c0_36] : memref<32x32xbf16, #tpu.memory_space<vmem>>, vector<32x32xbf16>
    %cst_37 = arith.constant dense<0.000000e+00> : vector<16x32xf32>
    %92 = tpu.matmul %90, %91, %cst_37 {dimension_numbers = #tpu.dot_dimension_numbers<[1], [0], [0], [1], [0, 0, 1, 1], [], []>} : vector<16x32xbf16>, vector<32x32xbf16>, vector<16x32xf32> -> vector<16x32xf32>
    %c0_38 = arith.constant 0 : index
    %c0_39 = arith.constant 0 : index
    %93 = vector.load %arg5[%c0_38, %c0_39] : memref<1x32xf32, #tpu.memory_space<vmem>>, vector<1x32xf32>
    %94 = vector.broadcast %93 : vector<1x32xf32> to vector<16x32xf32>
    %95 = arith.addf %92, %94 : vector<16x32xf32>
    %96 = arith.addf %2, %95 : vector<16x32xf32>
    %c0_40 = arith.constant 0 : index
    %c0_41 = arith.constant 0 : index
    %97 = vector.load %arg6[%c0_40, %c0_41] : memref<1x32xf32, #tpu.memory_space<vmem>>, vector<1x32xf32>
    %c0_42 = arith.constant 0 : index
    %c0_43 = arith.constant 0 : index
    %98 = vector.load %arg7[%c0_42, %c0_43] : memref<1x32xf32, #tpu.memory_space<vmem>>, vector<1x32xf32>
    %cst_44 = arith.constant dense<0.000000e+00> : vector<16xf32>
    %99 = vector.multi_reduction <add>, %96, %cst_44 [1] : vector<16x32xf32> to vector<16xf32>
    %100 = vector.shape_cast %99 : vector<16xf32> to vector<16x1xf32>
    %cst_45 = arith.constant 3.200000e+01 : f32
    %101 = vector.broadcast %cst_45 : f32 to vector<16x1xf32>
    %102 = arith.divf %100, %101 : vector<16x1xf32>
    %103 = vector.broadcast %102 : vector<16x1xf32> to vector<16x32xf32>
    %104 = arith.subf %96, %103 : vector<16x32xf32>
    %105 = arith.mulf %104, %104 : vector<16x32xf32>
    %cst_46 = arith.constant dense<0.000000e+00> : vector<16xf32>
    %106 = vector.multi_reduction <add>, %105, %cst_46 [1] : vector<16x32xf32> to vector<16xf32>
    %107 = vector.shape_cast %106 : vector<16xf32> to vector<16x1xf32>
    %cst_47 = arith.constant 3.200000e+01 : f32
    %108 = vector.broadcast %cst_47 : f32 to vector<16x1xf32>
    %109 = arith.divf %107, %108 : vector<16x1xf32>
    %cst_48 = arith.constant 9.99999974E-6 : f32
    %110 = vector.broadcast %cst_48 : f32 to vector<16x1xf32>
    %111 = arith.addf %109, %110 : vector<16x1xf32>
    %112 = math.rsqrt %111 : vector<16x1xf32>
    %113 = vector.broadcast %112 : vector<16x1xf32> to vector<16x32xf32>
    %114 = arith.mulf %104, %113 : vector<16x32xf32>
    %115 = vector.broadcast %97 : vector<1x32xf32> to vector<16x32xf32>
    %116 = arith.mulf %114, %115 : vector<16x32xf32>
    %117 = vector.broadcast %98 : vector<1x32xf32> to vector<16x32xf32>
    %118 = arith.addf %116, %117 : vector<16x32xf32>
    %119 = arith.truncf %118 : vector<16x32xf32> to vector<16x32xbf16>
    %c0_49 = arith.constant 0 : index
    %c0_50 = arith.constant 0 : index
    %120 = vector.load %arg10[%c0_49, %c0_50] : memref<32x64xbf16, #tpu.memory_space<vmem>>, vector<32x64xbf16>
    %cst_51 = arith.constant dense<0.000000e+00> : vector<16x64xf32>
    %121 = tpu.matmul %119, %120, %cst_51 {dimension_numbers = #tpu.dot_dimension_numbers<[1], [0], [0], [1], [0, 0, 1, 1], [], []>} : vector<16x32xbf16>, vector<32x64xbf16>, vector<16x64xf32> -> vector<16x64xf32>
    %c0_52 = arith.constant 0 : index
    %c0_53 = arith.constant 0 : index
    %122 = vector.load %arg11[%c0_52, %c0_53] : memref<1x64xf32, #tpu.memory_space<vmem>>, vector<1x64xf32>
    %123 = vector.broadcast %122 : vector<1x64xf32> to vector<16x64xf32>
    %124 = arith.addf %121, %123 : vector<16x64xf32>
    %cst_54 = arith.constant 5.000000e-01 : f32
    %125 = vector.broadcast %cst_54 : f32 to vector<16x64xf32>
    %126 = arith.mulf %125, %124 : vector<16x64xf32>
    %cst_55 = arith.constant 4.471500e-02 : f32
    %127 = vector.broadcast %cst_55 : f32 to vector<16x64xf32>
    %128 = arith.mulf %127, %124 : vector<16x64xf32>
    %129 = arith.mulf %128, %124 : vector<16x64xf32>
    %130 = arith.mulf %129, %124 : vector<16x64xf32>
    %131 = arith.addf %124, %130 : vector<16x64xf32>
    %cst_56 = arith.constant 0.797884583 : f32
    %132 = vector.broadcast %cst_56 : f32 to vector<16x64xf32>
    %133 = arith.mulf %132, %131 : vector<16x64xf32>
    %134 = math.tanh %133 : vector<16x64xf32>
    %cst_57 = arith.constant 1.000000e+00 : f32
    %135 = vector.broadcast %cst_57 : f32 to vector<16x64xf32>
    %136 = arith.addf %135, %134 : vector<16x64xf32>
    %137 = arith.mulf %126, %136 : vector<16x64xf32>
    %138 = arith.truncf %137 : vector<16x64xf32> to vector<16x64xbf16>
    %c0_58 = arith.constant 0 : index
    %c0_59 = arith.constant 0 : index
    %139 = vector.load %arg12[%c0_58, %c0_59] : memref<64x32xbf16, #tpu.memory_space<vmem>>, vector<64x32xbf16>
    %cst_60 = arith.constant dense<0.000000e+00> : vector<16x32xf32>
    %140 = tpu.matmul %138, %139, %cst_60 {dimension_numbers = #tpu.dot_dimension_numbers<[1], [0], [0], [1], [0, 0, 1, 1], [], []>} : vector<16x64xbf16>, vector<64x32xbf16>, vector<16x32xf32> -> vector<16x32xf32>
    %c0_61 = arith.constant 0 : index
    %c0_62 = arith.constant 0 : index
    %141 = vector.load %arg13[%c0_61, %c0_62] : memref<1x32xf32, #tpu.memory_space<vmem>>, vector<1x32xf32>
    %142 = vector.broadcast %141 : vector<1x32xf32> to vector<16x32xf32>
    %143 = arith.addf %140, %142 : vector<16x32xf32>
    %144 = arith.addf %118, %143 : vector<16x32xf32>
    %c0_63 = arith.constant 0 : index
    %c0_64 = arith.constant 0 : index
    %145 = vector.load %arg8[%c0_63, %c0_64] : memref<1x32xf32, #tpu.memory_space<vmem>>, vector<1x32xf32>
    %c0_65 = arith.constant 0 : index
    %c0_66 = arith.constant 0 : index
    %146 = vector.load %arg9[%c0_65, %c0_66] : memref<1x32xf32, #tpu.memory_space<vmem>>, vector<1x32xf32>
    %cst_67 = arith.constant dense<0.000000e+00> : vector<16xf32>
    %147 = vector.multi_reduction <add>, %144, %cst_67 [1] : vector<16x32xf32> to vector<16xf32>
    %148 = vector.shape_cast %147 : vector<16xf32> to vector<16x1xf32>
    %cst_68 = arith.constant 3.200000e+01 : f32
    %149 = vector.broadcast %cst_68 : f32 to vector<16x1xf32>
    %150 = arith.divf %148, %149 : vector<16x1xf32>
    %151 = vector.broadcast %150 : vector<16x1xf32> to vector<16x32xf32>
    %152 = arith.subf %144, %151 : vector<16x32xf32>
    %153 = arith.mulf %152, %152 : vector<16x32xf32>
    %cst_69 = arith.constant dense<0.000000e+00> : vector<16xf32>
    %154 = vector.multi_reduction <add>, %153, %cst_69 [1] : vector<16x32xf32> to vector<16xf32>
    %155 = vector.shape_cast %154 : vector<16xf32> to vector<16x1xf32>
    %cst_70 = arith.constant 3.200000e+01 : f32
    %156 = vector.broadcast %cst_70 : f32 to vector<16x1xf32>
    %157 = arith.divf %155, %156 : vector<16x1xf32>
    %cst_71 = arith.constant 9.99999974E-6 : f32
    %158 = vector.broadcast %cst_71 : f32 to vector<16x1xf32>
    %159 = arith.addf %157, %158 : vector<16x1xf32>
    %160 = math.rsqrt %159 : vector<16x1xf32>
    %161 = vector.broadcast %160 : vector<16x1xf32> to vector<16x32xf32>
    %162 = arith.mulf %152, %161 : vector<16x32xf32>
    %163 = vector.broadcast %145 : vector<1x32xf32> to vector<16x32xf32>
    %164 = arith.mulf %162, %163 : vector<16x32xf32>
    %165 = vector.broadcast %146 : vector<1x32xf32> to vector<16x32xf32>
    %166 = arith.addf %164, %165 : vector<16x32xf32>
    %167 = vector.shape_cast %166 : vector<16x32xf32> to vector<2x8x32xf32>
    %168 = arith.truncf %167 : vector<2x8x32xf32> to vector<2x8x32xbf16>
    %c0_72 = arith.constant 0 : index
    %c0_73 = arith.constant 0 : index
    %c0_74 = arith.constant 0 : index
    %169 = vector.load %arg14[%c0_72, %c0_73, %c0_74] : memref<2x8x32xbf16, #tpu.memory_space<vmem>>, vector<2x8x32xbf16>
    tpu.vector_store %arg14[%c0_72, %c0_73, %c0_74], %168 {strides = array<i32>} : memref<2x8x32xbf16, #tpu.memory_space<vmem>>, vector<2x8x32xbf16>,
    return
  }
  func.func @transform_0(%arg0: i32) -> (i32, i32, i32) {
    %c0_i32 = arith.constant 0 : i32
    %c0_i32_0 = arith.constant 0 : i32
    %c0_i32_1 = arith.constant 0 : i32
    return %arg0, %c0_i32, %c0_i32_0 : i32, i32, i32
  }
  func.func @transform_1(%arg0: i32) -> (i32, i32) {
    %c0_i32 = arith.constant 0 : i32
    %c0_i32_0 = arith.constant 0 : i32
    %c0_i32_1 = arith.constant 0 : i32
    return %c0_i32, %c0_i32_0 : i32, i32
  }
  func.func @transform_2(%arg0: i32) -> (i32, i32) {
    %c0_i32 = arith.constant 0 : i32
    %c0_i32_0 = arith.constant 0 : i32
    %c0_i32_1 = arith.constant 0 : i32
    return %c0_i32, %c0_i32_0 : i32, i32
  }
  func.func @transform_3(%arg0: i32) -> (i32, i32) {
    %c0_i32 = arith.constant 0 : i32
    %c0_i32_0 = arith.constant 0 : i32
    %c0_i32_1 = arith.constant 0 : i32
    return %c0_i32, %c0_i32_0 : i32, i32
  }
  func.func @transform_4(%arg0: i32) -> (i32, i32) {
    %c0_i32 = arith.constant 0 : i32
    %c0_i32_0 = arith.constant 0 : i32
    %c0_i32_1 = arith.constant 0 : i32
    return %c0_i32, %c0_i32_0 : i32, i32
  }
  func.func @transform_5(%arg0: i32) -> (i32, i32) {
    %c0_i32 = arith.constant 0 : i32
    %c0_i32_0 = arith.constant 0 : i32
    %c0_i32_1 = arith.constant 0 : i32
    return %c0_i32, %c0_i32_0 : i32, i32
  }
  func.func @transform_6(%arg0: i32) -> (i32, i32) {
    %c0_i32 = arith.constant 0 : i32
    %c0_i32_0 = arith.constant 0 : i32
    %c0_i32_1 = arith.constant 0 : i32
    return %c0_i32, %c0_i32_0 : i32, i32
  }
  func.func @transform_7(%arg0: i32) -> (i32, i32) {
    %c0_i32 = arith.constant 0 : i32
    %c0_i32_0 = arith.constant 0 : i32
    %c0_i32_1 = arith.constant 0 : i32
    return %c0_i32, %c0_i32_0 : i32, i32
  }
  func.func @transform_8(%arg0: i32) -> (i32, i32) {
    %c0_i32 = arith.constant 0 : i32
    %c0_i32_0 = arith.constant 0 : i32
    %c0_i32_1 = arith.constant 0 : i32
    return %c0_i32, %c0_i32_0 : i32, i32
  }
  func.func @transform_9(%arg0: i32) -> (i32, i32) {
    %c0_i32 = arith.constant 0 : i32
    %c0_i32_0 = arith.constant 0 : i32
    %c0_i32_1 = arith.constant 0 : i32
    return %c0_i32, %c0_i32_0 : i32, i32
  }
  func.func @transform_10(%arg0: i32) -> (i32, i32) {
    %c0_i32 = arith.constant 0 : i32
    %c0_i32_0 = arith.constant 0 : i32
    %c0_i32_1 = arith.constant 0 : i32
    return %c0_i32, %c0_i32_0 : i32, i32
  }
  func.func @transform_11(%arg0: i32) -> (i32, i32) {
    %c0_i32 = arith.constant 0 : i32
    %c0_i32_0 = arith.constant 0 : i32
    %c0_i32_1 = arith.constant 0 : i32
    return %c0_i32, %c0_i32_0 : i32, i32
  }
  func.func @transform_12(%arg0: i32) -> (i32, i32) {
    %c0_i32 = arith.constant 0 : i32
    %c0_i32_0 = arith.constant 0 : i32
    %c0_i32_1 = arith.constant 0 : i32
    return %c0_i32, %c0_i32_0 : i32, i32
  }
  func.func @transform_13(%arg0: i32) -> (i32, i32, i32) {
    %c0_i32 = arith.constant 0 : i32
    %c0_i32_0 = arith.constant 0 : i32
    %c0_i32_1 = arith.constant 0 : i32
    return %arg0, %c0_i32, %c0_i32_0 : i32, i32, i32
  }
}

module attributes {stable_mosaic.version = 11 : i64} {
  func.func @clip_head_kernel(%arg0: memref<2x32xbf16, #tpu.memory_space<vmem>>, %arg1: memref<32x32xf32, #tpu.memory_space<vmem>>, %arg2: memref<1x32xf32, #tpu.memory_space<vmem>>, %arg3: memref<2x32xbf16, #tpu.memory_space<vmem>>, %arg4: memref<1x32xf32, #tpu.memory_space<vmem>>, %arg5: memref<1x32xf32, #tpu.memory_space<vmem>>, %arg6: memref<32x16xf32, #tpu.memory_space<vmem>>, %arg7: memref<1x16xf32, #tpu.memory_space<vmem>>, %arg8: memref<16x32xf32, #tpu.memory_space<vmem>>, %arg9: memref<1x32xf32, #tpu.memory_space<vmem>>, %arg10: memref<1x1xf32, #tpu.memory_space<vmem>>, %arg11: memref<2x2xf32, #tpu.memory_space<vmem>>, %arg12: memref<1x1xf32, #tpu.memory_space<vmem>>) attributes {dimension_semantics = [], scalar_prefetch = 0 : i64, scratch_operands = 0 : i64, tpu.core_type = #tpu.core_type<tc>} {
    %c0 = arith.constant 0 : index
    %c0_0 = arith.constant 0 : index
    %0 = vector.load %arg0[%c0, %c0_0] : memref<2x32xbf16, #tpu.memory_space<vmem>>, vector<2x32xbf16>
    %1 = arith.extf %0 : vector<2x32xbf16> to vector<2x32xf32>
    %c0_1 = arith.constant 0 : index
    %c0_2 = arith.constant 0 : index
    %2 = vector.load %arg1[%c0_1, %c0_2] : memref<32x32xf32, #tpu.memory_space<vmem>>, vector<32x32xf32>
    %cst = arith.constant dense<0.000000e+00> : vector<2x32xf32>
    %3 = tpu.matmul %1, %2, %cst {dimension_numbers = #tpu.dot_dimension_numbers<[1], [0], [0], [1], [0, 0, 1, 1], [], []>} : vector<2x32xf32>, vector<32x32xf32>, vector<2x32xf32> -> vector<2x32xf32>
    %c0_3 = arith.constant 0 : index
    %c0_4 = arith.constant 0 : index
    %4 = vector.load %arg2[%c0_3, %c0_4] : memref<1x32xf32, #tpu.memory_space<vmem>>, vector<1x32xf32>
    %5 = vector.broadcast %4 : vector<1x32xf32> to vector<2x32xf32>
    %6 = arith.addf %3, %5 : vector<2x32xf32>
    %c0_5 = arith.constant 0 : index
    %c0_6 = arith.constant 0 : index
    %7 = vector.load %arg3[%c0_5, %c0_6] : memref<2x32xbf16, #tpu.memory_space<vmem>>, vector<2x32xbf16>
    %8 = arith.extf %7 : vector<2x32xbf16> to vector<2x32xf32>
    %c0_7 = arith.constant 0 : index
    %c0_8 = arith.constant 0 : index
    %9 = vector.load %arg4[%c0_7, %c0_8] : memref<1x32xf32, #tpu.memory_space<vmem>>, vector<1x32xf32>
    %c0_9 = arith.constant 0 : index
    %c0_10 = arith.constant 0 : index
    %10 = vector.load %arg5[%c0_9, %c0_10] : memref<1x32xf32, #tpu.memory_space<vmem>>, vector<1x32xf32>
    %cst_11 = arith.constant dense<0.000000e+00> : vector<2xf32>
    %11 = vector.multi_reduction <add>, %8, %cst_11 [1] : vector<2x32xf32> to vector<2xf32>
    %12 = vector.shape_cast %11 : vector<2xf32> to vector<2x1xf32>
    %cst_12 = arith.constant 3.200000e+01 : f32
    %13 = vector.broadcast %cst_12 : f32 to vector<2x1xf32>
    %14 = arith.divf %12, %13 : vector<2x1xf32>
    %15 = vector.broadcast %14 : vector<2x1xf32> to vector<2x32xf32>
    %16 = arith.subf %8, %15 : vector<2x32xf32>
    %17 = arith.mulf %16, %16 : vector<2x32xf32>
    %cst_13 = arith.constant dense<0.000000e+00> : vector<2xf32>
    %18 = vector.multi_reduction <add>, %17, %cst_13 [1] : vector<2x32xf32> to vector<2xf32>
    %19 = vector.shape_cast %18 : vector<2xf32> to vector<2x1xf32>
    %cst_14 = arith.constant 3.200000e+01 : f32
    %20 = vector.broadcast %cst_14 : f32 to vector<2x1xf32>
    %21 = arith.divf %19, %20 : vector<2x1xf32>
    %cst_15 = arith.constant 9.99999997E-7 : f32
    %22 = vector.broadcast %cst_15 : f32 to vector<2x1xf32>
    %23 = arith.addf %21, %22 : vector<2x1xf32>
    %24 = math.rsqrt %23 : vector<2x1xf32>
    %25 = vector.broadcast %24 : vector<2x1xf32> to vector<2x32xf32>
    %26 = arith.mulf %16, %25 : vector<2x32xf32>
    %27 = vector.broadcast %9 : vector<1x32xf32> to vector<2x32xf32>
    %28 = arith.mulf %26, %27 : vector<2x32xf32>
    %29 = vector.broadcast %10 : vector<1x32xf32> to vector<2x32xf32>
    %30 = arith.addf %28, %29 : vector<2x32xf32>
    %c0_16 = arith.constant 0 : index
    %c0_17 = arith.constant 0 : index
    %31 = vector.load %arg6[%c0_16, %c0_17] : memref<32x16xf32, #tpu.memory_space<vmem>>, vector<32x16xf32>
    %cst_18 = arith.constant dense<0.000000e+00> : vector<2x16xf32>
    %32 = tpu.matmul %30, %31, %cst_18 {dimension_numbers = #tpu.dot_dimension_numbers<[1], [0], [0], [1], [0, 0, 1, 1], [], []>} : vector<2x32xf32>, vector<32x16xf32>, vector<2x16xf32> -> vector<2x16xf32>
    %c0_19 = arith.constant 0 : index
    %c0_20 = arith.constant 0 : index
    %33 = vector.load %arg7[%c0_19, %c0_20] : memref<1x16xf32, #tpu.memory_space<vmem>>, vector<1x16xf32>
    %34 = vector.broadcast %33 : vector<1x16xf32> to vector<2x16xf32>
    %35 = arith.addf %32, %34 : vector<2x16xf32>
    %c0_21 = arith.constant 0 : index
    %c0_22 = arith.constant 0 : index
    %36 = vector.load %arg8[%c0_21, %c0_22] : memref<16x32xf32, #tpu.memory_space<vmem>>, vector<16x32xf32>
    %cst_23 = arith.constant dense<0.000000e+00> : vector<2x32xf32>
    %37 = tpu.matmul %35, %36, %cst_23 {dimension_numbers = #tpu.dot_dimension_numbers<[1], [0], [0], [1], [0, 0, 1, 1], [], []>} : vector<2x16xf32>, vector<16x32xf32>, vector<2x32xf32> -> vector<2x32xf32>
    %c0_24 = arith.constant 0 : index
    %c0_25 = arith.constant 0 : index
    %38 = vector.load %arg9[%c0_24, %c0_25] : memref<1x32xf32, #tpu.memory_space<vmem>>, vector<1x32xf32>
    %39 = vector.broadcast %38 : vector<1x32xf32> to vector<2x32xf32>
    %40 = arith.addf %37, %39 : vector<2x32xf32>
    %41 = arith.mulf %6, %6 : vector<2x32xf32>
    %cst_26 = arith.constant dense<0.000000e+00> : vector<2xf32>
    %42 = vector.multi_reduction <add>, %41, %cst_26 [1] : vector<2x32xf32> to vector<2xf32>
    %43 = vector.shape_cast %42 : vector<2xf32> to vector<2x1xf32>
    %cst_27 = arith.constant 9.99999996E-13 : f32
    %44 = vector.broadcast %cst_27 : f32 to vector<2x1xf32>
    %45 = arith.addf %43, %44 : vector<2x1xf32>
    %46 = math.rsqrt %45 : vector<2x1xf32>
    %47 = vector.broadcast %46 : vector<2x1xf32> to vector<2x32xf32>
    %48 = arith.mulf %6, %47 : vector<2x32xf32>
    %49 = arith.mulf %40, %40 : vector<2x32xf32>
    %cst_28 = arith.constant dense<0.000000e+00> : vector<2xf32>
    %50 = vector.multi_reduction <add>, %49, %cst_28 [1] : vector<2x32xf32> to vector<2xf32>
    %51 = vector.shape_cast %50 : vector<2xf32> to vector<2x1xf32>
    %cst_29 = arith.constant 9.99999996E-13 : f32
    %52 = vector.broadcast %cst_29 : f32 to vector<2x1xf32>
    %53 = arith.addf %51, %52 : vector<2x1xf32>
    %54 = math.rsqrt %53 : vector<2x1xf32>
    %55 = vector.broadcast %54 : vector<2x1xf32> to vector<2x32xf32>
    %56 = arith.mulf %40, %55 : vector<2x32xf32>
    %c0_30 = arith.constant 0 : index
    %c0_31 = arith.constant 0 : index
    %57 = vector.load %arg10[%c0_30, %c0_31] : memref<1x1xf32, #tpu.memory_space<vmem>>, vector<1x1xf32>
    %58 = math.exp %57 : vector<1x1xf32>
    %cst_32 = arith.constant dense<0.000000e+00> : vector<2x2xf32>
    %59 = tpu.matmul %48, %56, %cst_32 {dimension_numbers = #tpu.dot_dimension_numbers<[1], [1], [0], [0], [0, 0, 1, 0], [], []>} : vector<2x32xf32>, vector<2x32xf32>, vector<2x2xf32> -> vector<2x2xf32>
    %60 = vector.broadcast %58 : vector<1x1xf32> to vector<2x2xf32>
    %61 = arith.mulf %59, %60 : vector<2x2xf32>
    %c0_33 = arith.constant 0 : index
    %c0_34 = arith.constant 0 : index
    %62 = vector.load %arg11[%c0_33, %c0_34] : memref<2x2xf32, #tpu.memory_space<vmem>>, vector<2x2xf32>
    tpu.vector_store %arg11[%c0_33, %c0_34], %61 {strides = array<i32>} : memref<2x2xf32, #tpu.memory_space<vmem>>, vector<2x2xf32>,
    %63 = tpu.iota {dimensions = array<i32: 0>} : vector<2x2xi32>
    %64 = tpu.iota {dimensions = array<i32: 1>} : vector<2x2xi32>
    %65 = arith.cmpi eq, %63, %64 : vector<2x2xi32>
    %cst_35 = arith.constant 0.000000e+00 : f32
    %66 = vector.broadcast %cst_35 : f32 to vector<2x2xf32>
    %67 = arith.select %65, %61, %66 : vector<2x2xi1>, vector<2x2xf32>
    %cst_36 = arith.constant dense<0.000000e+00> : vector<2xf32>
    %68 = vector.multi_reduction <add>, %67, %cst_36 [1] : vector<2x2xf32> to vector<2xf32>
    %69 = vector.shape_cast %68 : vector<2xf32> to vector<2x1xf32>
    %cst_37 = arith.constant dense<0xFF800000> : vector<2xf32>
    %70 = vector.multi_reduction <maximumf>, %61, %cst_37 [1] : vector<2x2xf32> to vector<2xf32>
    %71 = vector.shape_cast %70 : vector<2xf32> to vector<2x1xf32>
    %72 = vector.broadcast %71 : vector<2x1xf32> to vector<2x2xf32>
    %73 = arith.subf %61, %72 : vector<2x2xf32>
    %74 = math.exp %73 : vector<2x2xf32>
    %cst_38 = arith.constant dense<0.000000e+00> : vector<2xf32>
    %75 = vector.multi_reduction <add>, %74, %cst_38 [1] : vector<2x2xf32> to vector<2xf32>
    %76 = vector.shape_cast %75 : vector<2xf32> to vector<2x1xf32>
    %77 = math.log %76 : vector<2x1xf32>
    %78 = arith.addf %71, %77 : vector<2x1xf32>
    %79 = arith.subf %78, %69 : vector<2x1xf32>
    %80 = vector.shape_cast %79 : vector<2x1xf32> to vector<1x2x1xf32>
    %cst_39 = arith.constant dense<0.000000e+00> : vector<1xf32>
    %81 = vector.multi_reduction <add>, %80, %cst_39 [1, 2] : vector<1x2x1xf32> to vector<1xf32>
    %82 = vector.shape_cast %81 : vector<1xf32> to vector<1x1x1xf32>
    %83 = vector.extract %82[0, 0, 0] : f32 from vector<1x1x1xf32>
    %cst_40 = arith.constant 2.000000e+00 : f32
    %84 = arith.divf %83, %cst_40 : f32
    %cst_41 = arith.constant dense<0.000000e+00> : vector<2xf32>
    %85 = vector.multi_reduction <add>, %67, %cst_41 [0] : vector<2x2xf32> to vector<2xf32>
    %86 = vector.shape_cast %85 : vector<2xf32> to vector<1x2xf32>
    %cst_42 = arith.constant dense<0xFF800000> : vector<2xf32>
    %87 = vector.multi_reduction <maximumf>, %61, %cst_42 [0] : vector<2x2xf32> to vector<2xf32>
    %88 = vector.shape_cast %87 : vector<2xf32> to vector<1x2xf32>
    %89 = vector.broadcast %88 : vector<1x2xf32> to vector<2x2xf32>
    %90 = arith.subf %61, %89 : vector<2x2xf32>
    %91 = math.exp %90 : vector<2x2xf32>
    %cst_43 = arith.constant dense<0.000000e+00> : vector<2xf32>
    %92 = vector.multi_reduction <add>, %91, %cst_43 [0] : vector<2x2xf32> to vector<2xf32>
    %93 = vector.shape_cast %92 : vector<2xf32> to vector<1x2xf32>
    %94 = math.log %93 : vector<1x2xf32>
    %95 = arith.addf %88, %94 : vector<1x2xf32>
    %96 = arith.subf %95, %86 : vector<1x2xf32>
    %97 = vector.shape_cast %96 : vector<1x2xf32> to vector<1x1x2xf32>
    %cst_44 = arith.constant dense<0.000000e+00> : vector<1xf32>
    %98 = vector.multi_reduction <add>, %97, %cst_44 [1, 2] : vector<1x1x2xf32> to vector<1xf32>
    %99 = vector.shape_cast %98 : vector<1xf32> to vector<1x1x1xf32>
    %100 = vector.extract %99[0, 0, 0] : f32 from vector<1x1x1xf32>
    %cst_45 = arith.constant 2.000000e+00 : f32
    %101 = arith.divf %100, %cst_45 : f32
    %102 = arith.addf %84, %101 : f32
    %cst_46 = arith.constant 5.000000e-01 : f32
    %103 = arith.mulf %102, %cst_46 : f32
    %104 = vector.broadcast %103 : f32 to vector<1x1xf32>
    %c0_47 = arith.constant 0 : index
    %c0_48 = arith.constant 0 : index
    %105 = vector.load %arg12[%c0_47, %c0_48] : memref<1x1xf32, #tpu.memory_space<vmem>>, vector<1x1xf32>
    tpu.vector_store %arg12[%c0_47, %c0_48], %104 {strides = array<i32>} : memref<1x1xf32, #tpu.memory_space<vmem>>, vector<1x1xf32>,
    return
  }
}

</mosaic_0001>

<bundles_post_ra>
// kernel: mul.4
= control target key start
LH: loop header
LB: loop body
LE: loop exit
PB: predicated region body
PF: predicated region fallthrough
CT: control target
= control target key end

     0   :  { %s34_s0 = inlined_call_operand.vmem [shape: f32[768], index: 0, kind: input, shape index: {}]   ;;  %s35_s1 = inlined_call_operand.vmem [shape: f32[768], index: 1, kind: input, shape index: {}]   ;;  %s36_s2 = inlined_call_operand.vmem [shape: f32[768], index: 2, kind: output, shape index: {}]  }
   0x1   :  { %v3_v0 = vld [vmem:[%s34_s0] sm:$0x3f] }
   0x2   :  { %v4_v1 = vld [vmem:[%s35_s1] sm:$0x3f] }
   0x3   :  { %v7_v2 = vmul.f32 %v4_v1, %v3_v0 }
   0x5   :  { %9 = vst [vmem:[%s36_s2] sm:$0xff] %v7_v2 }

// kernel: _lambda_.8
= control target key start
LH: loop header
LB: loop body
LE: loop exit
PB: predicated region body
PF: predicated region fallthrough
CT: control target
= control target key end

     0   :  { %s708_s12 = smov 0   ;;  %s710_s13 = smov 0   ;;  %s771_s0 = inlined_call_operand.vmem [shape: bf16[8,768], index: 0, kind: input, shape index: {}]   ;;  %s772_s1 = inlined_call_operand.vmem [shape: bf16[768,32], index: 1, kind: input, shape index: {}]   ;;  %s773_s2 = inlined_call_operand.vmem [shape: f32[1,32], index: 2, kind: input, shape index: {}]   ;;  %s774_s3 = inlined_call_operand.vmem [shape: f32[8,32], index: 3, kind: output, shape index: {}]  }
   0x1   :  { %s712_s14 = smov 0  }
   0x2 LB: > { %s25_s15 = sadd.s32 1, %s681_s13  ;;  %p569_p0 = scmp.ge.s32.totalorder %s685_s14, 1  ;;  %s685_s14 = sphi %s712_s14, %s13_s14   ;;  %s681_s13 = sphi %s710_s13, %s776_s13   ;;  %s677_s12 = sphi %s708_s12, %s775_s12  }
   0x3   : > { %p26_p1 = scmp.ge.s32.totalorder %s25_s15, 3  ;;  %p189_p2 = scmp.lt.s32.totalorder %s685_s14, 4 }
   0x5   : > { %s778_s15 = smov (%p26_p1, %s25_s15), 0  ;;  %p190_p3 = pnand %p569_p0, %p189_p2 }
   0x6   : > { %s570_s16 = sshll.u32 (!%p190_p3), %s677_s12, 1  ;;  %s572_s17 = sshll.u32 (!%p190_p3), %s677_s12, 5 }
   0x7   : > { %193 = sbr.rel (%p190_p3) target bundleno = 285 (0x11d), region = 32  ;;  %p233_p4 = scmp.lt.s32.totalorder (!%p190_p3), %s570_s16, 5 }
   0x8   : > { %p241_p5 = scmp.lt.s32.totalorder (!%p190_p3), %s572_s17, 95  ;;  %p574_p6 = scmp.ne.s32.totalorder (!%p190_p3), %s677_s12, 0 }
   0xe   : > { %s780_s16 = smov (!%p233_p4, %s570_s16), 5  ;;  %s782_s17 = smov (!%p241_p5, %s572_s17), 95 }
   0xf   : > { %s571_s18 = sshll.u32 %s780_s16, 2  ;;  %s573_s22 = sshll.u32 %s782_s17, 2  ;;  %vm264_vm0 = vcmask (!%p574_p6), 261120   ;;  %v687_v0 = vmov (!%p574_p6), 0.0  }
  0x10   : > { %s238_s21 = scalar_lea.vmem %s771_s0, %s571_s18  ;;  %s736_s25 = scalar_lea.vmem %s772_s1, %s573_s22  ;;  %265 = vst.msk [vmem:[#allocation2] sm:$0xff] (!%p574_p6), %vm264_vm0, %v687_v0 }
  0x11   : > { %263 = sbr.rel (%p574_p6) target bundleno = 24 (0x18), region = 36 }
  0x18 PF: > { %v645_v1 = vld [vmem:[%s736_s25 + $0x40] sm:$0xff]   ;;  %v647_v3 = vld [vmem:[%s736_s25 + $0x48] sm:$0xff]   ;;  %v649_v5 = vld [vmem:[%s736_s25 + $0x50] sm:$0xff]   ;;  %vm444_vm1 = vcmask 261120   ;;  %p593_p7 = scmp.ne.s32.totalorder %s677_s12, 2 }
  0x19   : > { %v646_v2 = vld [vmem:[%s736_s25] sm:$0xff]   ;;  %598 = vmatprep.subr.bf16.mxu0 %v645_v1  ;;  %v648_v4 = vld [vmem:[%s736_s25 + $0x8] sm:$0xff]   ;;  %v650_v6 = vld [vmem:[%s736_s25 + $0x10] sm:$0xff]  }
  0x1a   : > { %599 = vmatpush3.bf16.msra.mxu0 %v646_v2  ;;  %v651_v7 = vld [vmem:[%s736_s25 + $0x58] sm:$0xff]   ;;  %v653_v9 = vld [vmem:[%s736_s25 + $0x60] sm:$0xff]   ;;  %v655_v11 = vld [vmem:[%s736_s25 + $0x68] sm:$0xff]  }
  0x1b   : > { %600 = vmatprep.subr.bf16.mxu0 %v647_v3  ;;  %v652_v8 = vld [vmem:[%s736_s25 + $0x18] sm:$0xff]   ;;  %v654_v10 = vld [vmem:[%s736_s25 + $0x20] sm:$0xff]   ;;  %v656_v14 = vld [vmem:[%s736_s25 + $0x28] sm:$0xff]  }
  0x1c   : > { %v267_v12 = vld [vmem:[%s238_s21] sm:$0xff]  ;;  %v657_v15 = vld [vmem:[%s736_s25 + $0x70] sm:$0xff]   ;;  %v659_v17 = vld [vmem:[%s736_s25 + $0x78] sm:$0xff]  }
  0x1d   : > { %v576_v13 = vcombine.high %v267_v12, %v267_v12  ;;  %v658_v16 = vld [vmem:[%s736_s25 + $0x30] sm:$0xff]   ;;  %v660_v18 = vld [vmem:[%s736_s25 + $0x38] sm:$0xff]   ;;  %v575_v19 = vcombine.low %v267_v12, %v267_v12  ;;  %v266_v21 = vld [vmem:[#allocation2] sm:$0xff] }
  0x1e   : > { %601 = vmatpush3.bf16.msra.mxu0 %v648_v4  ;;  %v594_v28 = vld [vmem:[%s773_s2] ss:$0 sm:$0xff] (!%p593_p7) }
  0x1f   : > { %602 = vmatprep.subr.bf16.mxu0 %v649_v5  ;;  %435 = vmatprep.mubr.bf16.mxu0 %v576_v13 }
  0x22   : > { %603 = vmatpush3.bf16.msra.mxu0 %v650_v6 }
  0x23   : > { %604 = vmatprep.subr.bf16.mxu0 %v651_v7 }
  0x26   : > { %605 = vmatpush3.bf16.msra.mxu0 %v652_v8 }
  0x27   : > { %606 = vmatprep.subr.bf16.mxu0 %v653_v9 }
  0x2a   : > { %607 = vmatpush3.bf16.msra.mxu0 %v654_v10 }
  0x2b   : > { %608 = vmatprep.subr.bf16.mxu0 %v655_v11 }
  0x2e   : > { %609 = vmatpush3.bf16.msra.mxu0 %v656_v14 }
  0x2f   : > { %610 = vmatprep.subr.bf16.mxu0 %v657_v15 }
  0x32   : > { %611 = vmatpush3.bf16.msra.mxu0 %v658_v16 }
  0x33   : > { %612 = vmatprep.subr.bf16.mxu0 %v659_v17 }
  0x36   : > { %613 = vmatpush3.bf16.msra.mxu0 %v660_v18 }
  0x39   : > { %436 = vmatmul.mubr.bf16.vlgmr.msra.gmra.mrb[0].mxu0 %v575_v19 }
 0x10c   : > { %v614_v20 = vpop.f32.mrb[0].mxu0  ;;  %449 = sbr.rel (%p593_p7) target bundleno = 285 (0x11d), region = 40 }
 0x10d   : > { %v615_v22 = vpop.f32.mrb[1].mxu0 }
 0x10e   : > { %v616_v23 = vadd.f32 %v615_v22, %v614_v20  ;;  %v617_v24 = vpop.f32.mrb[2].mxu0 }
 0x10f   : > { %v618_v25 = vpop.f32.mrb[3].mxu0 }
 0x110   : > { %v443_v26 = vadd.f32 %v616_v23, %v266_v21 }
 0x112   : > { %445 = vst.msk [vmem:[#allocation2] sm:$0xff] %vm444_vm1, %v443_v26 }
 0x119   : > { %v450_v27 = vld [vmem:[#allocation2] sm:$0xff] }
 0x11a   : > { %v458_v29 = vadd.f32 %v594_v28, %v450_v27 }
 0x11c   : > { %459 = vst.msk [vmem:[%s774_s3] sm:$0xff] %vm444_vm1, %v458_v29 }
 0x11d PF: > { %s13_s14 = sadd.s32 1, %s685_s14   ;;  %s775_s12 = smov %s681_s13 }
 0x11e   : > { %p10_p8 = scmp.ge.s32.totalorder %s13_s14, 5   ;;  %s776_s13 = smov %s778_s15 }
 0x120   :  { %12 = sbr.rel (!%p10_p8) target bundleno = 2 (0x2), region = 76 }

// kernel: _lambda_.11
= control target key start
LH: loop header
LB: loop body
LE: loop exit
PB: predicated region body
PF: predicated region fallthrough
CT: control target
= control target key end

     0   :  { %s860_s0 = inlined_call_operand.vmem [shape: bf16[2,32], index: 0, kind: input, shape index: {}]   ;;  %s861_s1 = inlined_call_operand.vmem [shape: f32[32,32], index: 1, kind: input, shape index: {}]   ;;  %s862_s2 = inlined_call_operand.vmem [shape: f32[1,32], index: 2, kind: input, shape index: {}]   ;;  %s863_s3 = inlined_call_operand.vmem [shape: bf16[2,32], index: 3, kind: input, shape index: {}]   ;;  %s864_s4 = inlined_call_operand.vmem [shape: f32[1,32], index: 4, kind: input, shape index: {}]   ;;  %s865_s5 = inlined_call_operand.vmem [shape: f32[1,32], index: 5, kind: input, shape index: {}]   ;;  %s866_s6 = inlined_call_operand.vmem [shape: f32[32,16], index: 6, kind: input, shape index: {}]   ;;  %s867_s7 = inlined_call_operand.vmem [shape: f32[1,16], index: 7, kind: input, shape index: {}]   ;;  %s868_s8 = inlined_call_operand.vmem [shape: f32[16,32], index: 8, kind: input, shape index: {}]   ;;  %s869_s9 = inlined_call_operand.vmem [shape: f32[1,32], index: 9, kind: input, shape index: {}]   ;;  %s870_s10 = inlined_call_operand.<no memory space> [shape: f32[1,1], index: 10, kind: input, shape index: {}]   ;;  %s871_s11 = inlined_call_operand.hbm [shape: f32[2,2], index: 11, kind: output, shape index: {0}]   ;;  %s872_s12 = inlined_call_operand.hbm [shape: f32[1,1], index: 12, kind: output, shape index: {1}]  }
   0x1   :  { %v18_v0 = vstv %s870_s10 }
   0x2   :  { %19 = vst [vmem:[#allocation2] sm:$0x1] %v18_v0 }
   0x3   :  { %20 = vsyncpa [#allocation4], 0  ;;  %v131_v1 = vld [vmem:[%s863_s3] sm:$0x1]  ;;  %vm135_vm0 = vcmask 254976  }
   0x4   :  { %21 = vsyncpa [#allocation6], 0  ;;  %v132_v2 = vunpack.c.l.bf16 %v131_v1  ;;  %v164_v9 = vld [vmem:[%s866_s6] sm:$0xff]  ;;  %v165_v10 = vld [vmem:[%s866_s6 + $0x8] sm:$0xff]  ;;  %v694_v12 = vmov 0.0|0.0   ;;  %vm695_vm1 = vmmov 0   ;;  %v425_v56 = vlaneseq }
   0x5   :  { %v166_v11 = vld [vmem:[%s866_s6 + $0x10] sm:$0xff]  ;;  %610 = vmatprep.subr.bf16.mxu1 %v694_v12  ;;  %v611_v13 = vpack.c.bf16 %v165_v10, %v164_v9  ;;  %v167_v14 = vld [vmem:[%s866_s6 + $0x18] sm:$0xff]  ;;  %v696_v15 = vmov 0.0   ;;  %604 = vmatprep.subr.bf16.mxu0 %v694_v12  ;;  %v46_v17 = vld [vmem:[%s861_s1] sm:$0xff]  ;;  %vm57_vm2 = vcmask 261120   ;;  %vm257_vm3 = vcmask 130048  }
   0x6   :  { %v136_v3 = vsel %vm135_vm0, %v132_v2, 0.0  ;;  %589 = vmatprep.mubr.msk.f32.mxu1 %vm695_vm1, %v696_v15  ;;  %578 = vmatprep.mubr.msk.f32.mxu0 %vm695_vm1, %v696_v15  ;;  %v614_v16 = vpack.c.bf16 %v167_v14, %v166_v11  ;;  %v47_v18 = vld [vmem:[%s861_s1 + $0x8] sm:$0xff]  ;;  %v48_v19 = vld [vmem:[%s861_s1 + $0x10] sm:$0xff]  ;;  %v49_v21 = vld [vmem:[%s861_s1 + $0x18] sm:$0xff]  ;;  %v697_v54 = vmov 0   ;;  %v426_v57 = vshrl.u32 %v425_v56, 7 }
   0x7   :  { %137 = vadd.xlane.f32.xlu0 %v136_v3  ;;  %612 = vmatpush3.bf16.msra.mxu1 %v611_v13  ;;  %v605_v20 = vpack.c.bf16 %v47_v18, %v46_v17  ;;  %v608_v22 = vpack.c.bf16 %v49_v21, %v48_v19  ;;  %v44_v23 = vld [vmem:[%s860_s0] sm:$0x1]  ;;  %v249_v25 = vld [vmem:[%s868_s8 + $0x8] sm:$0xff]  ;;  %vm434_vm4 = vcmask 9216   ;;  %v439_v13 = vand.u32 127, %v425_v56 }
   0x8   :  { %613 = vmatprep.subr.bf16.mxu1 %v694_v12  ;;  %v248_v24 = vld [vmem:[%s868_s8] sm:$0xff]  ;;  %v45_v26 = vunpack.c.l.bf16 %v44_v23  ;;  %629 = vset.pattern.permute.xlu0 %v697_v54  ;;  %v427_v58 = vsub.s32 0, %v426_v57  ;;  %vm458_vm6 = vcmask 1024   ;;  %vm498_vm7 = vcmask 8192  }
   0x9   :  { %606 = vmatpush3.bf16.msra.mxu0 %v605_v20  ;;  %v617_v27 = vpack.c.bf16 %v249_v25, %v248_v24  ;;  %v547_v32 = vld [vmem:[%s864_s4] ss:$0 sm:$0xff]  ;;  %vm440_vm5 = vcmp.eq.s32.totalorder %v426_v57, %v439_v13 }
   0xa   :  { %607 = vmatprep.subr.bf16.mxu0 %v694_v12  ;;  %v548_v34 = vld [vmem:[%s865_s5] ss:$0 sm:$0xff] }
   0xb   :  { %615 = vmatpush3.bf16.msra.mxu1 %v614_v16  ;;  %v549_v39 = vld [vmem:[%s867_s7] ss:$0 sm:$0xff] }
   0xc   :  { %599 = vmatprep.subr.mxu1 %v696_v15  ;;  %v545_v43 = vld [vmem:[%s862_s2] ss:$0 sm:$0xff]  ;;  %s698_s2 = smov [#allocation3]  }
   0xd   :  { %609 = vmatpush3.bf16.msra.mxu0 %v608_v22  ;;  %v551_v44 = vld [vmem:[%s869_s9] ss:$0 sm:$0xff]  ;;  %s523_s7 = sshll.u32 %s698_s2, 4  ;;  %s524_s7 = int_to_ptr.vmem [resolvable:$true] %s523_s7 }
   0xe   :  { %616 = vmatprep.subr.bf16.mxu0 %v694_v12  ;;  %v345_v53 = vld [vmem:[#allocation2] sm:$0x1]  ;;  %s646_s9 = scalar_lea.vmem %s524_s7, 32  ;;  %p651_p1 = scmp.lt.s32.totalorder %s524_s7, %s524_s7 }
   0xf   :  { %v346_v55 = vmul.f32 1.442695, %v345_v53  ;;  %p647_p0 = scmp.ne.s32.totalorder %s524_s7, %s646_s9  ;;  %p652_p2 = scmp.lt.s32.totalorder %s646_s9, %s646_s9 }
  0x10   :  { %579 = vmatmul.mubr.msk.f32.vlgmr.msra.gmra.mrb[0].mxu0 %vm57_vm2, %v45_v26 }
  0x11   :  { %618 = vmatpush3.bf16.msra.mxu0 %v617_v27  ;;  %596 = vmatprep.mubr.msk.f32.mxu0 %vm695_vm1, %v696_v15  ;;  %p653_p3 = por %p652_p2, %p651_p1 }
  0x13   :  { %p654_p4 = pnand %p653_p3, %p647_p0 }
  0x94   :  { %v138_v4 = vpop.xlane.xlu0 %137 }
  0x95   :  { %v140_v5 = vmul.f32 0.03125, %v138_v4 }
  0x97   :  { %v141_v6 = vsub.f32 %v132_v2, %v140_v5 }
  0x99   :  { %v142_v7 = vmul.f32 %v141_v6, %v141_v6 }
  0x9b   :  { %v143_v8 = vsel %vm135_vm0, %v142_v7, 0.0 }
  0x9c   :  { %144 = vadd.xlane.f32.xlu0 %v143_v8 }
  0xe3   :  { %v127_v37 = vpop.f32.mrb[0].mxu0 }
  0xe4   :  { %v580_v38 = vpop.f32.mrb[1].mxu0  ;;  %v128_v46 = vadd.f32 %v545_v43, %v127_v37 }
  0xe6   :  { %v331_v51 = vmul.f32 %v128_v46, %v128_v46 }
  0xe8   :  { %v332_v52 = vsel %vm135_vm0, %v331_v51, 0.0 }
 0x129   :  { %v145_v28 = vpop.xlane.xlu0 %144 }
 0x12a   :  { %v146_v29 = vmul.f32 0.03125, %v145_v28 }
 0x12c   :  { %v147_v30 = vadd.f32 1e-06, %v146_v29 }
 0x12e   :  { %630 = vrsqrt.f32 %v147_v30 }
 0x12f   :  { %632 = vpow2.f32 %v346_v55 }
 0x138   :  { %v631_v31 = vpop.eup %630 }
 0x139   :  { %v149_v33 = vmul.f32 %v631_v31, %v141_v6  ;;  %v633_v59 = vpop.eup %632 }
 0x13a   :  { %v428_v60 = vrot.slane %v633_v59, %v427_v58 }
 0x13b   :  { %v156_v35 = vmul.f32 %v547_v32, %v149_v33 }
 0x13c   :  { %430 = vperm.xlu0 %629, %v428_v60  }
 0x13d   :  { %v163_v36 = vadd.f32 %v548_v34, %v156_v35 }
 0x13f   :  { %590 = vmatmul.mubr.msk.f32.vlgmr.msra.gmra.mrb[0].mxu1 %vm57_vm2, %v163_v36 }
 0x140   :  { %601 = vmatprep.mubr.msk.f32.mxu1 %vm695_vm1, %v696_v15 }
 0x1bb   :  { %v431_v5 = vpop.permute.xlu0 %430 }
 0x212   :  { %v244_v40 = vpop.f32.mrb[0].mxu1 }
 0x213   :  { %v245_v41 = vadd.f32 %v549_v39, %v244_v40  ;;  %v591_v42 = vpop.f32.mrb[1].mxu1 }
 0x215   :  { %597 = vmatmul.mubr.msk.f32.vlgmr.msra.gmra.mrb[2].mxu0 %vm257_vm3, %v245_v41 }
 0x2e8   :  { %v327_v45 = vpop.f32.mrb[2].mxu0 }
 0x2e9   :  { %v328_v47 = vadd.f32 %v551_v44, %v327_v45  ;;  %v598_v48 = vpop.f32.mrb[3].mxu0 }
 0x2eb   :  { %v338_v49 = vmul.f32 %v328_v47, %v328_v47 }
 0x2ed   :  { %v339_v50 = vsel %vm135_vm0, %v338_v49, 0.0 }
 0x2ee   :  { %340 = vadd.xlane.f32.xlu1 %v339_v50 }
 0x2f2   :  { %333 = vadd.xlane.f32.xlu1 %v332_v52 }
 0x37b   :  { %v341_v61 = vpop.xlane.xlu1 %340 }
 0x37c   :  { %v342_v62 = vadd.f32 1e-12, %v341_v61 }
 0x37e   :  { %634 = vrsqrt.f32 %v342_v62 }
 0x37f   :  { %v334_v63 = vpop.xlane.xlu1 %333 }
 0x380   :  { %v335_v0 = vadd.f32 1e-12, %v334_v63 }
 0x382   :  { %636 = vrsqrt.f32 %v335_v0 }
 0x388   :  { %v635_v1 = vpop.eup %634 }
 0x389   :  { %v344_v2 = vmul.f32 %v635_v1, %v328_v47 }
 0x38b   :  { %600 = vmatpush3.xpose.msk.msra.mxu1 %vm57_vm2, %v344_v2 }
 0x38c   :  { %v637_v3 = vpop.eup %636 }
 0x38d   :  { %v337_v4 = vmul.f32 %v637_v3, %v128_v46 }
 0x38f   :  { %602 = vmatmul.mubr.msk.f32.vlgmr.msra.gmra.mrb[2].mxu1 %vm57_vm2, %v337_v4 }
 0x462   :  { %v420_v6 = vpop.f32.mrb[2].mxu1 }
 0x463   :  { %v433_v7 = vmul.f32 %v431_v5, %v420_v6  ;;  %v603_v8 = vpop.f32.mrb[3].mxu1 }
 0x465   :  { %v445_v9 = vsel %vm434_vm4, %v433_v7, -inf  ;;  %435 = vst.msk [vmem:[#allocation3] sm:$0x3] %vm434_vm4, %v433_v7  ;;  %v441_v16 = vsel %vm440_vm5, %v433_v7, 0.0 }
 0x466   :  { %446 = vmax.xlane.f32.xlu1 %v445_v9  ;;  %v442_v17 = vsel %vm434_vm4, %v441_v16, 0.0  ;;  %v478_v18 = vrot.slane %v445_v9, 4 }
 0x467   :  { %v472_v34 = vrot.slane %v442_v17, 4 }
 0x468   :  { %v479_v19 = vmax.f32 %v445_v9, %v478_v18 }
 0x469   :  { %v473_v35 = vadd.f32 %v472_v34, %v442_v17 }
 0x46a   :  { %v480_v20 = vrot.slane %v479_v19, 2 }
 0x46b   :  { %v474_v37 = vrot.slane %v473_v35, 2 }
 0x46c   :  { %v481_v21 = vmax.f32 %v479_v19, %v480_v20 }
 0x46d   :  { %v475_v39 = vadd.f32 %v474_v37, %v473_v35 }
 0x46e   :  { %v482_v22 = vrot.slane %v481_v21, 1 }
 0x46f   :  { %v476_v43 = vrot.slane %v475_v39, 1 }
 0x470   :  { %v483_v23 = vmax.f32 %v481_v21, %v482_v22 }
 0x471   :  { %v477_v48 = vadd.f32 %v476_v43, %v475_v39 }
 0x472   :  { %v484_v24 = vsub.f32 %v433_v7, %v483_v23 }
 0x474   :  { %v485_v25 = vmul.f32 1.442695, %v484_v24 }
 0x4f3   :  { %v447_v10 = vpop.xlane.xlu1 %446 }
 0x4f4   :  { %v448_v11 = vsub.f32 %v433_v7, %v447_v10 }
 0x4f6   :  { %v449_v12 = vmul.f32 1.442695, %v448_v11 }
 0x4f8   :  { %638 = vpow2.f32 %v449_v12 }
 0x4f9   :  { %640 = vpow2.f32 %v485_v25 }
 0x502   :  { %v639_v14 = vpop.eup %638 }
 0x503   :  { %v451_v15 = vsel %vm434_vm4, %v639_v14, 0.0  ;;  %v641_v26 = vpop.eup %640 }
 0x504   :  { %452 = vadd.xlane.f32.xlu1 %v451_v15  ;;  %v487_v27 = vsel %vm434_vm4, %v641_v26, 0.0 }
 0x505   :  { %v488_v28 = vrot.slane %v487_v27, 4 }
 0x507   :  { %v489_v29 = vadd.f32 %v488_v28, %v487_v27 }
 0x508   :  { %443 = vadd.xlane.f32.xlu1 %v442_v17 }
 0x509   :  { %v490_v30 = vrot.slane %v489_v29, 2 }
 0x50b   :  { %v491_v31 = vadd.f32 %v490_v30, %v489_v29 }
 0x50d   :  { %v492_v32 = vrot.slane %v491_v31, 1 }
 0x50f   :  { %v493_v33 = vadd.f32 %v492_v32, %v491_v31 }
 0x511   :  { %642 = vlog2.f32 %v493_v33 }
 0x51b   :  { %v643_v38 = vpop.eup %642 }
 0x51c   :  { %v495_v40 = vmul.f32 0.6931472, %v643_v38 }
 0x51e   :  { %v496_v45 = vadd.f32 %v495_v40, %v483_v23 }
 0x520   :  { %v497_v50 = vsub.f32 %v496_v45, %v477_v48 }
 0x522   :  { %v499_v51 = vsel %vm498_vm7, %v497_v50, 0.0 }
 0x591   :  { %v453_v36 = vpop.xlane.xlu1 %452 }
 0x592   :  { %644 = vlog2.f32 %v453_v36 }
 0x595   :  { %v444_v46 = vpop.xlane.xlu1 %443 }
 0x59c   :  { %v645_v41 = vpop.eup %644 }
 0x59d   :  { %v455_v42 = vmul.f32 0.6931472, %v645_v41 }
 0x59f   :  { %v456_v44 = vadd.f32 %v455_v42, %v447_v10 }
 0x5a1   :  { %v457_v47 = vsub.f32 %v456_v44, %v444_v46 }
 0x5a3   :  { %v459_v49 = vsel %vm458_vm6, %v457_v47, 0.0 }
 0x5a4   :  { %460 = vadd.xlane.f32.xlu1 %v459_v49 }
 0x5a8   :  { %500 = vadd.xlane.f32.xlu1 %v499_v51 }
 0x5a9   :  { %657 = shalt.err (!%p654_p4)
}
 0x5aa   :  { %s658_s13 = scalar_lea.hbm %s871_s11, 32 }
 0x5ab   :  { %p659_p5 = scmp.ne.s32.totalorder %s871_s11, %s658_s13  ;;  %p662_p6 = scmp.lt.u32.totalorder %s658_s13, %s871_s11 }
 0x5ad   :  { %p664_p7 = pnand %p662_p6, %p659_p5 }
 0x5af   :  { %667 = shalt.err (!%p664_p7)
}
 0x5b0   :  { %526 = dma.vmem_to_hbm [thread:$0]  %s524_s7, 32, %s871_s11, [#allocation4]   ;;  %vm515_vm8 = vcmask 0  }
 0x5b1   :  { %s699_s23 = smov [#allocation5]  }
 0x5b2   :  { %s533_s24 = sshll.u32 %s699_s23, 4  ;;  %s534_s24 = int_to_ptr.vmem [resolvable:$true] %s533_s24 }
 0x5b3   :  { %s668_s0 = scalar_lea.vmem %s534_s24, 16  ;;  %s672_s1 = scalar_lea.vmem %s534_s24, 32 }
 0x5b4   :  { %p669_p8 = scmp.ne.s32.totalorder %s534_s24, %s668_s0  ;;  %p673_p9 = scmp.lt.s32.totalorder %s534_s24, %s534_s24 }
 0x5b5   :  { %p674_p10 = scmp.lt.s32.totalorder %s672_s1, %s668_s0 }
 0x5b7   :  { %p675_p11 = por %p674_p10, %p673_p9 }
 0x5b9   :  { %p676_p12 = pnand %p675_p11, %p669_p8 }
 0x631   :  { %v461_v52 = vpop.xlane.xlu1 %460 }
 0x632   :  { %v462_v53 = vrot.slane %v461_v52, 4 }
 0x634   :  { %v463_v54 = vadd.f32 %v462_v53, %v461_v52 }
 0x635   :  { %v501_v55 = vpop.xlane.xlu1 %500 }
 0x636   :  { %v464_v56 = vrot.slane %v463_v54, 2  ;;  %v502_v57 = vrot.slane %v501_v55, 4 }
 0x638   :  { %v503_v58 = vadd.f32 %v502_v57, %v501_v55  ;;  %v465_v59 = vadd.f32 %v464_v56, %v463_v54 }
 0x63a   :  { %v504_v60 = vrot.slane %v503_v58, 2  ;;  %v466_v61 = vrot.slane %v465_v59, 1 }
 0x63c   :  { %v505_v62 = vadd.f32 %v504_v60, %v503_v58  ;;  %v467_v63 = vadd.f32 %v466_v61, %v465_v59 }
 0x63e   :  { %619 = vpush %v467_v63  ;;  %v506_v0 = vrot.slane %v505_v62, 1 }
 0x640   :  { %v507_v1 = vadd.f32 %v506_v0, %v505_v62 }
 0x642   :  { %621 = vpush %v507_v1 }
 0x66f   :  { %s620_s19 = spop %619 }
 0x670   :  { %s471_s20 = smul.f32 0.5, %s620_s19 }
 0x673   :  { %s622_s21 = spop %621 }
 0x674   :  { %s511_s11 = smul.f32 0.5, %s622_s21 }
 0x676   :  { %s512_s22 = sadd.f32 %s511_s11, %s471_s20 }
 0x678   :  { %s513_s10 = smul.f32 0.5, %s512_s22 }
 0x67a   :  { %v514_v2 = vstv %s513_s10 }
 0x67b   :  { %516 = vst.msk [vmem:[#allocation5] sm:$0x1] %vm515_vm8, %v514_v2 }
 0x67c   :  { %679 = shalt.err (!%p676_p12)
}
 0x67d   :  { %s680_s26 = scalar_lea.hbm %s872_s12, 16 }
 0x67e   :  { %p681_p13 = scmp.ne.s32.totalorder %s872_s12, %s680_s26  ;;  %p684_p0 = scmp.lt.u32.totalorder %s680_s26, %s872_s12 }
 0x680   :  { %p686_p1 = pnand %p684_p0, %p681_p13 }
 0x682   :  { %689 = shalt.err (!%p686_p1)
}
 0x683   :  { %536 = dma.vmem_to_hbm [thread:$0]  %s534_s24, 16, %s872_s12, [#allocation6]  }
 0x684   :  { %690 = dma.done.wait [#allocation4], 32  }
 0x685   :  { %691 = vsyncadd [#allocation4], 4294967264 }
 0x686   :  { %692 = dma.done.wait [#allocation6], 16  }
 0x687   :  { %693 = vsyncadd [#allocation6], 4294967280 }
 0x688   :  { %543 = vsyncpa [#allocation4], 1 }
 0x689   :  { %544 = vsyncpa [#allocation6], 1 }

// kernel: _lambda_.6
= control target key start
LH: loop header
LB: loop body
LE: loop exit
PB: predicated region body
PF: predicated region fallthrough
CT: control target
= control target key end

     0   :  { %v1685_v0 = vmov 0.0   ;;  %vm1686_vm0 = vmmov 0   ;;  %vm73_vm1 = vcmask 261120   ;;  %vm133_vm2 = vcmask 64512   ;;  %s1690_s16 = smov 120   ;;  %s1691_s17 = smov 56   ;;  %s2008_s1 = inlined_call_operand.vmem [shape: bf16[32,96], index: 1, kind: input, shape index: {}]   ;;  %s2009_s0 = inlined_call_operand.vmem [shape: bf16[2,8,32], index: 0, kind: input, shape index: {}]   ;;  %s2010_s2 = inlined_call_operand.vmem [shape: f32[1,96], index: 2, kind: input, shape index: {}]   ;;  %s2011_s3 = inlined_call_operand.vmem [shape: bf16[32,32], index: 3, kind: input, shape index: {}]   ;;  %s2012_s4 = inlined_call_operand.vmem [shape: f32[1,32], index: 4, kind: input, shape index: {}]   ;;  %s2013_s9 = inlined_call_operand.vmem [shape: bf16[32,64], index: 9, kind: input, shape index: {}]   ;;  %s2014_s5 = inlined_call_operand.vmem [shape: f32[1,32], index: 5, kind: input, shape index: {}]   ;;  %s2015_s6 = inlined_call_operand.vmem [shape: f32[1,32], index: 6, kind: input, shape index: {}]   ;;  %s2016_s11 = inlined_call_operand.vmem [shape: bf16[64,32], index: 11, kind: input, shape index: {}]   ;;  %s2017_s10 = inlined_call_operand.vmem [shape: f32[1,64], index: 10, kind: input, shape index: {}]   ;;  %s2018_s12 = inlined_call_operand.vmem [shape: f32[1,32], index: 12, kind: input, shape index: {}]   ;;  %s2019_s7 = inlined_call_operand.vmem [shape: f32[1,32], index: 7, kind: input, shape index: {}]   ;;  %s2020_s8 = inlined_call_operand.vmem [shape: f32[1,32], index: 8, kind: input, shape index: {}]   ;;  %s2021_s13 = inlined_call_operand.vmem [shape: bf16[2,8,32], index: 13, kind: output, shape index: {}]  }
   0x1   :  { %1481 = vmatprep.subr.bf16.mxu0 %v1685_v0  ;;  %v1629_v1 = vld [vmem:[%s2008_s1] sm:$0xff]   ;;  %1485 = vmatprep.mubr.msk.bf16.mxu0 %vm1686_vm0, %v1685_v0  ;;  %v1630_v2 = vld [vmem:[%s2008_s1 + $0x8] sm:$0xff]   ;;  %s1688_s1 = smov 64   ;;  %vm258_vm3 = vcmask 1043456   ;;  %s1692_s18 = smov 80   ;;  %vm580_vm4 = vcmask 130112  }
   0x2   :  { %1489 = vmatprep.subr.bf16.mxu1 %v1685_v0  ;;  %1491 = vmatprep.mubr.msk.bf16.mxu1 %vm1686_vm0, %v1685_v0  ;;  %v1786_v3 = vld [vmem:[%s2009_s0] sm:$0xff]   ;;  %s1687_s0 = smov 96   ;;  %s1693_s19 = smov 112   ;;  %vm811_vm5 = vcmask 195712   ;;  %vm1042_vm6 = vcmask 261312   ;;  %vm1288_vm7 = vcmask 523264  }
   0x3   :  { %1482 = vmatpush3.bf16.msra.mxu0 %v1629_v1  ;;  %v1389_v4 = vld [vmem:[%s2010_s2] ss:$0 sm:$0xff]  ;;  %s1689_s2 = smov 88   ;;  %s1694_s20 = smov 48   ;;  %vm1381_vm8 = vcmask 257024  }
   0x4   :  { %1483 = vmatprep.subr.bf16.mxu0 %v1685_v0  ;;  %s1695_s21 = smov 72   ;;  %s1696_s22 = smov 104  }
   0x5   :  { %s1697_s23 = smov 40   ;;  %s1698_s24 = smov 8  }
   0x6   :  { %s1699_s25 = smov 16   ;;  %s1700_s30 = smov 24  }
   0x7   :  { %1484 = vmatpush3.bf16.msra.mxu0 %v1630_v2 }
   0x8   :  { %1495 = vmatprep.subr.bf16.mxu0 %v1685_v0 }
   0xa   :  { %1486 = vmatmul.mubr.msk.bf16.vlgmr.msra.gmra.mrb[0].mxu0 %vm73_vm1, %v1786_v3 }
   0xb   :  { %1497 = vmatprep.mubr.msk.bf16.mxu0 %vm1686_vm0, %v1685_v0 }
  0xdd   :  { %v111_v5 = vpop.f32.mrb[0].mxu0 }
  0xde   :  { %v112_v6 = vadd.f32 %v1389_v4, %v111_v5  ;;  %v1487_v7 = vpop.f32.mrb[1].mxu0 }
  0xdf   :  { %v114_v8 = vpop.f32.mrb[2].mxu0 }
  0xe0   :  { %v1797_v9 = vpack.c.bf16 %v112_v6, %v112_v6  ;;  %v115_v10 = vadd.f32 %v1389_v4, %v114_v8  ;;  %v1488_v11 = vpop.f32.mrb[3].mxu0  ;;  %v118_v15 = vmul.f32 0.35355338, %v112_v6 }
  0xe2   :  { %131 = vrot.lane.b32.xlu0 %v1797_v9, %s1687_s0  ;;  %v1800_v12 = vpack.c.bf16 %v115_v10, %v115_v10  ;;  %v1806_v18 = vpack.c.bf16 %v118_v15, %v118_v15  ;;  %v119_v19 = vmul.f32 0.35355338, %v115_v10 }
  0xe4   :  { %v1813_v20 = vpack.c.bf16 %v119_v19, %v119_v19 }
  0xe6   :  { %181 = vrot.lane.b32.xlu0 %v1800_v12, %s1687_s0 }
 0x154   :  { %v132_v13 = vpop.permute.xlu0 %131 }
 0x155   :  { %v138_v14 = vsel %vm133_vm2, %v132_v13, 0 }
 0x156   :  { %1490 = vmatpush3.bf16.xpose.msra.mxu1 %v138_v14 }
 0x157   :  { %1501 = vmatprep.subr.bf16.mxu1 %v1685_v0 }
 0x158   :  { %v182_v16 = vpop.permute.xlu0 %181 }
 0x159   :  { %v187_v17 = vsel %vm133_vm2, %v182_v16, 0 }
 0x15a   :  { %1496 = vmatpush3.bf16.xpose.msra.mxu0 %v187_v17 }
 0x15b   :  { %1507 = vmatprep.subr.bf16.mxu0 %v1685_v0 }
 0x15d   :  { %1492 = vmatmul.mubr.msk.bf16.vlgmr.msra.gmra.mrb[0].mxu1 %vm133_vm2, %v1806_v18 }
 0x15e   :  { %1503 = vmatprep.mubr.msk.bf16.mxu1 %vm1686_vm0, %v1685_v0 }
 0x161   :  { %1498 = vmatmul.mubr.msk.bf16.vlgmr.msra.gmra.mrb[4].mxu0 %vm133_vm2, %v1813_v20 }
 0x162   :  { %1509 = vmatprep.mubr.msk.bf16.mxu0 %vm1686_vm0, %v1685_v0 }
 0x230   :  { %v174_v21 = vpop.f32.mrb[0].mxu1 }
 0x231   :  { %v1493_v22 = vpop.f32.mrb[1].mxu1  ;;  %v229_v23 = vsel %vm133_vm2, %v174_v21, -inf }
 0x232   :  { %230 = vmax.xlane.f32.xlu1 %v229_v23  ;;  %v177_v24 = vpop.f32.mrb[2].mxu1 }
 0x233   :  { %v1494_v25 = vpop.f32.mrb[3].mxu1 }
 0x234   :  { %v223_v26 = vpop.f32.mrb[4].mxu0 }
 0x235   :  { %v1499_v27 = vpop.f32.mrb[5].mxu0  ;;  %v232_v28 = vsel %vm133_vm2, %v223_v26, -inf }
 0x236   :  { %233 = vmax.xlane.f32.xlu1 %v232_v28  ;;  %v226_v29 = vpop.f32.mrb[6].mxu0 }
 0x237   :  { %v1500_v30 = vpop.f32.mrb[7].mxu0 }
 0x247   :  { %253 = vrot.lane.b32.xlu1 %v1797_v9, %s1688_s1 }
 0x24b   :  { %302 = vrot.lane.b32.xlu1 %v1800_v12, %s1688_s1 }
 0x24f   :  { %354 = vrot.lane.b32.xlu1 %v1797_v9, %s1689_s2 }
 0x2bf   :  { %v231_v31 = vpop.xlane.xlu1 %230 }
 0x2c0   :  { %v235_v32 = vsub.f32 %v174_v21, %v231_v31 }
 0x2c2   :  { %v237_v33 = vmul.f32 1.442695, %v235_v32 }
 0x2c3   :  { %v234_v34 = vpop.xlane.xlu1 %233 }
 0x2c4   :  { %1641 = vpow2.f32 %v237_v33  ;;  %v236_v35 = vsub.f32 %v223_v26, %v234_v34 }
 0x2c6   :  { %v239_v36 = vmul.f32 1.442695, %v236_v35 }
 0x2c7   :  { %v254_v37 = vpop.permute.xlu1 %253 }
 0x2c8   :  { %1643 = vpow2.f32 %v239_v36  ;;  %v260_v38 = vsel %vm258_vm3, %v254_v37, 0 }
 0x2c9   :  { %1502 = vmatpush3.bf16.msra.mxu1 %v260_v38 }
 0x2ca   :  { %1513 = vmatprep.subr.bf16.mxu1 %v1685_v0 }
 0x2cb   :  { %v303_v39 = vpop.permute.xlu1 %302 }
 0x2cc   :  { %v308_v40 = vsel %vm258_vm3, %v303_v39, 0 }
 0x2cd   :  { %1508 = vmatpush3.bf16.msra.mxu0 %v308_v40 }
 0x2ce   :  { %v1642_v41 = vpop.eup %1641  ;;  %1519 = vmatprep.subr.bf16.mxu0 %v1685_v0 }
 0x2cf   :  { %v241_v42 = vsel %vm133_vm2, %v1642_v41, 0.0  ;;  %v355_v45 = vpop.permute.xlu1 %354 }
 0x2d0   :  { %242 = vadd.xlane.f32.xlu0 %v241_v42  ;;  %v360_v52 = vsel %vm133_vm2, %v355_v45, 0 }
 0x2d2   :  { %v1644_v43 = vpop.eup %1643 }
 0x2d3   :  { %v244_v44 = vsel %vm133_vm2, %v1644_v43, 0.0 }
 0x2d4   :  { %245 = vadd.xlane.f32.xlu1 %v244_v44 }
 0x2e5   :  { %404 = vrot.lane.b32.xlu1 %v1800_v12, %s1689_s2 }
 0x2e6   :  { %352 = vrot.lane.b32.xlu0 %v1806_v18, %s1690_s16 }
 0x2e9   :  { %402 = vrot.lane.b32.xlu1 %v1813_v20, %s1690_s16 }
 0x35d   :  { %v243_v46 = vpop.xlane.xlu0 %242 }
 0x35e   :  { %1645 = vrcp.f32 %v243_v46 }
 0x361   :  { %v246_v47 = vpop.xlane.xlu1 %245  ;;  %v353_v57 = vpop.permute.xlu0 %352 }
 0x362   :  { %1647 = vrcp.f32 %v246_v47 }
 0x365   :  { %v405_v54 = vpop.permute.xlu1 %404 }
 0x366   :  { %v410_v56 = vsel %vm133_vm2, %v405_v54, 0 }
 0x368   :  { %v1646_v48 = vpop.eup %1645 }
 0x369   :  { %v249_v49 = vmul.f32 %v1646_v48, %v1642_v41  ;;  %v403_v58 = vpop.permute.xlu1 %402 }
 0x36b   :  { %v251_v50 = vpack.c.bf16 %v249_v49, %v249_v49 }
 0x36c   :  { %v1648_v51 = vpop.eup %1647 }
 0x36d   :  { %v250_v53 = vmul.f32 %v1648_v51, %v1644_v43  ;;  %1504 = vmatmul.mubr.msk.bf16.vlgmr.msra.gmra.mrb[4].mxu1 %vm133_vm2, %v251_v50 }
 0x36e   :  { %1514 = vmatpush3.bf16.xpose.msra.mxu1 %v360_v52  ;;  %1515 = vmatprep.mubr.msk.bf16.mxu1 %vm1686_vm0, %v1685_v0 }
 0x36f   :  { %v252_v55 = vpack.c.bf16 %v250_v53, %v250_v53  ;;  %1525 = vmatprep.subr.bf16.mxu1 %v1685_v0 }
 0x371   :  { %1510 = vmatmul.mubr.msk.bf16.vlgmr.msra.gmra.mrb[8].mxu0 %vm133_vm2, %v252_v55 }
 0x372   :  { %1520 = vmatpush3.bf16.xpose.msra.mxu0 %v410_v56  ;;  %1521 = vmatprep.mubr.msk.bf16.mxu0 %vm1686_vm0, %v1685_v0 }
 0x373   :  { %1531 = vmatprep.subr.bf16.mxu0 %v1685_v0 }
 0x375   :  { %1516 = vmatmul.mubr.msk.bf16.vlgmr.msra.gmra.mrb[8].mxu1 %vm133_vm2, %v353_v57 }
 0x376   :  { %1527 = vmatprep.mubr.msk.bf16.mxu1 %vm1686_vm0, %v1685_v0 }
 0x379   :  { %1522 = vmatmul.mubr.msk.bf16.vlgmr.msra.gmra.mrb[12].mxu0 %vm133_vm2, %v403_v58 }
 0x37a   :  { %1533 = vmatprep.mubr.msk.bf16.mxu0 %vm1686_vm0, %v1685_v0 }
 0x440   :  { %v296_v59 = vpop.f32.mrb[4].mxu1 }
 0x441   :  { %350 = vst.msk [vmem:[#allocation2] sm:$0xff] %vm133_vm2, %v296_v59  ;;  %v1505_v60 = vpop.f32.mrb[5].mxu1 }
 0x442   :  { %v299_v61 = vpop.f32.mrb[6].mxu1 }
 0x443   :  { %v1506_v62 = vpop.f32.mrb[7].mxu1 }
 0x444   :  { %v344_v63 = vpop.f32.mrb[8].mxu0 }
 0x445   :  { %351 = vst.msk [vmem:[#allocation2 + $0x8] sm:$0xff] %vm133_vm2, %v344_v63  ;;  %v1511_v1 = vpop.f32.mrb[9].mxu0 }
 0x446   :  { %v347_v2 = vpop.f32.mrb[10].mxu0 }
 0x447   :  { %v1512_v4 = vpop.f32.mrb[11].mxu0 }
 0x448   :  { %v396_v5 = vpop.f32.mrb[8].mxu1 }
 0x449   :  { %v1517_v6 = vpop.f32.mrb[9].mxu1  ;;  %v452_v7 = vsel %vm133_vm2, %v396_v5, -inf }
 0x44a   :  { %453 = vmax.xlane.f32.xlu1 %v452_v7  ;;  %v399_v8 = vpop.f32.mrb[10].mxu1 }
 0x44b   :  { %v1518_v10 = vpop.f32.mrb[11].mxu1 }
 0x44c   :  { %v446_v11 = vpop.f32.mrb[12].mxu0 }
 0x44d   :  { %v1523_v13 = vpop.f32.mrb[13].mxu0  ;;  %v455_v14 = vsel %vm133_vm2, %v446_v11, -inf }
 0x44e   :  { %456 = vmax.xlane.f32.xlu0 %v455_v14  ;;  %v449_v15 = vpop.f32.mrb[14].mxu0 }
 0x44f   :  { %v1524_v16 = vpop.f32.mrb[15].mxu0 }
 0x45b   :  { %476 = vrot.lane.b32.xlu1 %v1797_v9, %s1691_s17 }
 0x45f   :  { %585 = vrot.lane.b32.xlu1 %v1797_v9, %s1692_s18 }
 0x464   :  { %524 = vrot.lane.b32.xlu0 %v1800_v12, %s1691_s17 }
 0x468   :  { %583 = vrot.lane.b32.xlu0 %v1806_v18, %s1693_s19 }
 0x4d7   :  { %v454_v17 = vpop.xlane.xlu1 %453 }
 0x4d8   :  { %v458_v19 = vsub.f32 %v396_v5, %v454_v17 }
 0x4da   :  { %v460_v21 = vmul.f32 1.442695, %v458_v19 }
 0x4db   :  { %v477_v22 = vpop.permute.xlu1 %476  ;;  %v457_v23 = vpop.xlane.xlu0 %456 }
 0x4dc   :  { %1649 = vpow2.f32 %v460_v21  ;;  %v482_v24 = vsel %vm258_vm3, %v477_v22, 0  ;;  %v459_v25 = vsub.f32 %v446_v11, %v457_v23 }
 0x4dd   :  { %1526 = vmatpush3.bf16.msra.mxu1 %v482_v24 }
 0x4de   :  { %v462_v26 = vmul.f32 1.442695, %v459_v25  ;;  %1537 = vmatprep.subr.bf16.mxu1 %v1685_v0 }
 0x4df   :  { %v525_v27 = vpop.permute.xlu0 %524  ;;  %v586_v33 = vpop.permute.xlu1 %585 }
 0x4e0   :  { %1651 = vpow2.f32 %v462_v26  ;;  %v530_v28 = vsel %vm258_vm3, %v525_v27, 0  ;;  %v591_v40 = vsel %vm133_vm2, %v586_v33, 0 }
 0x4e1   :  { %1532 = vmatpush3.bf16.msra.mxu0 %v530_v28 }
 0x4e2   :  { %1543 = vmatprep.subr.bf16.mxu0 %v1685_v0 }
 0x4e3   :  { %v584_v45 = vpop.permute.xlu0 %583 }
 0x4e6   :  { %v1650_v29 = vpop.eup %1649 }
 0x4e7   :  { %v464_v30 = vsel %vm133_vm2, %v1650_v29, 0.0 }
 0x4e8   :  { %465 = vadd.xlane.f32.xlu1 %v464_v30 }
 0x4ea   :  { %v1652_v31 = vpop.eup %1651 }
 0x4eb   :  { %v467_v32 = vsel %vm133_vm2, %v1652_v31, 0.0 }
 0x4ec   :  { %468 = vadd.xlane.f32.xlu1 %v467_v32 }
 0x4fd   :  { %635 = vrot.lane.b32.xlu1 %v1800_v12, %s1692_s18 }
 0x501   :  { %633 = vrot.lane.b32.xlu1 %v1813_v20, %s1693_s19 }
 0x575   :  { %v466_v34 = vpop.xlane.xlu1 %465 }
 0x576   :  { %1653 = vrcp.f32 %v466_v34 }
 0x579   :  { %v469_v35 = vpop.xlane.xlu1 %468 }
 0x57a   :  { %1655 = vrcp.f32 %v469_v35 }
 0x57d   :  { %v636_v42 = vpop.permute.xlu1 %635 }
 0x57e   :  { %v641_v44 = vsel %vm133_vm2, %v636_v42, 0 }
 0x580   :  { %v1654_v36 = vpop.eup %1653 }
 0x581   :  { %v472_v37 = vmul.f32 %v1654_v36, %v1650_v29  ;;  %v634_v46 = vpop.permute.xlu1 %633 }
 0x583   :  { %v474_v38 = vpack.c.bf16 %v472_v37, %v472_v37 }
 0x584   :  { %v1656_v39 = vpop.eup %1655 }
 0x585   :  { %v473_v41 = vmul.f32 %v1656_v39, %v1652_v31  ;;  %1528 = vmatmul.mubr.msk.bf16.vlgmr.msra.gmra.mrb[12].mxu1 %vm133_vm2, %v474_v38 }
 0x586   :  { %1538 = vmatpush3.bf16.xpose.msra.mxu1 %v591_v40  ;;  %1539 = vmatprep.mubr.msk.bf16.mxu1 %vm1686_vm0, %v1685_v0 }
 0x587   :  { %v475_v43 = vpack.c.bf16 %v473_v41, %v473_v41  ;;  %1549 = vmatprep.subr.bf16.mxu1 %v1685_v0 }
 0x589   :  { %1534 = vmatmul.mubr.msk.bf16.vlgmr.msra.gmra.mrb[16].mxu0 %vm133_vm2, %v475_v43 }
 0x58a   :  { %1544 = vmatpush3.bf16.xpose.msra.mxu0 %v641_v44  ;;  %1545 = vmatprep.mubr.msk.bf16.mxu0 %vm1686_vm0, %v1685_v0 }
 0x58b   :  { %1555 = vmatprep.subr.bf16.mxu0 %v1685_v0 }
 0x58d   :  { %1540 = vmatmul.mubr.msk.bf16.vlgmr.msra.gmra.mrb[16].mxu1 %vm133_vm2, %v584_v45 }
 0x58e   :  { %1551 = vmatprep.mubr.msk.bf16.mxu1 %vm1686_vm0, %v1685_v0 }
 0x591   :  { %1546 = vmatmul.mubr.msk.bf16.vlgmr.msra.gmra.mrb[20].mxu0 %vm133_vm2, %v634_v46 }
 0x592   :  { %1557 = vmatprep.mubr.msk.bf16.mxu0 %vm1686_vm0, %v1685_v0 }
 0x658   :  { %v1881_v47 = vpop.f32.mrb[12].mxu1 }
 0x659   :  { %v1529_v48 = vpop.f32.mrb[13].mxu1 }
 0x65a   :  { %v521_v49 = vpop.f32.mrb[14].mxu1 }
 0x65b   :  { %v1530_v50 = vpop.f32.mrb[15].mxu1 }
 0x65c   :  { %v1883_v51 = vpop.f32.mrb[16].mxu0 }
 0x65d   :  { %v1535_v52 = vpop.f32.mrb[17].mxu0 }
 0x65e   :  { %v569_v53 = vpop.f32.mrb[18].mxu0 }
 0x65f   :  { %v1536_v54 = vpop.f32.mrb[19].mxu0 }
 0x660   :  { %v627_v55 = vpop.f32.mrb[16].mxu1 }
 0x661   :  { %v1541_v56 = vpop.f32.mrb[17].mxu1  ;;  %v683_v57 = vsel %vm133_vm2, %v627_v55, -inf }
 0x662   :  { %684 = vmax.xlane.f32.xlu0 %v683_v57  ;;  %v630_v58 = vpop.f32.mrb[18].mxu1 }
 0x663   :  { %v1542_v59 = vpop.f32.mrb[19].mxu1 }
 0x664   :  { %v677_v60 = vpop.f32.mrb[20].mxu0 }
 0x665   :  { %v1547_v61 = vpop.f32.mrb[21].mxu0  ;;  %v686_v62 = vsel %vm133_vm2, %v677_v60, -inf }
 0x666   :  { %687 = vmax.xlane.f32.xlu1 %v686_v62  ;;  %v680_v63 = vpop.f32.mrb[22].mxu0 }
 0x667   :  { %v1548_v1 = vpop.f32.mrb[23].mxu0 }
 0x677   :  { %707 = vrot.lane.b32.xlu1 %v1797_v9, %s1694_s20 }
 0x67b   :  { %816 = vrot.lane.b32.xlu1 %v1797_v9, %s1695_s21 }
 0x67f   :  { %866 = vrot.lane.b32.xlu1 %v1800_v12, %s1695_s21 }
 0x683   :  { %864 = vrot.lane.b32.xlu1 %v1813_v20, %s1696_s22 }
 0x6ef   :  { %v685_v2 = vpop.xlane.xlu0 %684 }
 0x6f0   :  { %v689_v4 = vsub.f32 %v627_v55, %v685_v2 }
 0x6f2   :  { %v691_v5 = vmul.f32 1.442695, %v689_v4 }
 0x6f3   :  { %v688_v6 = vpop.xlane.xlu1 %687 }
 0x6f4   :  { %1657 = vpow2.f32 %v691_v5  ;;  %v690_v7 = vsub.f32 %v677_v60, %v688_v6 }
 0x6f6   :  { %v693_v8 = vmul.f32 1.442695, %v690_v7 }
 0x6f7   :  { %v708_v10 = vpop.permute.xlu1 %707 }
 0x6f8   :  { %1659 = vpow2.f32 %v693_v8  ;;  %v713_v11 = vsel %vm258_vm3, %v708_v10, 0 }
 0x6f9   :  { %1550 = vmatpush3.bf16.msra.mxu1 %v713_v11 }
 0x6fa   :  { %1561 = vmatprep.subr.bf16.mxu1 %v1685_v0 }
 0x6fb   :  { %v817_v23 = vpop.permute.xlu1 %816 }
 0x6fc   :  { %v822_v27 = vsel %vm133_vm2, %v817_v23, 0 }
 0x6fe   :  { %v1658_v13 = vpop.eup %1657 }
 0x6ff   :  { %v695_v14 = vsel %vm133_vm2, %v1658_v13, 0.0 }
 0x700   :  { %696 = vadd.xlane.f32.xlu0 %v695_v14 }
 0x702   :  { %v1660_v15 = vpop.eup %1659 }
 0x703   :  { %v698_v20 = vsel %vm133_vm2, %v1660_v15, 0.0 }
 0x704   :  { %699 = vadd.xlane.f32.xlu0 %v698_v20  ;;  %v1633_v20 = vld [vmem:[%s2011_s3 + $0x8] sm:$0xff]  }
 0x71a   :  { %755 = vrot.lane.b32.xlu0 %v1800_v12, %s1694_s20 }
 0x71e   :  { %814 = vrot.lane.b32.xlu0 %v1806_v18, %s1696_s22  ;;  %v867_v18 = vpop.permute.xlu1 %866 }
 0x71f   :  { %v872_v30 = vsel %vm133_vm2, %v867_v18, 0 }
 0x722   :  { %v865_v32 = vpop.permute.xlu1 %864 }
 0x78d   :  { %v697_v16 = vpop.xlane.xlu0 %696 }
 0x78e   :  { %1661 = vrcp.f32 %v697_v16 }
 0x791   :  { %v700_v17 = vpop.xlane.xlu0 %699 }
 0x792   :  { %1663 = vrcp.f32 %v700_v17 }
 0x795   :  { %v756_v19 = vpop.permute.xlu0 %755 }
 0x796   :  { %v761_v21 = vsel %vm258_vm3, %v756_v19, 0 }
 0x797   :  { %1556 = vmatpush3.bf16.msra.mxu0 %v761_v21 }
 0x798   :  { %v1662_v22 = vpop.eup %1661  ;;  %1567 = vmatprep.subr.bf16.mxu0 %v1685_v0 }
 0x799   :  { %v703_v24 = vmul.f32 %v1662_v22, %v1658_v13  ;;  %v815_v31 = vpop.permute.xlu0 %814 }
 0x79b   :  { %v705_v25 = vpack.c.bf16 %v703_v24, %v703_v24 }
 0x79c   :  { %v1664_v26 = vpop.eup %1663 }
 0x79d   :  { %v704_v28 = vmul.f32 %v1664_v26, %v1660_v15  ;;  %1552 = vmatmul.mubr.msk.bf16.vlgmr.msra.gmra.mrb[20].mxu1 %vm133_vm2, %v705_v25  ;;  %v1632_v15 = vld [vmem:[%s2011_s3] sm:$0xff]  }
 0x79e   :  { %1562 = vmatpush3.bf16.xpose.msra.mxu1 %v822_v27  ;;  %1563 = vmatprep.mubr.msk.bf16.mxu1 %vm1686_vm0, %v1685_v0 }
 0x79f   :  { %v706_v29 = vpack.c.bf16 %v704_v28, %v704_v28  ;;  %1573 = vmatprep.subr.bf16.mxu1 %v1685_v0 }
 0x7a1   :  { %1558 = vmatmul.mubr.msk.bf16.vlgmr.msra.gmra.mrb[24].mxu0 %vm133_vm2, %v706_v29 }
 0x7a2   :  { %1568 = vmatpush3.bf16.xpose.msra.mxu0 %v872_v30  ;;  %1569 = vmatprep.mubr.msk.bf16.mxu0 %vm1686_vm0, %v1685_v0  ;;  %v1413_v30 = vld [vmem:[%s2012_s4] ss:$0 sm:$0xff] }
 0x7a3   :  { %1579 = vmatprep.subr.bf16.mxu0 %v1685_v0 }
 0x7a5   :  { %1564 = vmatmul.mubr.msk.bf16.vlgmr.msra.gmra.mrb[24].mxu1 %vm133_vm2, %v815_v31  ;;  %v47_v31 = vunpack.c.l.bf16 %v1786_v3 }
 0x7a6   :  { %1575 = vmatprep.mubr.msk.bf16.mxu1 %vm1686_vm0, %v1685_v0 }
 0x7a9   :  { %1570 = vmatmul.mubr.msk.bf16.vlgmr.msra.gmra.mrb[28].mxu0 %vm133_vm2, %v865_v32 }
 0x7aa   :  { %1581 = vmatprep.mubr.msk.bf16.mxu0 %vm1686_vm0, %v1685_v0 }
 0x870   :  { %v749_v33 = vpop.f32.mrb[20].mxu1 }
 0x871   :  { %v1553_v34 = vpop.f32.mrb[21].mxu1 }
 0x872   :  { %v752_v35 = vpop.f32.mrb[22].mxu1 }
 0x873   :  { %v1554_v36 = vpop.f32.mrb[23].mxu1  ;;  %v48_v35 = vunpack.c.h.bf16 %v1786_v3 }
 0x874   :  { %v797_v37 = vpop.f32.mrb[24].mxu0 }
 0x875   :  { %v1559_v38 = vpop.f32.mrb[25].mxu0 }
 0x876   :  { %v800_v39 = vpop.f32.mrb[26].mxu0 }
 0x877   :  { %v1560_v40 = vpop.f32.mrb[27].mxu0 }
 0x878   :  { %v858_v41 = vpop.f32.mrb[24].mxu1 }
 0x879   :  { %v1565_v42 = vpop.f32.mrb[25].mxu1  ;;  %v914_v43 = vsel %vm133_vm2, %v858_v41, -inf }
 0x87a   :  { %915 = vmax.xlane.f32.xlu0 %v914_v43  ;;  %v861_v44 = vpop.f32.mrb[26].mxu1 }
 0x87b   :  { %v1566_v45 = vpop.f32.mrb[27].mxu1 }
 0x87c   :  { %v908_v46 = vpop.f32.mrb[28].mxu0 }
 0x87d   :  { %v1571_v48 = vpop.f32.mrb[29].mxu0  ;;  %v917_v49 = vsel %vm133_vm2, %v908_v46, -inf }
 0x87e   :  { %918 = vmax.xlane.f32.xlu1 %v917_v49  ;;  %v911_v50 = vpop.f32.mrb[30].mxu0 }
 0x87f   :  { %v1572_v52 = vpop.f32.mrb[31].mxu0 }
 0x88f   :  { %938 = vrot.lane.b32.xlu1 %v1797_v9, %s1697_s23 }
 0x893   :  { %574 = vrot.lane.b32.xlu1 %v1881_v47, %s1698_s24 }
 0x897   :  { %576 = vrot.lane.b32.xlu1 %v1883_v51, %s1698_s24 }
 0x89b   :  { %807 = vrot.lane.b32.xlu1 %v797_v37, %s1699_s25 }
 0x907   :  { %v916_v53 = vpop.xlane.xlu0 %915 }
 0x908   :  { %v920_v54 = vsub.f32 %v858_v41, %v916_v53 }
 0x90a   :  { %v922_v55 = vmul.f32 1.442695, %v920_v54  ;;  %v1634_v54 = vld [vmem:[%s2013_s9] sm:$0xff]  }
 0x90b   :  { %v919_v56 = vpop.xlane.xlu1 %918 }
 0x90c   :  { %1665 = vpow2.f32 %v922_v55  ;;  %v921_v57 = vsub.f32 %v908_v46, %v919_v56  ;;  %v1635_v55 = vld [vmem:[%s2013_s9 + $0x8] sm:$0xff]  }
 0x90e   :  { %v924_v58 = vmul.f32 1.442695, %v921_v57 }
 0x90f   :  { %v939_v59 = vpop.permute.xlu1 %938 }
 0x910   :  { %1667 = vpow2.f32 %v924_v58  ;;  %v944_v60 = vsel %vm258_vm3, %v939_v59, 0 }
 0x911   :  { %1574 = vmatpush3.bf16.msra.mxu1 %v944_v60 }
 0x912   :  { %1585 = vmatprep.subr.bf16.mxu1 %v1685_v0 }
 0x913   :  { %v575_v9 = vpop.permute.xlu1 %574 }
 0x914   :  { %581 = vst.msk [vmem:[#allocation2] sm:$0xff] %vm580_vm4, %v575_v9 }
 0x916   :  { %v1666_v47 = vpop.eup %1665 }
 0x917   :  { %v577_v51 = vpop.permute.xlu1 %576  ;;  %v926_v61 = vsel %vm133_vm2, %v1666_v47, 0.0 }
 0x918   :  { %582 = vst.msk [vmem:[#allocation2 + $0x8] sm:$0xff] %vm580_vm4, %v577_v51  ;;  %927 = vadd.xlane.f32.xlu0 %v926_v61  ;;  %v1417_v61 = vld [vmem:[%s2014_s5] ss:$0 sm:$0xff] }
 0x91a   :  { %v1668_v62 = vpop.eup %1667 }
 0x91b   :  { %v808_v63 = vpop.permute.xlu1 %807  ;;  %v929_v1 = vsel %vm133_vm2, %v1668_v62, 0.0 }
 0x91c   :  { %813 = vst.msk [vmem:[#allocation2 + $0x8] sm:$0xff] %vm811_vm5, %v808_v63  ;;  %930 = vadd.xlane.f32.xlu0 %v929_v1 }
 0x932   :  { %986 = vrot.lane.b32.xlu0 %v1800_v12, %s1697_s23 }
 0x936   :  { %805 = vrot.lane.b32.xlu0 %v749_v33, %s1699_s25 }
 0x9a5   :  { %v928_v2 = vpop.xlane.xlu0 %927 }
 0x9a6   :  { %1669 = vrcp.f32 %v928_v2  ;;  %v1418_v2 = vld [vmem:[%s2015_s6] ss:$0 sm:$0xff] }
 0x9a9   :  { %v931_v4 = vpop.xlane.xlu0 %930 }
 0x9aa   :  { %1671 = vrcp.f32 %v931_v4 }
 0x9ad   :  { %v987_v5 = vpop.permute.xlu0 %986 }
 0x9ae   :  { %v992_v6 = vsel %vm258_vm3, %v987_v5, 0 }
 0x9af   :  { %1580 = vmatpush3.bf16.msra.mxu0 %v992_v6 }
 0x9b0   :  { %v1670_v7 = vpop.eup %1669  ;;  %1593 = vmatprep.subr.bf16.mxu0 %v1685_v0 }
 0x9b1   :  { %v934_v8 = vmul.f32 %v1670_v7, %v1666_v47  ;;  %v806_v10 = vpop.permute.xlu0 %805 }
 0x9b2   :  { %812 = vst.msk [vmem:[#allocation2] sm:$0xff] %vm811_vm5, %v806_v10  ;;  %v1637_v10 = vld [vmem:[%s2016_s11 + $0x8] sm:$0xff]  }
 0x9b3   :  { %v936_v11 = vpack.c.bf16 %v934_v8, %v934_v8  ;;  %v1636_v8 = vld [vmem:[%s2016_s11] sm:$0xff]  }
 0x9b4   :  { %v1672_v13 = vpop.eup %1671 }
 0x9b5   :  { %v935_v14 = vmul.f32 %v1672_v13, %v1668_v62  ;;  %1576 = vmatmul.mubr.msk.bf16.vlgmr.msra.gmra.mrb[28].mxu1 %vm133_vm2, %v936_v11  ;;  %v1638_v11 = vld [vmem:[%s2016_s11 + $0x10] sm:$0xff]   ;;  %v1639_v13 = vld [vmem:[%s2016_s11 + $0x18] sm:$0xff]  }
 0x9b6   :  { %1589 = vmatprep.mubr.msk.bf16.mxu1 %vm1686_vm0, %v1685_v0  ;;  %1586 = vmatpush3.bf16.msra.mxu1 %v1632_v15 }
 0x9b7   :  { %v937_v12 = vpack.c.bf16 %v935_v14, %v935_v14  ;;  %1587 = vmatprep.subr.bf16.mxu1 %v1685_v0  ;;  %v1419_v14 = vld [vmem:[%s2017_s10] ss:$0 sm:$0xff] }
 0x9b9   :  { %1582 = vmatmul.mubr.msk.bf16.vlgmr.msra.gmra.mrb[32].mxu0 %vm133_vm2, %v937_v12 }
 0x9ba   :  { %1597 = vmatprep.mubr.msk.bf16.mxu0 %vm1686_vm0, %v1685_v0  ;;  %1588 = vmatpush3.bf16.msra.mxu1 %v1633_v20 }
 0x9bb   :  { %1601 = vmatprep.subr.bf16.mxu1 %v1685_v0  ;;  %1594 = vmatpush3.bf16.msra.mxu0 %v1634_v54 }
 0x9bc   :  { %1595 = vmatprep.subr.bf16.mxu0 %v1685_v0 }
 0x9bf   :  { %1596 = vmatpush3.bf16.msra.mxu0 %v1635_v55 }
 0xa88   :  { %v980_v16 = vpop.f32.mrb[28].mxu1 }
 0xa89   :  { %1036 = vrot.lane.b32.xlu0 %v980_v16, %s1700_s30  ;;  %v1577_v17 = vpop.f32.mrb[29].mxu1 }
 0xa8a   :  { %v983_v19 = vpop.f32.mrb[30].mxu1 }
 0xa8b   :  { %v1578_v21 = vpop.f32.mrb[31].mxu1 }
 0xa8c   :  { %v1028_v22 = vpop.f32.mrb[32].mxu0 }
 0xa8d   :  { %1038 = vrot.lane.b32.xlu1 %v1028_v22, %s1700_s30  ;;  %v1583_v23 = vpop.f32.mrb[33].mxu0 }
 0xa8e   :  { %v1031_v24 = vpop.f32.mrb[34].mxu0 }
 0xa8f   :  { %v1584_v25 = vpop.f32.mrb[35].mxu0 }
 0xafb   :  { %v1037_v26 = vpop.permute.xlu0 %1036 }
 0xafc   :  { %1043 = vst.msk [vmem:[#allocation2] sm:$0xff] %vm1042_vm6, %v1037_v26 }
 0xaff   :  { %v1039_v27 = vpop.permute.xlu1 %1038 }
 0xb00   :  { %1044 = vst.msk [vmem:[#allocation2 + $0x8] sm:$0xff] %vm1042_vm6, %v1039_v27 }
 0xb03   :  { %v1045_v28 = vld [vmem:[#allocation2] sm:$0xff] }
 0xb07   :  { %v1046_v18 = vld [vmem:[#allocation2 + $0x8] sm:$0xff] }
 0xb08   :  { %v1047_v29 = vpack.c.bf16 %v1046_v18, %v1045_v28 }
 0xb0a   :  { %1590 = vmatmul.mubr.msk.bf16.vlgmr.msra.gmra.mrb[32].mxu1 %vm73_vm1, %v1047_v29 }
 0xb0b   :  { %1609 = vmatprep.mubr.msk.bf16.mxu1 %vm1686_vm0, %v1685_v0  ;;  %1602 = vmatpush3.bf16.msra.mxu1 %v1636_v8 }
 0xb0c   :  { %1603 = vmatprep.subr.bf16.mxu1 %v1685_v0 }
 0xb0f   :  { %1604 = vmatpush3.bf16.msra.mxu1 %v1637_v10 }
 0xb10   :  { %1605 = vmatprep.subr.bf16.mxu1 %v1685_v0 }
 0xb13   :  { %1606 = vmatpush3.bf16.msra.mxu1 %v1638_v11 }
 0xb14   :  { %1607 = vmatprep.subr.bf16.mxu1 %v1685_v0 }
 0xb17   :  { %1608 = vmatpush3.bf16.msra.mxu1 %v1639_v13 }
 0xbdd   :  { %v1108_v32 = vpop.f32.mrb[32].mxu1 }
 0xbde   :  { %v1109_v33 = vadd.f32 %v1413_v30, %v1108_v32  ;;  %v1591_v34 = vpop.f32.mrb[33].mxu1 }
 0xbdf   :  { %v1111_v36 = vpop.f32.mrb[34].mxu1 }
 0xbe0   :  { %v1112_v37 = vadd.f32 %v1413_v30, %v1111_v36  ;;  %v1592_v38 = vpop.f32.mrb[35].mxu1  ;;  %v1115_v39 = vadd.f32 %v1109_v33, %v47_v31 }
 0xbe1   :  { %v1423_v38 = vld [vmem:[%s2018_s12] ss:$0 sm:$0xff] }
 0xbe2   :  { %v1119_v40 = vsel %vm73_vm1, %v1115_v39, 0.0  ;;  %v1116_v41 = vadd.f32 %v1112_v37, %v48_v35 }
 0xbe3   :  { %1120 = vadd.xlane.f32.xlu0 %v1119_v40 }
 0xbe4   :  { %v1122_v42 = vsel %vm73_vm1, %v1116_v41, 0.0 }
 0xbe5   :  { %1123 = vadd.xlane.f32.xlu1 %v1122_v42 }
 0xc70   :  { %v1121_v43 = vpop.xlane.xlu0 %1120 }
 0xc71   :  { %v1126_v44 = vmul.f32 0.03125, %v1121_v43 }
 0xc72   :  { %v1124_v45 = vpop.xlane.xlu1 %1123 }
 0xc73   :  { %v1128_v46 = vsub.f32 %v1115_v39, %v1126_v44  ;;  %v1127_v48 = vmul.f32 0.03125, %v1124_v45 }
 0xc75   :  { %v1129_v49 = vsub.f32 %v1116_v41, %v1127_v48  ;;  %v1130_v50 = vmul.f32 %v1128_v46, %v1128_v46 }
 0xc77   :  { %v1132_v3 = vsel %vm73_vm1, %v1130_v50, 0.0  ;;  %v1131_v52 = vmul.f32 %v1129_v49, %v1129_v49 }
 0xc78   :  { %1133 = vadd.xlane.f32.xlu0 %v1132_v3 }
 0xc79   :  { %v1135_v53 = vsel %vm73_vm1, %v1131_v52, 0.0 }
 0xc7c   :  { %1136 = vadd.xlane.f32.xlu0 %v1135_v53 }
 0xd05   :  { %v1134_v56 = vpop.xlane.xlu0 %1133 }
 0xd06   :  { %v1138_v57 = vmul.f32 0.03125, %v1134_v56 }
 0xd08   :  { %v1140_v58 = vadd.f32 1e-05, %v1138_v57 }
 0xd09   :  { %v1137_v59 = vpop.xlane.xlu0 %1136 }
 0xd0a   :  { %1673 = vrsqrt.f32 %v1140_v58  ;;  %v1139_v60 = vmul.f32 0.03125, %v1137_v59 }
 0xd0c   :  { %v1141_v9 = vadd.f32 1e-05, %v1139_v60 }
 0xd0e   :  { %1675 = vrsqrt.f32 %v1141_v9 }
 0xd14   :  { %v1674_v47 = vpop.eup %1673 }
 0xd15   :  { %v1144_v51 = vmul.f32 %v1674_v47, %v1128_v46 }
 0xd17   :  { %v1152_v63 = vmul.f32 %v1417_v61, %v1144_v51 }
 0xd18   :  { %v1676_v62 = vpop.eup %1675 }
 0xd19   :  { %v1145_v1 = vmul.f32 %v1676_v62, %v1129_v49  ;;  %v1160_v5 = vadd.f32 %v1418_v2, %v1152_v63 }
 0xd1b   :  { %v1153_v4 = vmul.f32 %v1417_v61, %v1145_v1  ;;  %v1429_v1 = vld [vmem:[%s2019_s7] ss:$0 sm:$0xff] }
 0xd1d   :  { %v1161_v6 = vadd.f32 %v1418_v2, %v1153_v4 }
 0xd1f   :  { %v1162_v7 = vpack.c.bf16 %v1161_v6, %v1160_v5 }
 0xd21   :  { %1598 = vmatmul.mubr.msk.bf16.vlgmr.msra.gmra.mrb[36].mxu0 %vm73_vm1, %v1162_v7 }
 0xdf4   :  { %v1223_v12 = vpop.f32.mrb[36].mxu0 }
 0xdf5   :  { %v1224_v15 = vadd.f32 %v1419_v14, %v1223_v12  ;;  %v1599_v20 = vpop.f32.mrb[37].mxu0 }
 0xdf6   :  { %v1226_v16 = vpop.f32.mrb[38].mxu0 }
 0xdf7   :  { %v1232_v17 = vmul.f32 0.044715, %v1224_v15  ;;  %v1227_v19 = vadd.f32 %v1419_v14, %v1226_v16  ;;  %v1600_v21 = vpop.f32.mrb[39].mxu0  ;;  %v1230_v32 = vmul.f32 0.5, %v1224_v15 }
 0xdf9   :  { %v1234_v22 = vmul.f32 %v1232_v17, %v1224_v15  ;;  %v1233_v23 = vmul.f32 0.044715, %v1227_v19  ;;  %v1231_v33 = vmul.f32 0.5, %v1227_v19 }
 0xdfb   :  { %v1236_v24 = vmul.f32 %v1234_v22, %v1224_v15  ;;  %v1235_v25 = vmul.f32 %v1233_v23, %v1227_v19 }
 0xdfd   :  { %v1238_v26 = vadd.f32 %v1236_v24, %v1224_v15  ;;  %v1237_v27 = vmul.f32 %v1235_v25, %v1227_v19 }
 0xdff   :  { %v1240_v28 = vmul.f32 0.7978846, %v1238_v26  ;;  %v1239_v0 = vadd.f32 %v1237_v27, %v1227_v19 }
 0xe01   :  { %1677 = vtanh.f32 %v1240_v28  ;;  %v1241_v18 = vmul.f32 0.7978846, %v1239_v0 }
 0xe03   :  { %1679 = vtanh.f32 %v1241_v18 }
 0xe0b   :  { %v1678_v29 = vpop.eup %1677 }
 0xe0c   :  { %v1244_v30 = vadd.f32 1.0, %v1678_v29 }
 0xe0d   :  { %v1680_v31 = vpop.eup %1679 }
 0xe0e   :  { %v1245_v34 = vadd.f32 1.0, %v1680_v31  ;;  %v1246_v35 = vmul.f32 %v1244_v30, %v1230_v32 }
 0xe10   :  { %v1247_v36 = vmul.f32 %v1245_v34, %v1231_v33 }
 0xe12   :  { %v1248_v37 = vpack.c.bf16 %v1247_v36, %v1246_v35 }
 0xe14   :  { %1610 = vmatmul.mubr.msk.bf16.vlgmr.msra.gmra.mrb[36].mxu1 %vm1288_vm7, %v1248_v37 }
 0xee7   :  { %v1326_v39 = vpop.f32.mrb[36].mxu1 }
 0xee8   :  { %v1327_v40 = vadd.f32 %v1423_v38, %v1326_v39  ;;  %v1611_v41 = vpop.f32.mrb[37].mxu1 }
 0xee9   :  { %v1329_v42 = vpop.f32.mrb[38].mxu1 }
 0xeea   :  { %v1330_v43 = vadd.f32 %v1423_v38, %v1329_v42  ;;  %v1612_v44 = vpop.f32.mrb[39].mxu1  ;;  %v1333_v45 = vadd.f32 %v1327_v40, %v1160_v5  ;;  %v1430_v5 = vld [vmem:[%s2020_s8] ss:$0 sm:$0xff] }
 0xeec   :  { %v1337_v46 = vsel %vm73_vm1, %v1333_v45, 0.0  ;;  %v1334_v48 = vadd.f32 %v1330_v43, %v1161_v6 }
 0xeed   :  { %1338 = vadd.xlane.f32.xlu1 %v1337_v46 }
 0xeee   :  { %v1340_v49 = vsel %vm73_vm1, %v1334_v48, 0.0 }
 0xeef   :  { %1341 = vadd.xlane.f32.xlu0 %v1340_v49 }
 0xf7a   :  { %v1339_v50 = vpop.xlane.xlu1 %1338 }
 0xf7b   :  { %v1343_v3 = vmul.f32 0.03125, %v1339_v50 }
 0xf7c   :  { %v1342_v52 = vpop.xlane.xlu0 %1341 }
 0xf7d   :  { %v1345_v53 = vsub.f32 %v1333_v45, %v1343_v3  ;;  %v1344_v54 = vmul.f32 0.03125, %v1342_v52 }
 0xf7f   :  { %v1346_v55 = vsub.f32 %v1334_v48, %v1344_v54  ;;  %v1347_v56 = vmul.f32 %v1345_v53, %v1345_v53 }
 0xf81   :  { %v1349_v57 = vsel %vm73_vm1, %v1347_v56, 0.0  ;;  %v1348_v58 = vmul.f32 %v1346_v55, %v1346_v55 }
 0xf82   :  { %1350 = vadd.xlane.f32.xlu1 %v1349_v57 }
 0xf83   :  { %v1352_v59 = vsel %vm73_vm1, %v1348_v58, 0.0 }
 0xf84   :  { %1353 = vadd.xlane.f32.xlu0 %v1352_v59 }
0x100f   :  { %v1351_v60 = vpop.xlane.xlu1 %1350 }
0x1010   :  { %v1355_v9 = vmul.f32 0.03125, %v1351_v60 }
0x1011   :  { %v1354_v47 = vpop.xlane.xlu0 %1353 }
0x1012   :  { %v1357_v51 = vadd.f32 1e-05, %v1355_v9  ;;  %v1356_v61 = vmul.f32 0.03125, %v1354_v47 }
0x1014   :  { %1681 = vrsqrt.f32 %v1357_v51  ;;  %v1358_v62 = vadd.f32 1e-05, %v1356_v61 }
0x1016   :  { %1683 = vrsqrt.f32 %v1358_v62 }
0x101e   :  { %v1682_v63 = vpop.eup %1681 }
0x101f   :  { %v1361_v2 = vmul.f32 %v1682_v63, %v1345_v53 }
0x1020   :  { %v1684_v4 = vpop.eup %1683 }
0x1021   :  { %v1369_v6 = vmul.f32 %v1429_v1, %v1361_v2  ;;  %v1362_v7 = vmul.f32 %v1684_v4, %v1346_v55 }
0x1023   :  { %v1377_v8 = vadd.f32 %v1430_v5, %v1369_v6  ;;  %v1370_v10 = vmul.f32 %v1429_v1, %v1362_v7 }
0x1025   :  { %v1379_v11 = vpack.c.bf16 %v1377_v8, %v1377_v8  ;;  %v1378_v13 = vadd.f32 %v1430_v5, %v1370_v10 }
0x1027   :  { %1382 = vst.msk [vmem:[%s2021_s13] sm:$0xf] %vm1381_vm8, %v1379_v11  ;;  %v1380_v14 = vpack.c.bf16 %v1378_v13, %v1378_v13 }
0x1029   :  { %1383 = vst.msk [vmem:[%s2021_s13 + $0x4] sm:$0xf] %vm1381_vm8, %v1380_v14 }

// kernel: _lambda_.9
= control target key start
LH: loop header
LB: loop body
LE: loop exit
PB: predicated region body
PF: predicated region fallthrough
CT: control target
= control target key end

     0   :  { %v55_v0 = vlaneseq  ;;  %v3359_v3 = vmov 1966171168   ;;  %vm207_vm0 = vcmask 261120   ;;  %vm211_vm1 = vcmask 254976   ;;  %s3364_s19 = smov 88   ;;  %s3366_s20 = smov 120   ;;  %s4104_s0 = inlined_call_operand.vmem [shape: bf16[2,5,32], index: 0, kind: input, shape index: {}]   ;;  %s4105_s1 = inlined_call_operand.vmem [shape: bf16[32,96], index: 1, kind: input, shape index: {}]   ;;  %s4106_s5 = inlined_call_operand.vmem [shape: f32[1,32], index: 5, kind: input, shape index: {}]   ;;  %s4107_s6 = inlined_call_operand.vmem [shape: f32[1,32], index: 6, kind: input, shape index: {}]   ;;  %s4108_s2 = inlined_call_operand.vmem [shape: f32[1,96], index: 2, kind: input, shape index: {}]   ;;  %s4109_s3 = inlined_call_operand.vmem [shape: bf16[32,32], index: 3, kind: input, shape index: {}]   ;;  %s4110_s4 = inlined_call_operand.vmem [shape: f32[1,32], index: 4, kind: input, shape index: {}]   ;;  %s4111_s9 = inlined_call_operand.vmem [shape: bf16[32,64], index: 9, kind: input, shape index: {}]   ;;  %s4112_s7 = inlined_call_operand.vmem [shape: f32[1,32], index: 7, kind: input, shape index: {}]   ;;  %s4113_s8 = inlined_call_operand.vmem [shape: f32[1,32], index: 8, kind: input, shape index: {}]   ;;  %s4114_s11 = inlined_call_operand.vmem [shape: bf16[64,32], index: 11, kind: input, shape index: {}]   ;;  %s4115_s10 = inlined_call_operand.vmem [shape: f32[1,64], index: 10, kind: input, shape index: {}]   ;;  %s4116_s12 = inlined_call_operand.vmem [shape: f32[1,32], index: 12, kind: input, shape index: {}]   ;;  %s4117_s13 = inlined_call_operand.vmem [shape: bf16[2,5,32], index: 13, kind: output, shape index: {}]  }
   0x1   :  { %v45_v1 = vld [vmem:[%s4104_s0] sm:$0x7]  ;;  %v46_v2 = vld [vmem:[%s4104_s0 + $0x4] sm:$0x7]  ;;  %v53_v4 = vunpack.c.l.s4 %v3359_v3  ;;  %vm3361_vm2 = vmmov 0   ;;  %vm886_vm3 = vcmask 64512  }
   0x2   :  { %v47_v5 = vunpack.c.l.bf16 %v45_v1  ;;  %v48_v6 = vunpack.c.l.bf16 %v46_v2  ;;  %v56_v7 = vshrl.u32 %v55_v0, 7  ;;  %vm1033_vm4 = vcmask 36864   ;;  %s3367_s21 = smov 56   ;;  %s3368_s22 = smov 80  }
   0x3   :  { %v54_v8 = vunpack.c.0.s8 %v53_v4  ;;  %vm1064_vm5 = vcmask 1041408   ;;  %vm1065_vm6 = vcmask 1042432   ;;  %vm1060_vm7 = vcmask 39936   ;;  %s3369_s23 = smov 112   ;;  %s3370_s24 = smov 48  }
   0x4   :  { %v51_v9 = vcombine.high %v47_v5, %v47_v5  ;;  %v90_v10 = vcombine.high %v48_v6, %v48_v6  ;;  %v3505_v44 = vsub.s32 0, %v56_v7  ;;  %v3507_v45 = vsub.s32 1, %v56_v7  ;;  %s3371_s25 = smov 72   ;;  %s3372_s26 = smov 104  }
   0x5   :  { %v3453_v11 = vsub.s32 %v54_v8, %v56_v7  ;;  %v3509_v46 = vsub.s32 2, %v56_v7  ;;  %v3511_v47 = vsub.s32 3, %v56_v7  ;;  %v3513_v49 = vsub.s32 4, %v56_v7  ;;  %s3373_s27 = smov 40   ;;  %s3374_s28 = smov 8  }
   0x6   :  { %v3515_v50 = vsub.s32 5, %v56_v7  ;;  %v3517_v51 = vsub.s32 6, %v56_v7  ;;  %v3519_v52 = vsub.s32 7, %v56_v7  ;;  %vm1159_vm8 = vcmask 61440   ;;  %s3375_s0 = smov 16   ;;  %s3376_s16 = smov 24  }
   0x7   :  { %v58_v12 = vrot.slane %v47_v5, %v3453_v11  ;;  %v65_v13 = vrot.slane %v51_v9, %v3453_v11  ;;  %v97_v14 = vrot.slane %v48_v6, %v3453_v11  ;;  %v104_v15 = vrot.slane %v90_v10, %v3453_v11 }
   0x8   :  { %4122 = vst [vmem:[#allocation3_spill] sm:$0xff] %v3519_v52  ;;  %vm1390_vm9 = vcmask 127040   ;;  %vm1621_vm10 = vcmask 192640   ;;  %vm1852_vm11 = vcmask 258240   ;;  %vm2818_vm12 = vcmask 523264  }
   0x9   :  { %v66_v16 = vcombine.high %v58_v12, %v58_v12  ;;  %v3460_v17 = vrot.slane %v58_v12, %v3453_v11  ;;  %v3463_v18 = vrot.slane %v65_v13, %v3453_v11  ;;  %v105_v19 = vcombine.high %v97_v14, %v97_v14 }
   0xa   :  { %v3466_v20 = vrot.slane %v97_v14, %v3453_v11  ;;  %v3475_v23 = vrot.slane %v104_v15, %v3453_v11  ;;  %vm3048_vm13 = vcmask 256000   ;;  %vm3049_vm14 = vsmask.f32 2304 }
   0xb   :  { %v3469_v21 = vrot.slane %v66_v16, %v3453_v11  ;;  %v3472_v22 = vrot.slane %v105_v19, %v3453_v11  ;;  %v3523_v54 = vcombine.high %v3460_v17, %v3460_v17  ;;  %vm3050_vm15 = vmand %vm3048_vm13, %vm3049_vm14 }
   0xc   :  { %v3479_v24 = vcombine.high %v3466_v20, %v3466_v20  ;;  %v143_v25 = vcombine.low %v3463_v18, %v3466_v20 }
   0xd   :  { %v141_v26 = vcombine.low %v3460_v17, %v3469_v21  ;;  %v3061_v27 = vcombine.high %v3460_v17, %v3469_v21  ;;  %v3489_v28 = vcombine.high %v3472_v22, %v3472_v22  ;;  %v3527_v55 = vcombine.high %v3469_v21, %v3469_v21 }
   0xe   :  { %v144_v29 = vcombine.low %v3472_v22, %v3479_v24  ;;  %v165_v30 = vrot.slane %v143_v25, %v3453_v11 }
   0xf   :  { %v151_v31 = vrot.slane %v141_v26, %v3453_v11  ;;  %v158_v32 = vrot.slane %v3061_v27, %v3453_v11  ;;  %v190_v33 = vcombine.low %v3489_v28, %v3475_v23 }
  0x10   :  { %v172_v34 = vrot.slane %v144_v29, %v3453_v11 }
  0x11   :  { %v173_v35 = vcombine.low %v151_v31, %v158_v32  ;;  %v197_v37 = vrot.slane %v190_v33, %v3453_v11 }
  0x12   :  { %v174_v36 = vcombine.low %v165_v30, %v172_v34 }
  0x13   :  { %v181_v38 = vrot.slane %v173_v35, %v3453_v11  ;;  %v204_v41 = vrot.slane %v197_v37, %v3453_v11 }
  0x14   :  { %v188_v39 = vrot.slane %v174_v36, %v3453_v11 }
  0x15   :  { %v212_v43 = vsel %vm211_vm1, %v204_v41, 0.0 }
  0x16   :  { %v189_v40 = vcombine.low %v181_v38, %v188_v39 }
  0x18   :  { %v208_v42 = vsel %vm207_vm0, %v189_v40, 0.0 }
  0x19   :  { %209 = vadd.xlane.f32.xlu0 %v208_v42 }
  0x1d   :  { %213 = vadd.xlane.f32.xlu0 %v212_v43 }
  0xa6   :  { %v210_v48 = vpop.xlane.xlu0 %209 }
  0xa7   :  { %v216_v53 = vmul.f32 0.03125, %v210_v48 }
  0xa9   :  { %v223_v56 = vrot.slane %v216_v53, %v3505_v44  ;;  %v227_v57 = vrot.slane %v216_v53, %v3507_v45  ;;  %v231_v58 = vrot.slane %v216_v53, %v3509_v46  ;;  %v235_v59 = vrot.slane %v216_v53, %v3511_v47 }
  0xaa   :  { %v214_v60 = vpop.xlane.xlu0 %213  ;;  %v239_v61 = vrot.slane %v216_v53, %v3513_v49  ;;  %v243_v62 = vrot.slane %v216_v53, %v3515_v50  ;;  %v247_v63 = vrot.slane %v216_v53, %v3517_v51  ;;  %v251_v0 = vrot.slane %v216_v53, %v3519_v52 }
  0xab   :  { %v217_v1 = vmul.f32 0.03125, %v214_v60  ;;  %v3538_v2 = vsub.f32 %v3460_v17, %v223_v56  ;;  %v3541_v3 = vsub.f32 %v3469_v21, %v227_v57  ;;  %v3544_v4 = vsub.f32 %v3523_v54, %v231_v58 }
  0xac   :  { %v3547_v5 = vsub.f32 %v3527_v55, %v235_v59  ;;  %v3550_v6 = vsub.f32 %v3463_v18, %v239_v61  ;;  %v3553_v7 = vsub.f32 %v3466_v20, %v243_v62  ;;  %v3556_v8 = vsub.f32 %v3472_v22, %v247_v63  ;;  %v3303_v62 = vld [vmem:[%s4105_s1] sm:$0xff]   ;;  %v3304_v63 = vld [vmem:[%s4105_s1 + $0x8] sm:$0xff]  }
  0xad   :  { %v255_v9 = vrot.slane %v217_v1, %v3505_v44  ;;  %v259_v10 = vrot.slane %v217_v1, %v3507_v45  ;;  %v3561_v12 = vsub.f32 %v3479_v24, %v251_v0  ;;  %v280_v13 = vmul.f32 %v3538_v2, %v3538_v2  ;;  %v3062_v0 = vld [vmem:[%s4106_s5] ss:$0 sm:$0xff] }
  0xae   :  { %v281_v14 = vmul.f32 %v3541_v3, %v3541_v3  ;;  %v282_v15 = vmul.f32 %v3544_v4, %v3544_v4  ;;  %v283_v16 = vmul.f32 %v3547_v5, %v3547_v5  ;;  %v284_v19 = vmul.f32 %v3550_v6, %v3550_v6  ;;  %v3063_v1 = vld [vmem:[%s4107_s6] ss:$0 sm:$0xff]  ;;  %s3363_s6 = smov 64  }
  0xaf   :  { %v3574_v25 = vsub.f32 %v3489_v28, %v255_v9  ;;  %v3577_v26 = vsub.f32 %v3475_v23, %v259_v10  ;;  %v285_v27 = vmul.f32 %v3553_v7, %v3553_v7  ;;  %v286_v29 = vmul.f32 %v3556_v8, %v3556_v8 }
  0xb0   :  { %v287_v30 = vmul.f32 %v3561_v12, %v3561_v12  ;;  %v300_v31 = vcombine.low %v280_v13, %v281_v14  ;;  %v301_v32 = vcombine.low %v282_v15, %v283_v16  ;;  %v4118_v61 = vmov 0.0  }
  0xb1   :  { %v288_v33 = vmul.f32 %v3574_v25, %v3574_v25  ;;  %v289_v34 = vmul.f32 %v3577_v26, %v3577_v26  ;;  %v302_v35 = vcombine.low %v284_v19, %v285_v27  ;;  %3153 = vmatprep.subr.bf16.mxu0 %v4118_v61  ;;  %3157 = vmatprep.mubr.msk.bf16.mxu0 %vm3361_vm2, %v4118_v61 }
  0xb2   :  { %v303_v36 = vcombine.low %v286_v29, %v287_v30  ;;  %v310_v37 = vrot.slane %v300_v31, %v3453_v11  ;;  %v317_v38 = vrot.slane %v301_v32, %v3453_v11  ;;  %3161 = vmatprep.subr.bf16.mxu1 %v4118_v61  ;;  %3163 = vmatprep.mubr.msk.bf16.mxu1 %vm3361_vm2, %v4118_v61 }
  0xb3   :  { %v324_v39 = vrot.slane %v302_v35, %v3453_v11  ;;  %v349_v40 = vcombine.low %v288_v33, %v289_v34  ;;  %3154 = vmatpush3.bf16.msra.mxu0 %v3303_v62  ;;  %v445_v9 = vcombine.high %v3062_v0, %v3062_v0  ;;  %v517_v10 = vcombine.high %v3063_v1, %v3063_v1 }
  0xb4   :  { %v331_v41 = vrot.slane %v303_v36, %v3453_v11  ;;  %v332_v42 = vcombine.low %v310_v37, %v317_v38  ;;  %3155 = vmatprep.subr.bf16.mxu0 %v4118_v61  ;;  %v452_v15 = vrot.slane %v3062_v0, %v3453_v11  ;;  %v524_v27 = vrot.slane %v3063_v1, %v3453_v11 }
  0xb5   :  { %v356_v53 = vrot.slane %v349_v40, %v3453_v11  ;;  %v459_v16 = vrot.slane %v445_v9, %v3453_v11  ;;  %v531_v29 = vrot.slane %v517_v10, %v3453_v11 }
  0xb6   :  { %v333_v43 = vcombine.low %v324_v39, %v331_v41  ;;  %v340_v48 = vrot.slane %v332_v42, %v3453_v11  ;;  %v460_v32 = vcombine.high %v452_v15, %v452_v15  ;;  %v532_v35 = vcombine.high %v524_v27, %v524_v27 }
  0xb7   :  { %v363_v58 = vrot.slane %v356_v53, %v3453_v11  ;;  %3156 = vmatpush3.bf16.msra.mxu0 %v3304_v63  ;;  %v461_v33 = vcombine.high %v459_v16, %v459_v16  ;;  %v533_v36 = vcombine.high %v531_v29, %v531_v29  ;;  %v468_v37 = vrot.slane %v452_v15, %v3453_v11 }
  0xb8   :  { %v347_v56 = vrot.slane %v333_v43, %v3453_v11  ;;  %3167 = vmatprep.subr.bf16.mxu0 %v4118_v61  ;;  %v482_v38 = vrot.slane %v460_v32, %v3453_v11  ;;  %v475_v39 = vrot.slane %v459_v16, %v3453_v11  ;;  %v540_v41 = vrot.slane %v524_v27, %v3453_v11 }
  0xb9   :  { %v369_v60 = vsel %vm211_vm1, %v363_v58, 0.0  ;;  %v489_v40 = vrot.slane %v461_v33, %v3453_v11  ;;  %v547_v42 = vrot.slane %v531_v29, %v3453_v11  ;;  %v554_v43 = vrot.slane %v532_v35, %v3453_v11 }
  0xba   :  { %v348_v57 = vcombine.low %v340_v48, %v347_v56  ;;  %v561_v48 = vrot.slane %v533_v36, %v3453_v11  ;;  %v490_v53 = vcombine.high %v468_v37, %v468_v37  ;;  %v491_v56 = vcombine.high %v475_v39, %v475_v39 }
  0xbb   :  { %v493_v58 = vcombine.high %v489_v40, %v489_v40  ;;  %v563_v62 = vcombine.high %v547_v42, %v547_v42  ;;  %v564_v63 = vcombine.high %v554_v43, %v554_v43 }
  0xbc   :  { %v366_v59 = vsel %vm207_vm0, %v348_v57, 0.0  ;;  %v492_v57 = vcombine.high %v482_v38, %v482_v38  ;;  %v565_v0 = vcombine.high %v561_v48, %v561_v48 }
  0xbd   :  { %367 = vadd.xlane.f32.xlu1 %v366_v59 }
  0xc1   :  { %370 = vadd.xlane.f32.xlu1 %v369_v60  ;;  %v562_v60 = vcombine.high %v540_v41, %v540_v41 }
 0x14a   :  { %v368_v13 = vpop.xlane.xlu1 %367 }
 0x14b   :  { %v372_v14 = vmul.f32 0.03125, %v368_v13 }
 0x14d   :  { %v374_v19 = vadd.f32 1e-06, %v372_v14 }
 0x14e   :  { %v371_v30 = vpop.xlane.xlu1 %370 }
 0x14f   :  { %3315 = vrsqrt.f32 %v374_v19  ;;  %v373_v31 = vmul.f32 0.03125, %v371_v30 }
 0x151   :  { %v375_v34 = vadd.f32 1e-06, %v373_v31 }
 0x153   :  { %3317 = vrsqrt.f32 %v375_v34 }
 0x159   :  { %v3316_v59 = vpop.eup %3315 }
 0x15a   :  { %v383_v1 = vrot.slane %v3316_v59, %v3505_v44  ;;  %v387_v9 = vrot.slane %v3316_v59, %v3507_v45  ;;  %v391_v10 = vrot.slane %v3316_v59, %v3509_v46  ;;  %v395_v13 = vrot.slane %v3316_v59, %v3511_v47 }
 0x15b   :  { %v399_v14 = vrot.slane %v3316_v59, %v3513_v49  ;;  %v403_v15 = vrot.slane %v3316_v59, %v3515_v50  ;;  %v407_v16 = vrot.slane %v3316_v59, %v3517_v51  ;;  %v411_v19 = vrot.slane %v3316_v59, %v3519_v52 }
 0x15c   :  { %v430_v27 = vmul.f32 %v383_v1, %v3538_v2  ;;  %v431_v29 = vmul.f32 %v387_v9, %v3541_v3  ;;  %v432_v30 = vmul.f32 %v391_v10, %v3544_v4  ;;  %v433_v31 = vmul.f32 %v395_v13, %v3547_v5 }
 0x15d   :  { %v3318_v32 = vpop.eup %3317  ;;  %v434_v33 = vmul.f32 %v399_v14, %v3550_v6  ;;  %v435_v34 = vmul.f32 %v403_v15, %v3553_v7  ;;  %v436_v35 = vmul.f32 %v407_v16, %v3556_v8  ;;  %v437_v36 = vmul.f32 %v411_v19, %v3561_v12 }
 0x15e   :  { %v415_v61 = vrot.slane %v3318_v32, %v3505_v44  ;;  %v419_v59 = vrot.slane %v3318_v32, %v3507_v45  ;;  %v502_v2 = vmul.f32 %v468_v37, %v430_v27  ;;  %v503_v1 = vmul.f32 %v482_v38, %v431_v29 }
 0x15f   :  { %v504_v3 = vmul.f32 %v490_v53, %v432_v30  ;;  %v505_v9 = vmul.f32 %v492_v57, %v433_v31  ;;  %v506_v4 = vmul.f32 %v475_v39, %v434_v33  ;;  %v507_v10 = vmul.f32 %v489_v40, %v435_v34 }
 0x160   :  { %v438_v5 = vmul.f32 %v415_v61, %v3574_v25  ;;  %v439_v6 = vmul.f32 %v419_v59, %v3577_v26  ;;  %v508_v13 = vmul.f32 %v491_v56, %v436_v35  ;;  %v509_v7 = vmul.f32 %v493_v58, %v437_v36 }
 0x161   :  { %v574_v14 = vadd.f32 %v540_v41, %v502_v2  ;;  %v575_v8 = vadd.f32 %v554_v43, %v503_v1  ;;  %v576_v15 = vadd.f32 %v562_v60, %v504_v3  ;;  %v577_v12 = vadd.f32 %v564_v63, %v505_v9 }
 0x162   :  { %v510_v16 = vmul.f32 %v468_v37, %v438_v5  ;;  %v511_v19 = vmul.f32 %v482_v38, %v439_v6  ;;  %v578_v52 = vadd.f32 %v547_v42, %v506_v4  ;;  %v579_v32 = vadd.f32 %v561_v48, %v507_v10 }
 0x163   :  { %v580_v27 = vadd.f32 %v563_v62, %v508_v13  ;;  %v581_v29 = vadd.f32 %v565_v0, %v509_v7  ;;  %v594_v53 = vcombine.low %v574_v14, %v575_v8  ;;  %v595_v57 = vcombine.low %v576_v15, %v577_v12  ;;  %v3064_v0 = vld [vmem:[%s4108_s2] ss:$0 sm:$0xff]  ;;  %s3362_s2 = smov 96  }
 0x164   :  { %v582_v39 = vadd.f32 %v540_v41, %v510_v16  ;;  %v583_v40 = vadd.f32 %v554_v43, %v511_v19  ;;  %v596_v30 = vcombine.low %v578_v52, %v579_v32  ;;  %v4123_v63 = vmov 0.0  }
 0x165   :  { %v597_v25 = vcombine.low %v580_v27, %v581_v29  ;;  %v604_v26 = vrot.slane %v594_v53, %v3453_v11  ;;  %v611_v61 = vrot.slane %v595_v57, %v3453_v11 }
 0x166   :  { %v618_v56 = vrot.slane %v596_v30, %v3453_v11  ;;  %v643_v58 = vcombine.low %v582_v39, %v583_v40 }
 0x167   :  { %v625_v37 = vrot.slane %v597_v25, %v3453_v11  ;;  %v626_v38 = vcombine.low %v604_v26, %v611_v61 }
 0x168   :  { %v650_v42 = vrot.slane %v643_v58, %v3453_v11 }
 0x169   :  { %v627_v48 = vcombine.low %v618_v56, %v625_v37  ;;  %v634_v60 = vrot.slane %v626_v38, %v3453_v11 }
 0x16a   :  { %v657_v52 = vrot.slane %v650_v42, %v3453_v11 }
 0x16b   :  { %v641_v41 = vrot.slane %v627_v48, %v3453_v11 }
 0x16d   :  { %v642_v43 = vcombine.low %v634_v60, %v641_v41 }
 0x16f   :  { %v660_v62 = vpack.c.bf16 %v657_v52, %v642_v43 }
 0x171   :  { %3158 = vmatmul.mubr.msk.bf16.vlgmr.msra.gmra.mrb[0].mxu0 %vm207_vm0, %v660_v62 }
 0x172   :  { %3169 = vmatprep.mubr.msk.bf16.mxu0 %vm3361_vm2, %v4123_v63 }
 0x244   :  { %v721_v31 = vpop.f32.mrb[0].mxu0 }
 0x245   :  { %v722_v33 = vadd.f32 %v3064_v0, %v721_v31  ;;  %v3159_v34 = vpop.f32.mrb[1].mxu0 }
 0x246   :  { %v724_v35 = vpop.f32.mrb[2].mxu0 }
 0x247   :  { %v725_v36 = vadd.f32 %v3064_v0, %v724_v35  ;;  %v3160_v59 = vpop.f32.mrb[3].mxu0  ;;  %v728_v2 = vmul.f32 0.35355338, %v722_v33 }
 0x249   :  { %v729_v1 = vmul.f32 0.35355338, %v725_v36  ;;  %v781_v3 = vpack.c.bf16 %v725_v36, %v722_v33  ;;  %v3069_v9 = vpack.c.bf16 %v725_v36, %v725_v36 }
 0x24b   :  { %v730_v4 = vpack.c.bf16 %v729_v1, %v728_v2  ;;  %v3068_v10 = vpack.c.bf16 %v729_v1, %v729_v1  ;;  %v790_v5 = vrot.slane %v781_v3, %v3453_v11  ;;  %v797_v13 = vrot.slane %v3069_v9, %v3453_v11 }
 0x24d   :  { %v739_v6 = vrot.slane %v730_v4, %v3453_v11  ;;  %v798_v7 = vcombine.high %v790_v5, %v790_v5  ;;  %v805_v14 = vrot.slane %v790_v5, %v3453_v11  ;;  %v746_v8 = vrot.slane %v3068_v10, %v3453_v11 }
 0x24e   :  { %v812_v29 = vrot.slane %v797_v13, %v3453_v11 }
 0x24f   :  { %v747_v15 = vcombine.high %v739_v6, %v739_v6  ;;  %v754_v12 = vrot.slane %v739_v6, %v3453_v11  ;;  %v819_v16 = vrot.slane %v798_v7, %v3453_v11  ;;  %v820_v19 = vcombine.high %v805_v14, %v805_v14 }
 0x250   :  { %v761_v30 = vrot.slane %v746_v8, %v3453_v11  ;;  %v831_v38 = vunpack.i.h.s16 %v812_v29 }
 0x251   :  { %v768_v32 = vrot.slane %v747_v15, %v3453_v11  ;;  %v769_v27 = vcombine.high %v754_v12, %v754_v12  ;;  %v821_v53 = vcombine.high %v819_v16, %v819_v16  ;;  %v826_v57 = vunpack.i.l.s16 %v820_v19 }
 0x252   :  { %v827_v39 = vunpack.i.h.s16 %v820_v19  ;;  %v861_v40 = vcombine.low %v805_v14, %v819_v16  ;;  %v780_v41 = vunpack.i.h.s16 %v761_v30  ;;  %v976_v34 = vrot.slane %v831_v38, %v3453_v11 }
 0x253   :  { %v770_v25 = vcombine.high %v768_v32, %v768_v32  ;;  %v776_v26 = vunpack.i.h.s16 %v769_v27  ;;  %v829_v61 = vunpack.i.h.s16 %v821_v53  ;;  %v875_v58 = vrot.slane %v826_v57, %v3453_v11 }
 0x254   :  { %v868_v56 = vrot.slane %v861_v40, %v3453_v11  ;;  %v3073_v42 = vpack.i.b16 %v821_v53, %v827_v39  ;;  %v950_v35 = vrot.slane %v780_v41, %v3453_v11  ;;  %v835_v3 = vcombine.low %v754_v12, %v768_v32 }
 0x255   :  { %v778_v37 = vunpack.i.h.s16 %v770_v25  ;;  %v3074_v48 = vpack.i.b16 %v812_v29, %v829_v61  ;;  %v3071_v52 = vpack.i.b16 %v770_v25, %v776_v26  ;;  %v775_v9 = vunpack.i.l.s16 %v769_v27 }
 0x256   :  { %v876_v60 = vcombine.low %v868_v56, %v875_v58  ;;  %v842_v4 = vrot.slane %v835_v3, %v3453_v11 }
 0x257   :  { %v3072_v43 = vpack.i.b16 %v761_v30, %v778_v37  ;;  %v962_v62 = vcombine.low %v3073_v42, %v3074_v48  ;;  %v849_v10 = vrot.slane %v775_v9, %v3453_v11  ;;  %v3365_v30 = vmov 65535  }
 0x258   :  { %v3678_v0 = vrot.slane %v876_v60, %v3453_v11  ;;  %v1066_v25 = vsel %vm1064_vm5, 4294967295, %v3365_v30 }
 0x259   :  { %v936_v31 = vcombine.low %v3071_v52, %v3072_v43  ;;  %v969_v33 = vrot.slane %v962_v62, %v3453_v11  ;;  %v850_v13 = vcombine.low %v842_v4, %v849_v10  ;;  %v3713_v56 = vsel %vm1065_vm6, %v1066_v25, 0 }
 0x25a   :  { %884 = vrot.lane.b32.xlu0 %v3678_v0, %s3362_s2 }
 0x25b   :  { %v977_v36 = vcombine.low %v969_v33, %v976_v34  ;;  %v943_v59 = vrot.slane %v936_v31, %v3453_v11  ;;  %v3695_v8 = vrot.slane %v850_v13, %v3453_v11 }
 0x25d   :  { %v3686_v2 = vrot.slane %v977_v36, %v3453_v11  ;;  %v951_v1 = vcombine.low %v943_v59, %v950_v35 }
 0x25f   :  { %985 = vrot.lane.b32.xlu1 %v3686_v2, %s3362_s2  ;;  %v3703_v15 = vrot.slane %v951_v1, %v3453_v11 }
 0x2cc   :  { %v885_v5 = vpop.permute.xlu0 %884 }
 0x2cd   :  { %v891_v6 = vsel %vm886_vm3, %v885_v5, 0 }
 0x2ce   :  { %3162 = vmatpush3.bf16.xpose.msra.mxu1 %v891_v6 }
 0x2cf   :  { %3173 = vmatprep.subr.bf16.mxu1 %v4123_v63 }
 0x2d1   :  { %v986_v7 = vpop.permute.xlu1 %985 }
 0x2d2   :  { %v991_v14 = vsel %vm886_vm3, %v986_v7, 0 }
 0x2d3   :  { %3168 = vmatpush3.bf16.xpose.msra.mxu0 %v991_v14 }
 0x2d4   :  { %3179 = vmatprep.subr.bf16.mxu0 %v4123_v63 }
 0x2d5   :  { %3164 = vmatmul.mubr.msk.bf16.vlgmr.msra.gmra.mrb[0].mxu1 %vm886_vm3, %v3695_v8 }
 0x2d6   :  { %3175 = vmatprep.mubr.msk.bf16.mxu1 %vm3361_vm2, %v4123_v63 }
 0x2da   :  { %3170 = vmatmul.mubr.msk.bf16.vlgmr.msra.gmra.mrb[4].mxu0 %vm886_vm3, %v3703_v15 }
 0x2db   :  { %3181 = vmatprep.mubr.msk.bf16.mxu0 %vm3361_vm2, %v4123_v63 }
 0x3a8   :  { %v927_v12 = vpop.f32.mrb[0].mxu1 }
 0x3a9   :  { %v3165_v16 = vpop.f32.mrb[1].mxu1  ;;  %v1034_v19 = vsel %vm1033_vm4, %v927_v12, -inf }
 0x3aa   :  { %1035 = vmax.xlane.f32.xlu1 %v1034_v19  ;;  %v930_v32 = vpop.f32.mrb[2].mxu1 }
 0x3ab   :  { %v3166_v27 = vpop.f32.mrb[3].mxu1 }
 0x3ad   :  { %v1027_v29 = vpop.f32.mrb[4].mxu0 }
 0x3ae   :  { %v3171_v53 = vpop.f32.mrb[5].mxu0  ;;  %v1037_v57 = vsel %vm1033_vm4, %v1027_v29, -inf }
 0x3af   :  { %1038 = vmax.xlane.f32.xlu0 %v1037_v57  ;;  %v1030_v39 = vpop.f32.mrb[6].mxu0 }
 0x3b0   :  { %v3172_v40 = vpop.f32.mrb[7].mxu0 }
 0x3bb   :  { %1111 = vrot.lane.b32.xlu1 %v3686_v2, %s3363_s6 }
 0x3bf   :  { %1164 = vrot.lane.b32.xlu1 %v3678_v0, %s3364_s19 }
 0x437   :  { %v1036_v26 = vpop.xlane.xlu1 %1035 }
 0x438   :  { %v1040_v61 = vsub.f32 %v927_v12, %v1036_v26 }
 0x43a   :  { %v1042_v58 = vmul.f32 1.442695, %v1040_v61 }
 0x43b   :  { %v1112_v37 = vpop.permute.xlu1 %1111 }
 0x43c   :  { %3319 = vpow2.f32 %v1042_v58  ;;  %v1117_v38 = vand.u32 %v1112_v37, %v3713_v56  ;;  %v1039_v42 = vpop.xlane.xlu0 %1038 }
 0x43d   :  { %v1041_v48 = vsub.f32 %v1027_v29, %v1039_v42 }
 0x43e   :  { %3180 = vmatpush3.bf16.msra.mxu0 %v1117_v38 }
 0x43f   :  { %v1044_v60 = vmul.f32 1.442695, %v1041_v48  ;;  %3191 = vmatprep.subr.bf16.mxu0 %v4123_v63  ;;  %v1165_v33 = vpop.permute.xlu1 %1164 }
 0x440   :  { %v1170_v4 = vsel %vm886_vm3, %v1165_v33, 0 }
 0x441   :  { %3321 = vpow2.f32 %v1044_v60 }
 0x446   :  { %v3320_v41 = vpop.eup %3319 }
 0x447   :  { %v1046_v52 = vsel %vm1033_vm4, %v3320_v41, 0.0 }
 0x448   :  { %1047 = vadd.xlane.f32.xlu0 %v1046_v52 }
 0x44b   :  { %v3322_v43 = vpop.eup %3321 }
 0x44c   :  { %v1049_v62 = vsel %vm1033_vm4, %v3322_v43, 0.0 }
 0x44d   :  { %1050 = vadd.xlane.f32.xlu1 %v1049_v62 }
 0x45e   :  { %1058 = vrot.lane.b32.xlu0 %v3678_v0, %s3363_s6  ;;  %1214 = vrot.lane.b32.xlu1 %v3686_v2, %s3364_s19 }
 0x462   :  { %1162 = vrot.lane.b32.xlu0 %v3695_v8, %s3366_s20  ;;  %1212 = vrot.lane.b32.xlu1 %v3703_v15, %s3366_s20 }
 0x4d5   :  { %v1048_v31 = vpop.xlane.xlu0 %1047 }
 0x4d6   :  { %3323 = vrcp.f32 %v1048_v31 }
 0x4d9   :  { %v1059_v34 = vpop.permute.xlu0 %1058 }
 0x4da   :  { %v1069_v35 = vand.u32 %v3713_v56, %v1059_v34  ;;  %v1051_v36 = vpop.xlane.xlu1 %1050 }
 0x4db   :  { %3325 = vrcp.f32 %v1051_v36 }
 0x4dc   :  { %3174 = vmatpush3.bf16.msra.mxu1 %v1069_v35 }
 0x4dd   :  { %3185 = vmatprep.subr.bf16.mxu1 %v4123_v63  ;;  %v1163_v7 = vpop.permute.xlu0 %1162 }
 0x4de   :  { %v1215_v5 = vpop.permute.xlu1 %1214 }
 0x4df   :  { %v1220_v13 = vsel %vm886_vm3, %v1215_v5, 0 }
 0x4e0   :  { %v3324_v59 = vpop.eup %3323 }
 0x4e1   :  { %v1054_v1 = vmul.f32 %v3324_v59, %v3320_v41 }
 0x4e2   :  { %v1213_v14 = vpop.permute.xlu1 %1212 }
 0x4e3   :  { %v1056_v3 = vpack.c.bf16 %v1054_v1, %v1054_v1 }
 0x4e5   :  { %v3326_v9 = vpop.eup %3325  ;;  %3176 = vmatmul.mubr.msk.bf16.vlgmr.msra.gmra.mrb[4].mxu1 %vm1060_vm7, %v1056_v3 }
 0x4e6   :  { %v1055_v10 = vmul.f32 %v3326_v9, %v3322_v43  ;;  %3186 = vmatpush3.bf16.xpose.msra.mxu1 %v1170_v4  ;;  %3187 = vmatprep.mubr.msk.bf16.mxu1 %vm3361_vm2, %v4123_v63 }
 0x4e7   :  { %3197 = vmatprep.subr.bf16.mxu1 %v4123_v63 }
 0x4e8   :  { %v1057_v6 = vpack.c.bf16 %v1055_v10, %v1055_v10 }
 0x4ea   :  { %3182 = vmatmul.mubr.msk.bf16.vlgmr.msra.gmra.mrb[8].mxu0 %vm1060_vm7, %v1057_v6 }
 0x4eb   :  { %3192 = vmatpush3.bf16.xpose.msra.mxu0 %v1220_v13  ;;  %3193 = vmatprep.mubr.msk.bf16.mxu0 %vm3361_vm2, %v4123_v63 }
 0x4ec   :  { %3203 = vmatprep.subr.bf16.mxu0 %v4123_v63 }
 0x4ed   :  { %3188 = vmatmul.mubr.msk.bf16.vlgmr.msra.gmra.mrb[8].mxu1 %vm886_vm3, %v1163_v7 }
 0x4ee   :  { %3199 = vmatprep.mubr.msk.bf16.mxu1 %vm3361_vm2, %v4123_v63 }
 0x4f2   :  { %3194 = vmatmul.mubr.msk.bf16.vlgmr.msra.gmra.mrb[12].mxu0 %vm886_vm3, %v1213_v14 }
 0x4f3   :  { %3205 = vmatprep.mubr.msk.bf16.mxu0 %vm3361_vm2, %v4123_v63 }
 0x5b8   :  { %v1105_v12 = vpop.f32.mrb[4].mxu1 }
 0x5b9   :  { %1160 = vst.msk [vmem:[#allocation2] sm:$0x1f] %vm1159_vm8, %v1105_v12  ;;  %v3177_v16 = vpop.f32.mrb[5].mxu1 }
 0x5ba   :  { %v1108_v19 = vpop.f32.mrb[6].mxu1 }
 0x5bb   :  { %v3178_v32 = vpop.f32.mrb[7].mxu1 }
 0x5bd   :  { %v1153_v27 = vpop.f32.mrb[8].mxu0 }
 0x5be   :  { %1161 = vst.msk [vmem:[#allocation2 + $0x8] sm:$0x1f] %vm1159_vm8, %v1153_v27  ;;  %v3183_v29 = vpop.f32.mrb[9].mxu0 }
 0x5bf   :  { %v1156_v53 = vpop.f32.mrb[10].mxu0 }
 0x5c0   :  { %v1206_v57 = vpop.f32.mrb[8].mxu1  ;;  %v3184_v39 = vpop.f32.mrb[11].mxu0 }
 0x5c1   :  { %v3189_v40 = vpop.f32.mrb[9].mxu1  ;;  %v1262_v30 = vsel %vm1033_vm4, %v1206_v57, -inf }
 0x5c2   :  { %1263 = vmax.xlane.f32.xlu0 %v1262_v30  ;;  %v1209_v25 = vpop.f32.mrb[10].mxu1 }
 0x5c3   :  { %v3190_v26 = vpop.f32.mrb[11].mxu1 }
 0x5c5   :  { %v1256_v61 = vpop.f32.mrb[12].mxu0 }
 0x5c6   :  { %v3195_v58 = vpop.f32.mrb[13].mxu0  ;;  %v1265_v37 = vsel %vm1033_vm4, %v1256_v61, -inf }
 0x5c7   :  { %1266 = vmax.xlane.f32.xlu1 %v1265_v37  ;;  %v1259_v38 = vpop.f32.mrb[14].mxu0 }
 0x5c8   :  { %v3196_v42 = vpop.f32.mrb[15].mxu0 }
 0x5d8   :  { %1334 = vrot.lane.b32.xlu1 %v3686_v2, %s3367_s21 }
 0x5dc   :  { %1395 = vrot.lane.b32.xlu1 %v3678_v0, %s3368_s22 }
 0x5e0   :  { %1445 = vrot.lane.b32.xlu1 %v3686_v2, %s3368_s22 }
 0x5e4   :  { %1443 = vrot.lane.b32.xlu1 %v3703_v15, %s3369_s23 }
 0x64f   :  { %v1264_v48 = vpop.xlane.xlu0 %1263 }
 0x650   :  { %v1268_v60 = vsub.f32 %v1206_v57, %v1264_v48 }
 0x652   :  { %v1270_v41 = vmul.f32 1.442695, %v1268_v60 }
 0x654   :  { %3327 = vpow2.f32 %v1270_v41  ;;  %v1267_v52 = vpop.xlane.xlu1 %1266 }
 0x655   :  { %v1269_v43 = vsub.f32 %v1256_v61, %v1267_v52 }
 0x657   :  { %v1272_v62 = vmul.f32 1.442695, %v1269_v43 }
 0x658   :  { %v1335_v31 = vpop.permute.xlu1 %1334 }
 0x659   :  { %3329 = vpow2.f32 %v1272_v62  ;;  %v1340_v33 = vand.u32 %v1335_v31, %v3713_v56 }
 0x65b   :  { %3204 = vmatpush3.bf16.msra.mxu0 %v1340_v33 }
 0x65c   :  { %3215 = vmatprep.subr.bf16.mxu0 %v4123_v63  ;;  %v1396_v5 = vpop.permute.xlu1 %1395 }
 0x65d   :  { %v1401_v19 = vsel %vm886_vm3, %v1396_v5, 0 }
 0x65e   :  { %v3328_v34 = vpop.eup %3327 }
 0x65f   :  { %v1274_v35 = vsel %vm1033_vm4, %v3328_v34, 0.0 }
 0x660   :  { %1275 = vadd.xlane.f32.xlu0 %v1274_v35  ;;  %v1446_v12 = vpop.permute.xlu1 %1445 }
 0x661   :  { %v1451_v32 = vsel %vm886_vm3, %v1446_v12, 0 }
 0x663   :  { %v3330_v36 = vpop.eup %3329 }
 0x664   :  { %v1277_v59 = vsel %vm1033_vm4, %v3330_v36, 0.0  ;;  %v1444_v29 = vpop.permute.xlu1 %1443 }
 0x665   :  { %1278 = vadd.xlane.f32.xlu0 %v1277_v59 }
 0x67b   :  { %1286 = vrot.lane.b32.xlu0 %v3678_v0, %s3367_s21 }
 0x67f   :  { %1393 = vrot.lane.b32.xlu0 %v3695_v8, %s3369_s23 }
 0x6ed   :  { %v1276_v1 = vpop.xlane.xlu0 %1275 }
 0x6ee   :  { %3331 = vrcp.f32 %v1276_v1 }
 0x6f2   :  { %v1279_v3 = vpop.xlane.xlu0 %1278 }
 0x6f3   :  { %3333 = vrcp.f32 %v1279_v3 }
 0x6f6   :  { %v1287_v9 = vpop.permute.xlu0 %1286 }
 0x6f7   :  { %v1292_v4 = vand.u32 %v1287_v9, %v3713_v56 }
 0x6f8   :  { %v3332_v10 = vpop.eup %3331 }
 0x6f9   :  { %v1282_v6 = vmul.f32 %v3332_v10, %v3328_v34  ;;  %3198 = vmatpush3.bf16.msra.mxu1 %v1292_v4 }
 0x6fa   :  { %3209 = vmatprep.subr.bf16.mxu1 %v4123_v63  ;;  %v1394_v27 = vpop.permute.xlu0 %1393 }
 0x6fb   :  { %v1284_v13 = vpack.c.bf16 %v1282_v6, %v1282_v6 }
 0x6fd   :  { %v3334_v7 = vpop.eup %3333  ;;  %3200 = vmatmul.mubr.msk.bf16.vlgmr.msra.gmra.mrb[12].mxu1 %vm1060_vm7, %v1284_v13 }
 0x6fe   :  { %v1283_v14 = vmul.f32 %v3334_v7, %v3330_v36  ;;  %3211 = vmatprep.mubr.msk.bf16.mxu1 %vm3361_vm2, %v4123_v63 }
 0x700   :  { %v1285_v16 = vpack.c.bf16 %v1283_v14, %v1283_v14 }
 0x702   :  { %3206 = vmatmul.mubr.msk.bf16.vlgmr.msra.gmra.mrb[16].mxu0 %vm1060_vm7, %v1285_v16  ;;  %3210 = vmatpush3.bf16.xpose.msra.mxu1 %v1401_v19 }
 0x703   :  { %3216 = vmatpush3.bf16.xpose.msra.mxu0 %v1451_v32  ;;  %3217 = vmatprep.mubr.msk.bf16.mxu0 %vm3361_vm2, %v4123_v63 }
 0x704   :  { %3227 = vmatprep.subr.bf16.mxu0 %v4123_v63  ;;  %3221 = vmatprep.subr.bf16.mxu1 %v4123_v63 }
 0x709   :  { %3212 = vmatmul.mubr.msk.bf16.vlgmr.msra.gmra.mrb[16].mxu1 %vm886_vm3, %v1394_v27 }
 0x70a   :  { %3218 = vmatmul.mubr.msk.bf16.vlgmr.msra.gmra.mrb[20].mxu0 %vm886_vm3, %v1444_v29  ;;  %3223 = vmatprep.mubr.msk.bf16.mxu1 %vm3361_vm2, %v4123_v63 }
 0x70b   :  { %3229 = vmatprep.mubr.msk.bf16.mxu0 %vm3361_vm2, %v4123_v63 }
 0x7d0   :  { %v3771_v53 = vpop.f32.mrb[12].mxu1 }
 0x7d1   :  { %v3201_v57 = vpop.f32.mrb[13].mxu1 }
 0x7d2   :  { %v1331_v39 = vpop.f32.mrb[14].mxu1 }
 0x7d3   :  { %v3202_v40 = vpop.f32.mrb[15].mxu1 }
 0x7d5   :  { %v3773_v30 = vpop.f32.mrb[16].mxu0 }
 0x7d6   :  { %v3207_v25 = vpop.f32.mrb[17].mxu0 }
 0x7d7   :  { %v1379_v26 = vpop.f32.mrb[18].mxu0 }
 0x7d8   :  { %v3208_v61 = vpop.f32.mrb[19].mxu0 }
 0x7dc   :  { %v1437_v58 = vpop.f32.mrb[16].mxu1 }
 0x7dd   :  { %v3213_v37 = vpop.f32.mrb[17].mxu1  ;;  %v1487_v38 = vpop.f32.mrb[20].mxu0  ;;  %v1493_v42 = vsel %vm1033_vm4, %v1437_v58, -inf }
 0x7de   :  { %1494 = vmax.xlane.f32.xlu0 %v1493_v42  ;;  %v1440_v48 = vpop.f32.mrb[18].mxu1  ;;  %v3219_v60 = vpop.f32.mrb[21].mxu0  ;;  %v1496_v41 = vsel %vm1033_vm4, %v1487_v38, -inf }
 0x7df   :  { %v3214_v52 = vpop.f32.mrb[19].mxu1  ;;  %1497 = vmax.xlane.f32.xlu1 %v1496_v41  ;;  %v1490_v43 = vpop.f32.mrb[22].mxu0 }
 0x7e0   :  { %v3220_v62 = vpop.f32.mrb[23].mxu0 }
 0x7f0   :  { %1565 = vrot.lane.b32.xlu1 %v3686_v2, %s3370_s24 }
 0x7f4   :  { %1626 = vrot.lane.b32.xlu1 %v3678_v0, %s3371_s25 }
 0x7f8   :  { %1676 = vrot.lane.b32.xlu1 %v3686_v2, %s3371_s25 }
 0x7fc   :  { %1674 = vrot.lane.b32.xlu1 %v3703_v15, %s3372_s26 }
 0x86b   :  { %v1495_v31 = vpop.xlane.xlu0 %1494 }
 0x86c   :  { %v1499_v33 = vsub.f32 %v1437_v58, %v1495_v31  ;;  %v1498_v34 = vpop.xlane.xlu1 %1497 }
 0x86d   :  { %v1500_v35 = vsub.f32 %v1487_v38, %v1498_v34 }
 0x86e   :  { %v1501_v36 = vmul.f32 1.442695, %v1499_v33 }
 0x86f   :  { %v1503_v59 = vmul.f32 1.442695, %v1500_v35 }
 0x870   :  { %3335 = vpow2.f32 %v1501_v36  ;;  %v1566_v1 = vpop.permute.xlu1 %1565 }
 0x871   :  { %v1571_v3 = vand.u32 %v1566_v1, %v3713_v56  ;;  %3337 = vpow2.f32 %v1503_v59 }
 0x873   :  { %3228 = vmatpush3.bf16.msra.mxu0 %v1571_v3 }
 0x874   :  { %3239 = vmatprep.subr.bf16.mxu0 %v4123_v63  ;;  %v1627_v12 = vpop.permute.xlu1 %1626 }
 0x875   :  { %v1632_v57 = vsel %vm886_vm3, %v1627_v12, 0 }
 0x878   :  { %v1677_v29 = vpop.permute.xlu1 %1676 }
 0x879   :  { %v1682_v39 = vsel %vm886_vm3, %v1677_v29, 0 }
 0x87a   :  { %v3336_v9 = vpop.eup %3335 }
 0x87b   :  { %v1505_v4 = vsel %vm1033_vm4, %v3336_v9, 0.0  ;;  %v3338_v10 = vpop.eup %3337 }
 0x87c   :  { %1506 = vadd.xlane.f32.xlu0 %v1505_v4  ;;  %v1508_v15 = vsel %vm1033_vm4, %v3338_v10, 0.0  ;;  %v1675_v25 = vpop.permute.xlu1 %1674 }
 0x880   :  { %1509 = vadd.xlane.f32.xlu0 %v1508_v15 }
 0x896   :  { %1517 = vrot.lane.b32.xlu0 %v3678_v0, %s3370_s24 }
 0x89a   :  { %1624 = vrot.lane.b32.xlu0 %v3695_v8, %s3372_s26 }
 0x909   :  { %v1507_v5 = vpop.xlane.xlu0 %1506 }
 0x90a   :  { %3339 = vrcp.f32 %v1507_v5 }
 0x90d   :  { %v1510_v6 = vpop.xlane.xlu0 %1509 }
 0x90e   :  { %3341 = vrcp.f32 %v1510_v6 }
 0x911   :  { %v1518_v13 = vpop.permute.xlu0 %1517 }
 0x912   :  { %v1523_v7 = vand.u32 %v1518_v13, %v3713_v56 }
 0x914   :  { %v3340_v14 = vpop.eup %3339  ;;  %3222 = vmatpush3.bf16.msra.mxu1 %v1523_v7 }
 0x915   :  { %v1513_v16 = vmul.f32 %v3340_v14, %v3336_v9  ;;  %3233 = vmatprep.subr.bf16.mxu1 %v4123_v63  ;;  %v1625_v40 = vpop.permute.xlu0 %1624 }
 0x917   :  { %v1515_v19 = vpack.c.bf16 %v1513_v16, %v1513_v16 }
 0x918   :  { %v3342_v32 = vpop.eup %3341 }
 0x919   :  { %v1514_v27 = vmul.f32 %v3342_v32, %v3338_v10  ;;  %3224 = vmatmul.mubr.msk.bf16.vlgmr.msra.gmra.mrb[20].mxu1 %vm1060_vm7, %v1515_v19 }
 0x91a   :  { %3235 = vmatprep.mubr.msk.bf16.mxu1 %vm3361_vm2, %v4123_v63 }
 0x91b   :  { %v1516_v8 = vpack.c.bf16 %v1514_v27, %v1514_v27 }
 0x91d   :  { %3230 = vmatmul.mubr.msk.bf16.vlgmr.msra.gmra.mrb[24].mxu0 %vm1060_vm7, %v1516_v8  ;;  %3234 = vmatpush3.bf16.xpose.msra.mxu1 %v1632_v57 }
 0x91e   :  { %3240 = vmatpush3.bf16.xpose.msra.mxu0 %v1682_v39  ;;  %3241 = vmatprep.mubr.msk.bf16.mxu0 %vm3361_vm2, %v4123_v63 }
 0x91f   :  { %3251 = vmatprep.subr.bf16.mxu0 %v4123_v63  ;;  %3245 = vmatprep.subr.bf16.mxu1 %v4123_v63 }
 0x924   :  { %3236 = vmatmul.mubr.msk.bf16.vlgmr.msra.gmra.mrb[24].mxu1 %vm886_vm3, %v1625_v40 }
 0x925   :  { %3242 = vmatmul.mubr.msk.bf16.vlgmr.msra.gmra.mrb[28].mxu0 %vm886_vm3, %v1675_v25  ;;  %3247 = vmatprep.mubr.msk.bf16.mxu1 %vm3361_vm2, %v4123_v63 }
 0x926   :  { %3253 = vmatprep.mubr.msk.bf16.mxu0 %vm3361_vm2, %v4123_v63 }
 0x9ec   :  { %v1559_v26 = vpop.f32.mrb[20].mxu1 }
 0x9ed   :  { %v3225_v61 = vpop.f32.mrb[21].mxu1 }
 0x9ee   :  { %v1562_v58 = vpop.f32.mrb[22].mxu1 }
 0x9ef   :  { %v3226_v37 = vpop.f32.mrb[23].mxu1 }
 0x9f0   :  { %v1607_v38 = vpop.f32.mrb[24].mxu0 }
 0x9f1   :  { %v3231_v42 = vpop.f32.mrb[25].mxu0 }
 0x9f2   :  { %v1610_v48 = vpop.f32.mrb[26].mxu0 }
 0x9f3   :  { %v3232_v60 = vpop.f32.mrb[27].mxu0 }
 0x9f7   :  { %v1668_v41 = vpop.f32.mrb[24].mxu1 }
 0x9f8   :  { %v3237_v52 = vpop.f32.mrb[25].mxu1  ;;  %v1718_v43 = vpop.f32.mrb[28].mxu0  ;;  %v1724_v62 = vsel %vm1033_vm4, %v1668_v41, -inf }
 0x9f9   :  { %1725 = vmax.xlane.f32.xlu0 %v1724_v62  ;;  %v1671_v31 = vpop.f32.mrb[26].mxu1  ;;  %v3243_v33 = vpop.f32.mrb[29].mxu0  ;;  %v1727_v34 = vsel %vm1033_vm4, %v1718_v43, -inf }
 0x9fa   :  { %v3238_v35 = vpop.f32.mrb[27].mxu1  ;;  %1728 = vmax.xlane.f32.xlu1 %v1727_v34  ;;  %v1721_v36 = vpop.f32.mrb[30].mxu0 }
 0x9fb   :  { %v3244_v59 = vpop.f32.mrb[31].mxu0 }
 0xa0b   :  { %1796 = vrot.lane.b32.xlu1 %v3686_v2, %s3373_s27 }
 0xa0f   :  { %1384 = vrot.lane.b32.xlu1 %v3771_v53, %s3374_s28 }
 0xa13   :  { %1386 = vrot.lane.b32.xlu1 %v3773_v30, %s3374_s28 }
 0xa17   :  { %1617 = vrot.lane.b32.xlu1 %v1607_v38, %s3375_s0 }
 0xa86   :  { %v1726_v1 = vpop.xlane.xlu0 %1725 }
 0xa87   :  { %v1730_v3 = vsub.f32 %v1668_v41, %v1726_v1  ;;  %v1729_v9 = vpop.xlane.xlu1 %1728 }
 0xa88   :  { %v1731_v4 = vsub.f32 %v1718_v43, %v1729_v9 }
 0xa89   :  { %v1732_v10 = vmul.f32 1.442695, %v1730_v3 }
 0xa8a   :  { %v1734_v15 = vmul.f32 1.442695, %v1731_v4 }
 0xa8b   :  { %3343 = vpow2.f32 %v1732_v10  ;;  %v1797_v5 = vpop.permute.xlu1 %1796 }
 0xa8c   :  { %v1802_v6 = vand.u32 %v1797_v5, %v3713_v56  ;;  %3345 = vpow2.f32 %v1734_v15 }
 0xa8e   :  { %3252 = vmatpush3.bf16.msra.mxu0 %v1802_v6 }
 0xa8f   :  { %v1385_v2 = vpop.permute.xlu1 %1384  ;;  %3265 = vmatprep.subr.bf16.mxu0 %v4123_v63 }
 0xa90   :  { %1391 = vst.msk [vmem:[#allocation2] sm:$0x1f] %vm1390_vm9, %v1385_v2 }
 0xa93   :  { %v1387_v53 = vpop.permute.xlu1 %1386 }
 0xa94   :  { %1392 = vst.msk [vmem:[#allocation2 + $0x8] sm:$0x1f] %vm1390_vm9, %v1387_v53 }
 0xa95   :  { %v3344_v30 = vpop.eup %3343 }
 0xa96   :  { %v1736_v13 = vsel %vm1033_vm4, %v3344_v30, 0.0  ;;  %v3346_v7 = vpop.eup %3345 }
 0xa97   :  { %1737 = vadd.xlane.f32.xlu0 %v1736_v13  ;;  %v1618_v14 = vpop.permute.xlu1 %1617  ;;  %v1739_v12 = vsel %vm1033_vm4, %v3346_v7, 0.0 }
 0xa98   :  { %1623 = vst.msk [vmem:[#allocation2 + $0x8] sm:$0x1f] %vm1621_vm10, %v1618_v14 }
 0xa9b   :  { %1740 = vadd.xlane.f32.xlu0 %v1739_v12 }
 0xab1   :  { %1748 = vrot.lane.b32.xlu0 %v3678_v0, %s3373_s27 }
 0xab5   :  { %1615 = vrot.lane.b32.xlu0 %v1559_v26, %s3375_s0  ;;  %v3306_v26 = vld [vmem:[%s4109_s3 + $0x8] sm:$0xff]  }
 0xb24   :  { %v1738_v16 = vpop.xlane.xlu0 %1737 }
 0xb25   :  { %3347 = vrcp.f32 %v1738_v16 }
 0xb28   :  { %v1741_v19 = vpop.xlane.xlu0 %1740 }
 0xb29   :  { %3349 = vrcp.f32 %v1741_v19 }
 0xb2c   :  { %v1749_v32 = vpop.permute.xlu0 %1748 }
 0xb2d   :  { %v1754_v27 = vand.u32 %v1749_v32, %v3713_v56  ;;  %v3305_v56 = vld [vmem:[%s4109_s3] sm:$0xff]  }
 0xb2f   :  { %v3348_v29 = vpop.eup %3347  ;;  %3246 = vmatpush3.bf16.msra.mxu1 %v1754_v27 }
 0xb30   :  { %v1744_v8 = vmul.f32 %v3348_v29, %v3344_v30  ;;  %v1616_v57 = vpop.permute.xlu0 %1615  ;;  %3257 = vmatprep.subr.bf16.mxu1 %v4123_v63 }
 0xb31   :  { %1622 = vst.msk [vmem:[#allocation2] sm:$0x1f] %vm1621_vm10, %v1616_v57 }
 0xb32   :  { %v1746_v39 = vpack.c.bf16 %v1744_v8, %v1744_v8 }
 0xb33   :  { %v3350_v40 = vpop.eup %3349 }
 0xb34   :  { %v1745_v25 = vmul.f32 %v3350_v40, %v3346_v7  ;;  %3248 = vmatmul.mubr.msk.bf16.vlgmr.msra.gmra.mrb[28].mxu1 %vm1060_vm7, %v1746_v39 }
 0xb35   :  { %3261 = vmatprep.mubr.msk.bf16.mxu1 %vm3361_vm2, %v4123_v63  ;;  %3258 = vmatpush3.bf16.msra.mxu1 %v3305_v56 }
 0xb36   :  { %v1747_v0 = vpack.c.bf16 %v1745_v25, %v1745_v25  ;;  %3259 = vmatprep.subr.bf16.mxu1 %v4123_v63 }
 0xb38   :  { %3254 = vmatmul.mubr.msk.bf16.vlgmr.msra.gmra.mrb[32].mxu0 %vm1060_vm7, %v1747_v0 }
 0xb39   :  { %3269 = vmatprep.mubr.msk.bf16.mxu0 %vm3361_vm2, %v4123_v63  ;;  %3260 = vmatpush3.bf16.msra.mxu1 %v3306_v26 }
 0xb3a   :  { %3273 = vmatprep.subr.bf16.mxu1 %v4123_v63 }
 0xc07   :  { %v1790_v61 = vpop.f32.mrb[28].mxu1 }
 0xc08   :  { %1846 = vrot.lane.b32.xlu0 %v1790_v61, %s3376_s16  ;;  %v3249_v58 = vpop.f32.mrb[29].mxu1  ;;  %v3091_v61 = vld [vmem:[%s4110_s4] ss:$0 sm:$0xff] }
 0xc09   :  { %v1793_v37 = vpop.f32.mrb[30].mxu1 }
 0xc0a   :  { %v3250_v38 = vpop.f32.mrb[31].mxu1 }
 0xc0b   :  { %v1838_v42 = vpop.f32.mrb[32].mxu0 }
 0xc0c   :  { %1848 = vrot.lane.b32.xlu1 %v1838_v42, %s3376_s16  ;;  %v3255_v48 = vpop.f32.mrb[33].mxu0 }
 0xc0d   :  { %v1841_v60 = vpop.f32.mrb[34].mxu0 }
 0xc0e   :  { %v3256_v41 = vpop.f32.mrb[35].mxu0 }
 0xc7a   :  { %v1847_v52 = vpop.permute.xlu0 %1846 }
 0xc7b   :  { %1853 = vst.msk [vmem:[#allocation2] sm:$0x1f] %vm1852_vm11, %v1847_v52 }
 0xc7e   :  { %v1849_v43 = vpop.permute.xlu1 %1848 }
 0xc7f   :  { %1854 = vst.msk [vmem:[#allocation2 + $0x8] sm:$0x1f] %vm1852_vm11, %v1849_v43 }
 0xc82   :  { %v1855_v62 = vld [vmem:[#allocation2] sm:$0x1f] }
 0xc83   :  { %v1859_v31 = vcombine.high %v1855_v62, %v1855_v62  ;;  %v1866_v33 = vrot.slane %v1855_v62, %v3453_v11 }
 0xc85   :  { %v1873_v34 = vrot.slane %v1859_v31, %v3453_v11  ;;  %v1874_v35 = vcombine.high %v1866_v33, %v1866_v33  ;;  %v1881_v59 = vrot.slane %v1866_v33, %v3453_v11 }
 0xc86   :  { %v1856_v36 = vld [vmem:[#allocation2 + $0x8] sm:$0x1f] }
 0xc87   :  { %v1895_v1 = vrot.slane %v1874_v35, %v3453_v11  ;;  %v1898_v3 = vcombine.high %v1856_v36, %v1856_v36  ;;  %v1905_v9 = vrot.slane %v1856_v36, %v3453_v11  ;;  %v1888_v4 = vrot.slane %v1873_v34, %v3453_v11 }
 0xc89   :  { %v1912_v10 = vrot.slane %v1898_v3, %v3453_v11  ;;  %v1913_v15 = vcombine.high %v1905_v9, %v1905_v9  ;;  %v1920_v5 = vrot.slane %v1905_v9, %v3453_v11  ;;  %v1937_v6 = vcombine.low %v1881_v59, %v1895_v1 }
 0xc8a   :  { %v3090_v2 = vcombine.high %v1881_v59, %v1895_v1 }
 0xc8b   :  { %v1934_v53 = vrot.slane %v1913_v15, %v3453_v11  ;;  %v1935_v30 = vcombine.high %v1920_v5, %v1920_v5  ;;  %v1939_v13 = vcombine.low %v1888_v4, %v1920_v5  ;;  %v1947_v7 = vrot.slane %v1937_v6, %v3453_v11 }
 0xc8c   :  { %v1954_v14 = vrot.slane %v3090_v2, %v3453_v11  ;;  %v1927_v12 = vrot.slane %v1912_v10, %v3453_v11 }
 0xc8d   :  { %v1936_v16 = vcombine.high %v1934_v53, %v1934_v53  ;;  %v1940_v19 = vcombine.low %v1934_v53, %v1935_v30  ;;  %v1961_v32 = vrot.slane %v1939_v13, %v3453_v11 }
 0xc8e   :  { %v1969_v29 = vcombine.low %v1947_v7, %v1954_v14 }
 0xc8f   :  { %v1968_v27 = vrot.slane %v1940_v19, %v3453_v11  ;;  %v1986_v8 = vcombine.low %v1936_v16, %v1927_v12 }
 0xc90   :  { %v1977_v40 = vrot.slane %v1969_v29, %v3453_v11 }
 0xc91   :  { %v1970_v57 = vcombine.low %v1961_v32, %v1968_v27  ;;  %v1993_v39 = vrot.slane %v1986_v8, %v3453_v11 }
 0xc93   :  { %v1984_v25 = vrot.slane %v1970_v57, %v3453_v11  ;;  %v2000_v56 = vrot.slane %v1993_v39, %v3453_v11 }
 0xc95   :  { %v1985_v0 = vcombine.low %v1977_v40, %v1984_v25 }
 0xc97   :  { %v2003_v26 = vpack.c.bf16 %v2000_v56, %v1985_v0 }
 0xc99   :  { %3262 = vmatmul.mubr.msk.bf16.vlgmr.msra.gmra.mrb[32].mxu1 %vm207_vm0, %v2003_v26 }
 0xc9a   :  { %3281 = vmatprep.mubr.msk.bf16.mxu1 %vm3361_vm2, %v4123_v63 }
 0xd6c   :  { %v2064_v58 = vpop.f32.mrb[32].mxu1 }
 0xd6d   :  { %v2065_v37 = vadd.f32 %v3091_v61, %v2064_v58  ;;  %v3263_v38 = vpop.f32.mrb[33].mxu1 }
 0xd6e   :  { %v2067_v42 = vpop.f32.mrb[34].mxu1 }
 0xd6f   :  { %v2073_v48 = vcombine.high %v2065_v37, %v2065_v37  ;;  %v2080_v60 = vrot.slane %v2065_v37, %v3453_v11  ;;  %v2068_v41 = vadd.f32 %v3091_v61, %v2067_v42  ;;  %v3264_v52 = vpop.f32.mrb[35].mxu1 }
 0xd71   :  { %v2087_v43 = vrot.slane %v2073_v48, %v3453_v11  ;;  %v2088_v62 = vcombine.high %v2080_v60, %v2080_v60  ;;  %v2096_v31 = vrot.slane %v2080_v60, %v3453_v11  ;;  %v2128_v33 = vrot.slane %v2068_v41, %v3453_v11 }
 0xd73   :  { %v2089_v34 = vcombine.high %v2087_v43, %v2087_v43  ;;  %v2103_v35 = vrot.slane %v2087_v43, %v3453_v11  ;;  %v2110_v36 = vrot.slane %v2088_v62, %v3453_v11  ;;  %v2118_v59 = vcombine.high %v2096_v31, %v2096_v31 }
 0xd74   :  { %v2129_v1 = vcombine.high %v2128_v33, %v2128_v33  ;;  %v2136_v3 = vrot.slane %v2128_v33, %v3453_v11  ;;  %v3871_v5 = vadd.f32 %v2096_v31, %v3460_v17 }
 0xd75   :  { %v2117_v9 = vrot.slane %v2089_v34, %v3453_v11  ;;  %v2119_v4 = vcombine.high %v2103_v35, %v2103_v35  ;;  %v2120_v10 = vcombine.high %v2110_v36, %v2110_v36  ;;  %v3868_v15 = vadd.f32 %v2110_v36, %v3469_v21 }
 0xd76   :  { %v3874_v6 = vadd.f32 %v2118_v59, %v3523_v54  ;;  %v2143_v2 = vrot.slane %v2129_v1, %v3453_v11  ;;  %v3881_v13 = vadd.f32 %v2103_v35, %v3463_v18  ;;  %v3887_v21 = vadd.f32 %v2136_v3, %v3489_v28  ;;  %v4124_v35 = vld [vmem:[#allocation3_spill] sm:$0xff] }
 0xd77   :  { %v2121_v53 = vcombine.high %v2117_v9, %v2117_v9  ;;  %v3878_v30 = vadd.f32 %v2120_v10, %v3527_v55  ;;  %v3884_v7 = vadd.f32 %v2117_v9, %v3466_v20  ;;  %v2176_v54 = vcombine.low %v3871_v5, %v3868_v15 }
 0xd78   :  { %v3890_v17 = vadd.f32 %v2143_v2, %v3475_v23  ;;  %v3895_v14 = vadd.f32 %v2119_v4, %v3472_v22 }
 0xd79   :  { %v3898_v55 = vadd.f32 %v2121_v53, %v3479_v24  ;;  %v2177_v18 = vcombine.low %v3874_v6, %v3878_v30  ;;  %v2178_v20 = vcombine.low %v3881_v13, %v3884_v7  ;;  %v2186_v12 = vrot.slane %v2176_v54, %v3453_v11 }
 0xd7a   :  { %v2225_v28 = vcombine.low %v3887_v21, %v3890_v17 }
 0xd7b   :  { %v2179_v23 = vcombine.low %v3895_v14, %v3898_v55  ;;  %v2193_v22 = vrot.slane %v2177_v18, %v3453_v11  ;;  %v2200_v24 = vrot.slane %v2178_v20, %v3453_v11 }
 0xd7c   :  { %v2232_v16 = vrot.slane %v2225_v28, %v3453_v11 }
 0xd7d   :  { %v2207_v19 = vrot.slane %v2179_v23, %v3453_v11  ;;  %v2208_v32 = vcombine.low %v2186_v12, %v2193_v22 }
 0xd7e   :  { %v2239_v27 = vrot.slane %v2232_v16, %v3453_v11 }
 0xd7f   :  { %v2209_v29 = vcombine.low %v2200_v24, %v2207_v19  ;;  %v2216_v57 = vrot.slane %v2208_v32, %v3453_v11 }
 0xd80   :  { %v2245_v8 = vsel %vm211_vm1, %v2239_v27, 0.0 }
 0xd81   :  { %2246 = vadd.xlane.f32.xlu1 %v2245_v8  ;;  %v2223_v39 = vrot.slane %v2209_v29, %v3453_v11 }
 0xd83   :  { %v2224_v40 = vcombine.low %v2216_v57, %v2223_v39 }
 0xd85   :  { %v2242_v25 = vsel %vm207_vm0, %v2224_v40, 0.0 }
 0xd86   :  { %2243 = vadd.xlane.f32.xlu0 %v2242_v25 }
 0xe0e   :  { %v2247_v0 = vpop.xlane.xlu1 %2246 }
 0xe0f   :  { %v2249_v56 = vmul.f32 0.03125, %v2247_v0 }
 0xe11   :  { %v2287_v26 = vrot.slane %v2249_v56, %v3505_v44  ;;  %v2291_v61 = vrot.slane %v2249_v56, %v3507_v45 }
 0xe13   :  { %v3921_v58 = vsub.f32 %v3887_v21, %v2287_v26  ;;  %v3924_v37 = vsub.f32 %v3890_v17, %v2291_v61  ;;  %v2244_v38 = vpop.xlane.xlu0 %2243 }
 0xe14   :  { %v2248_v42 = vmul.f32 0.03125, %v2244_v38 }
 0xe15   :  { %v2320_v48 = vmul.f32 %v3921_v58, %v3921_v58  ;;  %v2321_v60 = vmul.f32 %v3924_v37, %v3924_v37 }
 0xe16   :  { %v2255_v41 = vrot.slane %v2248_v42, %v3505_v44  ;;  %v2259_v52 = vrot.slane %v2248_v42, %v3507_v45  ;;  %v2263_v43 = vrot.slane %v2248_v42, %v3509_v46  ;;  %v2267_v62 = vrot.slane %v2248_v42, %v3511_v47 }
 0xe17   :  { %v2271_v31 = vrot.slane %v2248_v42, %v3513_v49  ;;  %v2275_v33 = vrot.slane %v2248_v42, %v3515_v50  ;;  %v2279_v34 = vrot.slane %v2248_v42, %v3517_v51  ;;  %v2283_v36 = vrot.slane %v2248_v42, %v4124_v35 }
 0xe18   :  { %v3939_v59 = vsub.f32 %v3871_v5, %v2255_v41  ;;  %v3942_v1 = vsub.f32 %v3868_v15, %v2259_v52  ;;  %v3945_v3 = vsub.f32 %v3874_v6, %v2263_v43  ;;  %v3948_v9 = vsub.f32 %v3878_v30, %v2267_v62  ;;  %v3095_v43 = vld [vmem:[%s4112_s7] ss:$0 sm:$0xff] }
 0xe19   :  { %v3951_v4 = vsub.f32 %v3881_v13, %v2271_v31  ;;  %v3954_v10 = vsub.f32 %v3884_v7, %v2275_v33  ;;  %v3957_v2 = vsub.f32 %v3895_v14, %v2279_v34  ;;  %v3960_v53 = vsub.f32 %v3898_v55, %v2283_v36  ;;  %v3096_v62 = vld [vmem:[%s4113_s8] ss:$0 sm:$0xff] }
 0xe1a   :  { %v2312_v54 = vmul.f32 %v3939_v59, %v3939_v59  ;;  %v2313_v18 = vmul.f32 %v3942_v1, %v3942_v1  ;;  %v2314_v20 = vmul.f32 %v3945_v3, %v3945_v3  ;;  %v2315_v28 = vmul.f32 %v3948_v9, %v3948_v9 }
 0xe1b   :  { %v2316_v23 = vmul.f32 %v3951_v4, %v3951_v4  ;;  %v2317_v12 = vmul.f32 %v3954_v10, %v3954_v10  ;;  %v2318_v22 = vmul.f32 %v3957_v2, %v3957_v2  ;;  %v2319_v16 = vmul.f32 %v3960_v53, %v3960_v53 }
 0xe1c   :  { %v2332_v24 = vcombine.low %v2312_v54, %v2313_v18  ;;  %v2333_v19 = vcombine.low %v2314_v20, %v2315_v28  ;;  %v2381_v40 = vcombine.low %v2320_v48, %v2321_v60  ;;  %v3309_v48 = vld [vmem:[%s4111_s9] sm:$0xff]   ;;  %v3310_v60 = vld [vmem:[%s4111_s9 + $0x8] sm:$0xff]   ;;  %v2477_v31 = vcombine.high %v3095_v43, %v3095_v43 }
 0xe1d   :  { %v2334_v32 = vcombine.low %v2316_v23, %v2317_v12  ;;  %v2335_v27 = vcombine.low %v2318_v22, %v2319_v16  ;;  %3266 = vmatpush3.bf16.msra.mxu0 %v3309_v48  ;;  %v2549_v33 = vcombine.high %v3096_v62, %v3096_v62  ;;  %v2484_v54 = vrot.slane %v3095_v43, %v3453_v11 }
 0xe1e   :  { %v2342_v29 = vrot.slane %v2332_v24, %v3453_v11  ;;  %v2349_v8 = vrot.slane %v2333_v19, %v3453_v11  ;;  %v2388_v61 = vrot.slane %v2381_v40, %v3453_v11  ;;  %3267 = vmatprep.subr.bf16.mxu0 %v4123_v63  ;;  %v2491_v18 = vrot.slane %v2477_v31, %v3453_v11 }
 0xe1f   :  { %v2356_v57 = vrot.slane %v2334_v32, %v3453_v11  ;;  %v2363_v39 = vrot.slane %v2335_v27, %v3453_v11  ;;  %v2556_v28 = vrot.slane %v3096_v62, %v3453_v11  ;;  %v2563_v23 = vrot.slane %v2549_v33, %v3453_v11 }
 0xe20   :  { %v2364_v25 = vcombine.low %v2342_v29, %v2349_v8  ;;  %v2395_v41 = vrot.slane %v2388_v61, %v3453_v11  ;;  %v2492_v16 = vcombine.high %v2484_v54, %v2484_v54  ;;  %v2493_v24 = vcombine.high %v2491_v18, %v2491_v18 }
 0xe21   :  { %v2365_v0 = vcombine.low %v2356_v57, %v2363_v39  ;;  %3268 = vmatpush3.bf16.msra.mxu0 %v3310_v60  ;;  %v2564_v19 = vcombine.high %v2556_v28, %v2556_v28  ;;  %v2565_v27 = vcombine.high %v2563_v23, %v2563_v23  ;;  %v2500_v29 = vrot.slane %v2484_v54, %v3453_v11 }
 0xe22   :  { %v2372_v56 = vrot.slane %v2364_v25, %v3453_v11  ;;  %v2401_v52 = vsel %vm211_vm1, %v2395_v41, 0.0  ;;  %v2514_v8 = vrot.slane %v2492_v16, %v3453_v11  ;;  %v2507_v57 = vrot.slane %v2491_v18, %v3453_v11 }
 0xe23   :  { %v2379_v26 = vrot.slane %v2365_v0, %v3453_v11  ;;  %v2521_v39 = vrot.slane %v2493_v24, %v3453_v11  ;;  %v2572_v40 = vrot.slane %v2556_v28, %v3453_v11  ;;  %v2586_v25 = vrot.slane %v2564_v19, %v3453_v11 }
 0xe24   :  { %v2579_v0 = vrot.slane %v2563_v23, %v3453_v11  ;;  %v2524_v61 = vcombine.high %v2514_v8, %v2514_v8 }
 0xe25   :  { %v2380_v38 = vcombine.low %v2372_v56, %v2379_v26  ;;  %v2593_v56 = vrot.slane %v2565_v27, %v3453_v11  ;;  %v2522_v26 = vcombine.high %v2500_v29, %v2500_v29  ;;  %v2596_v60 = vcombine.high %v2586_v25, %v2586_v25 }
 0xe26   :  { %v2595_v48 = vcombine.high %v2579_v0, %v2579_v0 }
 0xe27   :  { %v2398_v42 = vsel %vm207_vm0, %v2380_v38, 0.0  ;;  %v2523_v38 = vcombine.high %v2507_v57, %v2507_v57  ;;  %v2597_v43 = vcombine.high %v2593_v56, %v2593_v56 }
 0xe28   :  { %2399 = vadd.xlane.f32.xlu0 %v2398_v42  ;;  %v2525_v42 = vcombine.high %v2521_v39, %v2521_v39 }
 0xe2c   :  { %2402 = vadd.xlane.f32.xlu0 %v2401_v52  ;;  %v2594_v52 = vcombine.high %v2572_v40, %v2572_v40 }
 0xeb5   :  { %v2400_v34 = vpop.xlane.xlu0 %2399 }
 0xeb6   :  { %v2404_v36 = vmul.f32 0.03125, %v2400_v34 }
 0xeb8   :  { %v2406_v20 = vadd.f32 1e-06, %v2404_v36 }
 0xeb9   :  { %v2403_v12 = vpop.xlane.xlu0 %2402 }
 0xeba   :  { %3351 = vrsqrt.f32 %v2406_v20  ;;  %v2405_v22 = vmul.f32 0.03125, %v2403_v12 }
 0xebc   :  { %v2407_v32 = vadd.f32 1e-06, %v2405_v22 }
 0xebe   :  { %3353 = vrsqrt.f32 %v2407_v32 }
 0xec4   :  { %v3352_v41 = vpop.eup %3351 }
 0xec5   :  { %v2415_v62 = vrot.slane %v3352_v41, %v3505_v44  ;;  %v2419_v31 = vrot.slane %v3352_v41, %v3507_v45  ;;  %v2423_v33 = vrot.slane %v3352_v41, %v3509_v46  ;;  %v2427_v34 = vrot.slane %v3352_v41, %v3511_v47 }
 0xec6   :  { %v2431_v36 = vrot.slane %v3352_v41, %v3513_v49  ;;  %v2435_v54 = vrot.slane %v3352_v41, %v3515_v50  ;;  %v2439_v18 = vrot.slane %v3352_v41, %v3517_v51  ;;  %v2443_v20 = vrot.slane %v3352_v41, %v4124_v35 }
 0xec7   :  { %v2462_v28 = vmul.f32 %v2415_v62, %v3939_v59  ;;  %v2463_v23 = vmul.f32 %v2419_v31, %v3942_v1  ;;  %v2464_v12 = vmul.f32 %v2423_v33, %v3945_v3  ;;  %v2465_v22 = vmul.f32 %v2427_v34, %v3948_v9 }
 0xec8   :  { %v3354_v16 = vpop.eup %3353  ;;  %v2466_v46 = vmul.f32 %v2431_v36, %v3951_v4  ;;  %v2467_v47 = vmul.f32 %v2435_v54, %v3954_v10  ;;  %v2468_v49 = vmul.f32 %v2439_v18, %v3957_v2  ;;  %v2469_v50 = vmul.f32 %v2443_v20, %v3960_v53  ;;  %v3311_v18 = vld [vmem:[%s4114_s11] sm:$0xff]   ;;  %v3312_v20 = vld [vmem:[%s4114_s11 + $0x8] sm:$0xff]  }
 0xec9   :  { %v2534_v51 = vmul.f32 %v2500_v29, %v2462_v28  ;;  %v2535_v24 = vmul.f32 %v2514_v8, %v2463_v23  ;;  %v2447_v35 = vrot.slane %v3354_v16, %v3505_v44  ;;  %v2451_v59 = vrot.slane %v3354_v16, %v3507_v45  ;;  %3274 = vmatpush3.bf16.msra.mxu1 %v3311_v18  ;;  %v3313_v28 = vld [vmem:[%s4114_s11 + $0x10] sm:$0xff]   ;;  %v3314_v23 = vld [vmem:[%s4114_s11 + $0x18] sm:$0xff]  }
 0xeca   :  { %v2536_v1 = vmul.f32 %v2522_v26, %v2464_v12  ;;  %v2537_v19 = vmul.f32 %v2524_v61, %v2465_v22  ;;  %v2538_v3 = vmul.f32 %v2507_v57, %v2466_v46  ;;  %v2539_v32 = vmul.f32 %v2521_v39, %v2467_v47  ;;  %3275 = vmatprep.subr.bf16.mxu1 %v4123_v63  ;;  %v3097_v12 = vld [vmem:[%s4115_s10] ss:$0 sm:$0xff] }
 0xecb   :  { %v2470_v9 = vmul.f32 %v2447_v35, %v3921_v58  ;;  %v2471_v4 = vmul.f32 %v2451_v59, %v3924_v37  ;;  %v2540_v27 = vmul.f32 %v2523_v38, %v2468_v49  ;;  %v2541_v10 = vmul.f32 %v2525_v42, %v2469_v50 }
 0xecc   :  { %v2606_v41 = vadd.f32 %v2572_v40, %v2534_v51  ;;  %v2607_v2 = vadd.f32 %v2586_v25, %v2535_v24  ;;  %v2608_v62 = vadd.f32 %v2594_v52, %v2536_v1  ;;  %v2609_v53 = vadd.f32 %v2596_v60, %v2537_v19 }
 0xecd   :  { %v2542_v31 = vmul.f32 %v2500_v29, %v2470_v9  ;;  %v2543_v33 = vmul.f32 %v2514_v8, %v2471_v4  ;;  %v2610_v34 = vadd.f32 %v2579_v0, %v2538_v3  ;;  %v2611_v44 = vadd.f32 %v2593_v56, %v2539_v32  ;;  %3276 = vmatpush3.bf16.msra.mxu1 %v3312_v20 }
 0xece   :  { %v2612_v36 = vadd.f32 %v2595_v48, %v2540_v27  ;;  %v2613_v45 = vadd.f32 %v2597_v43, %v2541_v10  ;;  %v2626_v26 = vcombine.low %v2606_v41, %v2607_v2  ;;  %v2627_v61 = vcombine.low %v2608_v62, %v2609_v53  ;;  %3277 = vmatprep.subr.bf16.mxu1 %v4123_v63 }
 0xecf   :  { %v2614_v57 = vadd.f32 %v2572_v40, %v2542_v31  ;;  %v2615_v39 = vadd.f32 %v2586_v25, %v2543_v33  ;;  %v2628_v54 = vcombine.low %v2610_v34, %v2611_v44  ;;  %v3101_v34 = vld [vmem:[%s4116_s12] ss:$0 sm:$0xff] }
 0xed0   :  { %v2629_v58 = vcombine.low %v2612_v36, %v2613_v45  ;;  %v2636_v37 = vrot.slane %v2626_v26, %v3453_v11  ;;  %v2643_v38 = vrot.slane %v2627_v61, %v3453_v11 }
 0xed1   :  { %v2650_v42 = vrot.slane %v2628_v54, %v3453_v11  ;;  %v2675_v52 = vcombine.low %v2614_v57, %v2615_v39  ;;  %3278 = vmatpush3.bf16.msra.mxu1 %v3313_v28 }
 0xed2   :  { %v2657_v29 = vrot.slane %v2629_v58, %v3453_v11  ;;  %v2658_v8 = vcombine.low %v2636_v37, %v2643_v38  ;;  %3279 = vmatprep.subr.bf16.mxu1 %v4123_v63 }
 0xed3   :  { %v2682_v0 = vrot.slane %v2675_v52, %v3453_v11 }
 0xed4   :  { %v2659_v56 = vcombine.low %v2650_v42, %v2657_v29  ;;  %v2666_v48 = vrot.slane %v2658_v8, %v3453_v11 }
 0xed5   :  { %v2689_v25 = vrot.slane %v2682_v0, %v3453_v11  ;;  %3280 = vmatpush3.bf16.msra.mxu1 %v3314_v23 }
 0xed6   :  { %v2673_v40 = vrot.slane %v2659_v56, %v3453_v11 }
 0xed8   :  { %v2674_v60 = vcombine.low %v2666_v48, %v2673_v40 }
 0xeda   :  { %v2692_v43 = vpack.c.bf16 %v2689_v25, %v2674_v60 }
 0xedc   :  { %3270 = vmatmul.mubr.msk.bf16.vlgmr.msra.gmra.mrb[36].mxu0 %vm207_vm0, %v2692_v43 }
 0xfaf   :  { %v2753_v22 = vpop.f32.mrb[36].mxu0 }
 0xfb0   :  { %v2754_v16 = vadd.f32 %v3097_v12, %v2753_v22  ;;  %v3271_v46 = vpop.f32.mrb[37].mxu0 }
 0xfb1   :  { %v2756_v47 = vpop.f32.mrb[38].mxu0 }
 0xfb2   :  { %v2762_v49 = vmul.f32 0.044715, %v2754_v16  ;;  %v2757_v50 = vadd.f32 %v3097_v12, %v2756_v47  ;;  %v3272_v51 = vpop.f32.mrb[39].mxu0  ;;  %v2760_v41 = vmul.f32 0.5, %v2754_v16 }
 0xfb4   :  { %v2764_v24 = vmul.f32 %v2762_v49, %v2754_v16  ;;  %v2763_v35 = vmul.f32 0.044715, %v2757_v50  ;;  %v2761_v2 = vmul.f32 0.5, %v2757_v50 }
 0xfb6   :  { %v2766_v59 = vmul.f32 %v2764_v24, %v2754_v16  ;;  %v2765_v1 = vmul.f32 %v2763_v35, %v2757_v50 }
 0xfb8   :  { %v2768_v19 = vadd.f32 %v2766_v59, %v2754_v16  ;;  %v2767_v3 = vmul.f32 %v2765_v1, %v2757_v50 }
 0xfba   :  { %v2770_v32 = vmul.f32 0.7978846, %v2768_v19  ;;  %v2769_v63 = vadd.f32 %v2767_v3, %v2757_v50 }
 0xfbc   :  { %3355 = vtanh.f32 %v2770_v32  ;;  %v2771_v9 = vmul.f32 0.7978846, %v2769_v63  ;;  %v3051_v32 = vld [vmem:[%s4117_s13] sm:$0x7] }
 0xfbe   :  { %3357 = vtanh.f32 %v2771_v9 }
 0xfc6   :  { %v3356_v4 = vpop.eup %3355 }
 0xfc7   :  { %v2774_v27 = vadd.f32 1.0, %v3356_v4  ;;  %v3054_v4 = vld [vmem:[%s4117_s13 + $0x4] sm:$0x7] }
 0xfc8   :  { %v3358_v10 = vpop.eup %3357 }
 0xfc9   :  { %v2775_v62 = vadd.f32 1.0, %v3358_v10  ;;  %v2776_v53 = vmul.f32 %v2774_v27, %v2760_v41 }
 0xfcb   :  { %v2777_v31 = vmul.f32 %v2775_v62, %v2761_v2 }
 0xfcd   :  { %v2778_v33 = vpack.c.bf16 %v2777_v31, %v2776_v53 }
 0xfcf   :  { %3282 = vmatmul.mubr.msk.bf16.vlgmr.msra.gmra.mrb[36].mxu1 %vm2818_vm12, %v2778_v33 }
0x10a2   :  { %v2856_v44 = vpop.f32.mrb[36].mxu1 }
0x10a3   :  { %v2857_v36 = vadd.f32 %v3101_v34, %v2856_v44  ;;  %v3283_v45 = vpop.f32.mrb[37].mxu1 }
0x10a4   :  { %v2859_v26 = vpop.f32.mrb[38].mxu1 }
0x10a5   :  { %v2865_v61 = vcombine.high %v2857_v36, %v2857_v36  ;;  %v2872_v57 = vrot.slane %v2857_v36, %v3453_v11  ;;  %v2860_v39 = vadd.f32 %v3101_v34, %v2859_v26  ;;  %v3284_v54 = vpop.f32.mrb[39].mxu1 }
0x10a7   :  { %v2879_v58 = vrot.slane %v2865_v61, %v3453_v11  ;;  %v2880_v37 = vcombine.high %v2872_v57, %v2872_v57  ;;  %v2888_v38 = vrot.slane %v2872_v57, %v3453_v11  ;;  %v2920_v42 = vrot.slane %v2860_v39, %v3453_v11 }
0x10a9   :  { %v2881_v52 = vcombine.high %v2879_v58, %v2879_v58  ;;  %v2895_v29 = vrot.slane %v2879_v58, %v3453_v11  ;;  %v2902_v8 = vrot.slane %v2880_v37, %v3453_v11  ;;  %v2910_v0 = vcombine.high %v2888_v38, %v2888_v38 }
0x10aa   :  { %v2921_v56 = vcombine.high %v2920_v42, %v2920_v42  ;;  %v2928_v48 = vrot.slane %v2920_v42, %v3453_v11  ;;  %v2946_v18 = vadd.f32 %v2888_v38, %v3871_v5 }
0x10ab   :  { %v2909_v40 = vrot.slane %v2881_v52, %v3453_v11  ;;  %v2911_v25 = vcombine.high %v2895_v29, %v2895_v29  ;;  %v2912_v60 = vcombine.high %v2902_v8, %v2902_v8  ;;  %v2947_v43 = vadd.f32 %v2902_v8, %v3868_v15 }
0x10ac   :  { %v2948_v20 = vadd.f32 %v2910_v0, %v3874_v6  ;;  %v2950_v28 = vadd.f32 %v2895_v29, %v3881_v13  ;;  %v2935_v23 = vrot.slane %v2921_v56, %v3453_v11  ;;  %v2954_v49 = vadd.f32 %v2928_v48, %v3887_v21 }
0x10ad   :  { %v2913_v12 = vcombine.high %v2909_v40, %v2909_v40  ;;  %v2949_v22 = vadd.f32 %v2912_v60, %v3878_v30  ;;  %v2951_v16 = vadd.f32 %v2909_v40, %v3884_v7  ;;  %v2952_v46 = vadd.f32 %v2911_v25, %v3895_v14 }
0x10ae   :  { %v2966_v47 = vcombine.low %v2946_v18, %v2947_v43  ;;  %v2955_v6 = vadd.f32 %v2935_v23, %v3890_v17  ;;  %v2988_v24 = vrot.slane %v2950_v28, %v3453_v11 }
0x10af   :  { %v2967_v50 = vcombine.low %v2948_v20, %v2949_v22  ;;  %v3005_v15 = vcombine.low %v2951_v16, %v2952_v46  ;;  %v2953_v5 = vadd.f32 %v2913_v12, %v3898_v55 }
0x10b0   :  { %v2974_v13 = vrot.slane %v2966_v47, %v3453_v11  ;;  %v3027_v21 = vrot.slane %v2955_v6, %v3453_v11  ;;  %v3003_v55 = vrot.slane %v2988_v24, %v3453_v11 }
0x10b1   :  { %v2981_v51 = vrot.slane %v2967_v50, %v3453_v11  ;;  %v3006_v30 = vcombine.low %v2953_v5, %v2954_v49  ;;  %v3013_v7 = vrot.slane %v3005_v15, %v3453_v11 }
0x10b2   :  { %v3042_v3 = vrot.slane %v3027_v21, %v3453_v11 }
0x10b3   :  { %v2989_v35 = vcombine.low %v2974_v13, %v2981_v51  ;;  %v3020_v14 = vrot.slane %v3006_v30, %v3453_v11 }
0x10b5   :  { %v2996_v59 = vrot.slane %v2989_v35, %v3453_v11  ;;  %v3028_v17 = vcombine.low %v3013_v7, %v3020_v14 }
0x10b7   :  { %v3004_v1 = vcombine.low %v2996_v59, %v3003_v55  ;;  %v3035_v19 = vrot.slane %v3028_v17, %v3453_v11 }
0x10b9   :  { %v3046_v63 = vpack.c.bf16 %v3004_v1, %v3004_v1  ;;  %v3043_v9 = vcombine.low %v3035_v19, %v3042_v3 }
0x10bb   :  { %v3052_v27 = vsel %vm3050_vm15, %v3046_v63, %v3051_v32  ;;  %v3047_v10 = vpack.c.bf16 %v3043_v9, %v3043_v9 }
0x10bc   :  { %3053 = vst [vmem:[%s4117_s13] sm:$0x7] %v3052_v27 }
0x10bd   :  { %v3055_v41 = vsel %vm3050_vm15, %v3047_v10, %v3054_v4 }
0x10be   :  { %3056 = vst [vmem:[%s4117_s13 + $0x4] sm:$0x7] %v3055_v41 }

</bundles_post_ra>
